<compile_context>
chip_gen: v7x
topology: tpu7x:2x2x1
jax: 0.10.0
libtpu: 0.0.40
codegen_flags: <defaults>
</compile_context>

<pallas_src>
import functools

import jax
import jax.numpy as jnp
from jax.experimental import pallas as pl
from jax.experimental.pallas import tpu as pltpu


def _convlstm_cell_kernel(x_ref, hprev_ref, cprev_ref, w_ref, b_ref,
                          h_ref, c_ref, acc_ref, *, H, W, K, Cin, Ch):
    """One ConvLSTM cell step for one batch element.

    x_ref:     (1, H, W, Cin)       layer input, NHWC, f32
    hprev_ref: (1, H, W, Ch)        previous hidden state, NHWC, f32
    cprev_ref: (1, H*W, Ch)         previous cell state (flattened spatial), f32
    w_ref:     (K, K*Cc, 4*Ch)      conv weights, per-dy slabs (dx folded), bf16
    b_ref:     (1, 4*Ch)            conv bias, f32
    h_ref:     (1, H*W, Ch)         new hidden state (out)
    c_ref:     (1, H*W, Ch)         new cell state   (out)
    acc_ref:   (H*W, 4*Ch) f32 VMEM scratch accumulator
    """
    Cc = Cin + Ch
    pad = K // 2
    HW = H * W

    # ---- in-kernel concat(x, h_prev) + zero halo + dx-tap lane packing -----
    comb = jnp.concatenate([x_ref[0], hprev_ref[0]], axis=-1)      # (H, W, Cc) f32
    if pad > 0:
        zw = jnp.zeros((H, pad, Cc), comb.dtype)
        combw = jnp.concatenate([zw, comb, zw], axis=1)            # (H, W+2p, Cc)
    else:
        combw = comb
    # im2col-lite along dx: pack the K horizontal taps into the lane dim once,
    # so each matmul contracts over K*Cc instead of Cc.
    packed = jnp.concatenate(
        [combw[:, dx:dx + W, :] for dx in range(K)], axis=-1)      # (H, W, K*Cc)
    packed = packed.astype(jnp.bfloat16)                           # MXU operand dtype
    if pad > 0:
        zh = jnp.zeros((pad, W, K * Cc), jnp.bfloat16)
        s = jnp.concatenate([zh, packed, zh], axis=0)              # (H+2p, W, K*Cc)
    else:
        s = packed

    # ---- conv as K deep matmuls accumulated in the f32 VMEM scratch --------
    acc_ref[...] = jnp.broadcast_to(b_ref[...], (HW, 4 * Ch))      # bias-fused init
    for dy in range(K):
        patch = s[dy:dy + H].reshape(HW, K * Cc)                   # (HW, K*Cc) bf16
        acc_ref[...] += jnp.dot(patch, w_ref[dy],
                                preferred_element_type=jnp.float32)

    # ---- gates + state update (all f32) ------------------------------------
    acc = acc_ref[...]                                             # (HW, 4*Ch)
    sig = jax.nn.sigmoid(acc[:, :3 * Ch])    # one fused EUP pass for i, f, o
    g = jnp.tanh(acc[:, 3 * Ch:])
    i = sig[:, :Ch]
    f = sig[:, Ch:2 * Ch]
    o = sig[:, 2 * Ch:]

    c_prev = cprev_ref[0]                                          # (HW, Ch)
    c_cur = f * c_prev + i * g
    h_cur = o * jnp.tanh(c_cur)

    h_ref[0] = h_cur.astype(h_ref.dtype)
    c_ref[0] = c_cur.astype(c_ref.dtype)


def convlstm_cell(x_nhwc, h_prev_nhwc, c_prev_flat, w_slabs, bias2):
    """Single ConvLSTMCell forward.

    x_nhwc:      (B, H, W, Cin)   f32
    h_prev_nhwc: (B, H, W, Ch)    f32
    c_prev_flat: (B, H*W, Ch)     f32
    w_slabs:     (K, K*Cc, 4*Ch)  bf16 (per-dy weight slabs, dx folded)
    bias2:       (1, 4*Ch)        f32
    Returns (h_new, c_new) as (B, H*W, Ch) f32.
    """
    B, H, W, Cin = x_nhwc.shape
    Ch = h_prev_nhwc.shape[-1]
    K = w_slabs.shape[0]
    Cc = Cin + Ch
    HW = H * W

    kernel = functools.partial(_convlstm_cell_kernel,
                               H=H, W=W, K=K, Cin=Cin, Ch=Ch)

    h_new, c_new = pl.pallas_call(
        kernel,
        out_shape=(jax.ShapeDtypeStruct((B, HW, Ch), x_nhwc.dtype),
                   jax.ShapeDtypeStruct((B, HW, Ch), x_nhwc.dtype)),
        grid=(B,),
        in_specs=[
            pl.BlockSpec((1, H, W, Cin), lambda b: (b, 0, 0, 0)),
            pl.BlockSpec((1, H, W, Ch), lambda b: (b, 0, 0, 0)),
            pl.BlockSpec((1, HW, Ch), lambda b: (b, 0, 0)),
            pl.BlockSpec((K, K * Cc, 4 * Ch), lambda b: (0, 0, 0)),
            pl.BlockSpec((1, 4 * Ch), lambda b: (0, 0)),
        ],
        out_specs=(
            pl.BlockSpec((1, HW, Ch), lambda b: (b, 0, 0)),
            pl.BlockSpec((1, HW, Ch), lambda b: (b, 0, 0)),
        ),
        scratch_shapes=[pltpu.VMEM((HW, 4 * Ch), jnp.float32)],
        input_output_aliases={2: 1},   # reuse c_prev's buffer for c_new
        compiler_params=pltpu.CompilerParams(
            dimension_semantics=("parallel",),
            vmem_limit_bytes=32 * 1024 * 1024),
    )(x_nhwc, h_prev_nhwc, c_prev_flat, w_slabs, bias2)
    return h_new, c_new


class ConvLSTMPallas:
    """JAX/Pallas equivalent of the PyTorch ConvLSTM module (forward only)."""

    def __init__(self, in_channels, h_channels, num_layers, kernel_size, key):
        self.in_channels = in_channels
        self.h_channels = list(h_channels)
        self.num_layers = num_layers
        self.kernel_size = kernel_size
        self.params = []      # kernel-ready: (w (K, K*Cc, 4*Ch) bf16, b (1, 4*Ch) f32)
        self.ref_params = []  # reference:    (w (K, K, Cc, 4*Ch) f32, b (4*Ch,) f32)
        for i in range(num_layers):
            cin = in_channels if i == 0 else h_channels[i - 1]
            cc = cin + h_channels[i]
            key, wk, bk = jax.random.split(key, 3)
            # nn.Conv2d default init: uniform(-1/sqrt(fan_in), 1/sqrt(fan_in)).
            fan_in = cc * kernel_size * kernel_size
            bound = 1.0 / (fan_in ** 0.5)
            w = jax.random.uniform(
                wk, (kernel_size, kernel_size, cc, 4 * h_channels[i]),
                jnp.float32, -bound, bound)
            b = jax.random.uniform(
                bk, (4 * h_channels[i],), jnp.float32, -bound, bound)
            # Fold the dx taps into the contraction dim (per-dy weight slabs);
            # MXU operands are bf16, bias stays f32.
            w_slabs = w.reshape(kernel_size, kernel_size * cc,
                                4 * h_channels[i]).astype(jnp.bfloat16)
            self.params.append((w_slabs, b.reshape(1, 4 * h_channels[i])))
            self.ref_params.append((w, b))
        self._forward = jax.jit(self._forward_impl)

    def _forward_impl(self, x_nchw, hidden_nchw, cell_nchw):
        B, _, H, W = x_nchw.shape
        HW = H * W
        inp = jnp.transpose(x_nchw, (0, 2, 3, 1))                  # -> NHWC
        out_h, out_c = [], []
        for i in range(self.num_layers):
            ch = self.h_channels[i]
            h_prev = jnp.transpose(hidden_nchw[i], (0, 2, 3, 1))
            c_prev = jnp.transpose(cell_nchw[i], (0, 2, 3, 1)).reshape(B, HW, ch)
            w_slabs, bias2 = self.params[i]
            h_flat, c_flat = convlstm_cell(inp, h_prev, c_prev, w_slabs, bias2)
            h_nhwc = h_flat.reshape(B, H, W, ch)
            out_h.append(jnp.transpose(h_nhwc, (0, 3, 1, 2)))
            out_c.append(jnp.transpose(c_flat.reshape(B, H, W, ch), (0, 3, 1, 2)))
            inp = h_nhwc                                           # feeds next layer
        return out_h, out_c

    def __call__(self, x_nchw, states=(None, None)):
        # PyTorch-style NCHW in / NCHW out.
        B, _, H, W = x_nchw.shape
        if states[0] is None and states[1] is None:
            hidden = [jnp.zeros((B, ch, H, W), x_nchw.dtype)
                      for ch in self.h_channels]
            cell = [jnp.zeros((B, ch, H, W), x_nchw.dtype)
                    for ch in self.h_channels]
        else:
            hidden, cell = states
        return self._forward(x_nchw, hidden, cell)


# ---------------------- pure-JAX reference (for checking) -------------------
def _convlstm_cell_ref(x_nhwc, h_prev, c_prev, w_hwio, bias):
    comb = jnp.concatenate([x_nhwc, h_prev], axis=-1)
    pre = jax.lax.conv_general_dilated(
        comb, w_hwio, window_strides=(1, 1), padding="SAME",
        dimension_numbers=("NHWC", "HWIO", "NHWC")) + bias
    ch = h_prev.shape[-1]
    i = jax.nn.sigmoid(pre[..., :ch])
    f = jax.nn.sigmoid(pre[..., ch:2 * ch])
    o = jax.nn.sigmoid(pre[..., 2 * ch:3 * ch])
    g = jnp.tanh(pre[..., 3 * ch:])
    c = f * c_prev + i * g
    h = o * jnp.tanh(c)
    return h, c


def _ref_forward(model, x_nchw):
    B, _, H, W = x_nchw.shape
    inp = jnp.transpose(x_nchw, (0, 2, 3, 1))
    hs, cs = [], []
    for i in range(model.num_layers):
        ch = model.h_channels[i]
        h0 = jnp.zeros((B, H, W, ch), inp.dtype)
        c0 = jnp.zeros((B, H, W, ch), inp.dtype)
        w, b = model.ref_params[i]
        h, c = _convlstm_cell_ref(inp, h0, c0, w, b)
        hs.append(jnp.transpose(h, (0, 3, 1, 2)))
        cs.append(jnp.transpose(c, (0, 3, 1, 2)))
        inp = h
    return hs, cs


if __name__ == "__main__":
    key = jax.random.PRNGKey(0)
    key, xk, pk = jax.random.split(key, 3)

    # Small shapes consistent with the module: batch=2, in_channels=4,
    # spatial 16x16, two layers with 32 hidden channels each, kernel 3.
    B, Cin, H, W = 2, 4, 16, 16
    h_channels = [32, 32]
    num_layers = 2
    kernel_size = 3

    x = jax.random.normal(xk, (B, Cin, H, W), jnp.float32)  # NCHW like PyTorch

    model = ConvLSTMPallas(Cin, h_channels, num_layers, kernel_size, pk)
    hidden_states, cell_states = model(x, states=(None, None))

    for t in list(hidden_states) + list(cell_states):
        jax.block_until_ready(t)

    assert hidden_states[0].shape == (B, h_channels[0], H, W)
    assert cell_states[1].shape == (B, h_channels[1], H, W)

    # Correctness check vs. a pure-JAX reference (bf16 MXU operands in the
    # kernel vs f32 conv in the reference -> loose tolerance).
    ref_h, ref_c = _ref_forward(model, x)
    for got, ref in zip(list(hidden_states) + list(cell_states),
                        list(ref_h) + list(ref_c)):
        err = float(jnp.max(jnp.abs(got - ref)))
        assert err < 5e-2, f"max abs err vs reference: {err}"

    print("KERNEL_OK")
</pallas_src>

<mosaic_0001>
module attributes {stable_mosaic.version = 11 : i64} {
  func.func @_convlstm_cell_kernel(%arg0: i32, %arg1: memref<1x16x16x4xf32, #tpu.memory_space<vmem>>, %arg2: memref<1x16x16x32xf32, #tpu.memory_space<vmem>>, %arg3: memref<1x256x32xf32, #tpu.memory_space<vmem>>, %arg4: memref<3x108x128xbf16, #tpu.memory_space<vmem>>, %arg5: memref<1x128xf32, #tpu.memory_space<vmem>>, %arg6: memref<1x256x32xf32, #tpu.memory_space<vmem>>, %arg7: memref<1x256x32xf32, #tpu.memory_space<vmem>>, %arg8: memref<256x128xf32, #tpu.memory_space<vmem>>) attributes {dimension_semantics = [#tpu.dimension_semantics<parallel>], iteration_bounds = array<i64: 2>, scalar_prefetch = 0 : i64, scratch_operands = 1 : i64, tpu.core_type = #tpu.core_type<tc>, window_params = [{transform_indices = @transform_0, window_bounds = array<i64: 1, 16, 16, 4>}, {transform_indices = @transform_1, window_bounds = array<i64: 1, 16, 16, 32>}, {transform_indices = @transform_2, window_bounds = array<i64: 1, 256, 32>}, {pipeline_mode = #tpu.pipeline_mode<synchronous>, transform_indices = @transform_3, window_bounds = array<i64: 3, 108, 128>}, {pipeline_mode = #tpu.pipeline_mode<synchronous>, transform_indices = @transform_4, window_bounds = array<i64: 1, 128>}, {transform_indices = @transform_5, window_bounds = array<i64: 1, 256, 32>}, {transform_indices = @transform_6, window_bounds = array<i64: 1, 256, 32>}]} {
    %c0 = arith.constant 0 : index
    %c0_0 = arith.constant 0 : index
    %c0_1 = arith.constant 0 : index
    %c0_2 = arith.constant 0 : index
    %0 = vector.load %arg1[%c0, %c0_0, %c0_1, %c0_2] : memref<1x16x16x4xf32, #tpu.memory_space<vmem>>, vector<1x16x16x4xf32>
    %1 = vector.shape_cast %0 : vector<1x16x16x4xf32> to vector<16x16x4xf32>
    %c0_3 = arith.constant 0 : index
    %c0_4 = arith.constant 0 : index
    %c0_5 = arith.constant 0 : index
    %c0_6 = arith.constant 0 : index
    %2 = vector.load %arg2[%c0_3, %c0_4, %c0_5, %c0_6] : memref<1x16x16x32xf32, #tpu.memory_space<vmem>>, vector<1x16x16x32xf32>
    %3 = vector.shape_cast %2 : vector<1x16x16x32xf32> to vector<16x16x32xf32>
    %4 = tpu.concatenate %1, %3 in 2 : vector<16x16x4xf32>, vector<16x16x32xf32> -> vector<16x16x36xf32>
    %cst = arith.constant 0.000000e+00 : f32
    %5 = vector.broadcast %cst : f32 to vector<16x1x36xf32>
    %6 = tpu.concatenate %5, %4, %5 in 1 : vector<16x1x36xf32>, vector<16x16x36xf32>, vector<16x1x36xf32> -> vector<16x18x36xf32>
    %7 = vector.extract_strided_slice %6 {offsets = [0, 0, 0], sizes = [16, 16, 36], strides = [1, 1, 1]} : vector<16x18x36xf32> to vector<16x16x36xf32>
    %8 = vector.extract_strided_slice %6 {offsets = [0, 1, 0], sizes = [16, 16, 36], strides = [1, 1, 1]} : vector<16x18x36xf32> to vector<16x16x36xf32>
    %9 = vector.extract_strided_slice %6 {offsets = [0, 2, 0], sizes = [16, 16, 36], strides = [1, 1, 1]} : vector<16x18x36xf32> to vector<16x16x36xf32>
    %10 = tpu.concatenate %7, %8, %9 in 2 : vector<16x16x36xf32>, vector<16x16x36xf32>, vector<16x16x36xf32> -> vector<16x16x108xf32>
    %11 = arith.truncf %10 : vector<16x16x108xf32> to vector<16x16x108xbf16>
    %cst_7 = arith.constant 0.000000e+00 : bf16
    %12 = vector.broadcast %cst_7 : bf16 to vector<1x16x108xbf16>
    %13 = tpu.concatenate %12, %11, %12 in 0 : vector<1x16x108xbf16>, vector<16x16x108xbf16>, vector<1x16x108xbf16> -> vector<18x16x108xbf16>
    %c0_8 = arith.constant 0 : index
    %c0_9 = arith.constant 0 : index
    %14 = vector.load %arg5[%c0_8, %c0_9] : memref<1x128xf32, #tpu.memory_space<vmem>>, vector<1x128xf32>
    %15 = vector.shape_cast %14 : vector<1x128xf32> to vector<1x128xf32>
    %16 = vector.broadcast %15 : vector<1x128xf32> to vector<256x128xf32>
    %c0_10 = arith.constant 0 : index
    %c0_11 = arith.constant 0 : index
    %17 = vector.load %arg8[%c0_10, %c0_11] : memref<256x128xf32, #tpu.memory_space<vmem>>, vector<256x128xf32>
    tpu.vector_store %arg8[%c0_10, %c0_11], %16 {strides = array<i32>} : memref<256x128xf32, #tpu.memory_space<vmem>>, vector<256x128xf32>,
    %18 = vector.extract_strided_slice %13 {offsets = [0, 0, 0], sizes = [16, 16, 108], strides = [1, 1, 1]} : vector<18x16x108xbf16> to vector<16x16x108xbf16>
    %19 = vector.shape_cast %18 : vector<16x16x108xbf16> to vector<256x108xbf16>
    %c0_12 = arith.constant 0 : index
    %c0_13 = arith.constant 0 : index
    %20 = vector.load %arg8[%c0_12, %c0_13] : memref<256x128xf32, #tpu.memory_space<vmem>>, vector<256x128xf32>
    %c0_14 = arith.constant 0 : index
    %c0_15 = arith.constant 0 : index
    %c0_16 = arith.constant 0 : index
    %21 = vector.load %arg4[%c0_14, %c0_15, %c0_16] : memref<3x108x128xbf16, #tpu.memory_space<vmem>>, vector<1x108x128xbf16>
    %22 = vector.shape_cast %21 : vector<1x108x128xbf16> to vector<108x128xbf16>
    %cst_17 = arith.constant dense<0.000000e+00> : vector<256x128xf32>
    %23 = tpu.matmul %19, %22, %cst_17 {dimension_numbers = #tpu.dot_dimension_numbers<[1], [0], [0], [1], [0, 0, 1, 1], [], []>} : vector<256x108xbf16>, vector<108x128xbf16>, vector<256x128xf32> -> vector<256x128xf32>
    %24 = arith.addf %20, %23 : vector<256x128xf32>
    %c0_18 = arith.constant 0 : index
    %c0_19 = arith.constant 0 : index
    %25 = vector.load %arg8[%c0_18, %c0_19] : memref<256x128xf32, #tpu.memory_space<vmem>>, vector<256x128xf32>
    tpu.vector_store %arg8[%c0_18, %c0_19], %24 {strides = array<i32>} : memref<256x128xf32, #tpu.memory_space<vmem>>, vector<256x128xf32>,
    %26 = vector.extract_strided_slice %13 {offsets = [1, 0, 0], sizes = [16, 16, 108], strides = [1, 1, 1]} : vector<18x16x108xbf16> to vector<16x16x108xbf16>
    %27 = vector.shape_cast %26 : vector<16x16x108xbf16> to vector<256x108xbf16>
    %c0_20 = arith.constant 0 : index
    %c0_21 = arith.constant 0 : index
    %28 = vector.load %arg8[%c0_20, %c0_21] : memref<256x128xf32, #tpu.memory_space<vmem>>, vector<256x128xf32>
    %c1 = arith.constant 1 : index
    %c0_22 = arith.constant 0 : index
    %c0_23 = arith.constant 0 : index
    %29 = vector.load %arg4[%c1, %c0_22, %c0_23] : memref<3x108x128xbf16, #tpu.memory_space<vmem>>, vector<1x108x128xbf16>
    %30 = vector.shape_cast %29 : vector<1x108x128xbf16> to vector<108x128xbf16>
    %cst_24 = arith.constant dense<0.000000e+00> : vector<256x128xf32>
    %31 = tpu.matmul %27, %30, %cst_24 {dimension_numbers = #tpu.dot_dimension_numbers<[1], [0], [0], [1], [0, 0, 1, 1], [], []>} : vector<256x108xbf16>, vector<108x128xbf16>, vector<256x128xf32> -> vector<256x128xf32>
    %32 = arith.addf %28, %31 : vector<256x128xf32>
    %c0_25 = arith.constant 0 : index
    %c0_26 = arith.constant 0 : index
    %33 = vector.load %arg8[%c0_25, %c0_26] : memref<256x128xf32, #tpu.memory_space<vmem>>, vector<256x128xf32>
    tpu.vector_store %arg8[%c0_25, %c0_26], %32 {strides = array<i32>} : memref<256x128xf32, #tpu.memory_space<vmem>>, vector<256x128xf32>,
    %34 = vector.extract_strided_slice %13 {offsets = [2, 0, 0], sizes = [16, 16, 108], strides = [1, 1, 1]} : vector<18x16x108xbf16> to vector<16x16x108xbf16>
    %35 = vector.shape_cast %34 : vector<16x16x108xbf16> to vector<256x108xbf16>
    %c0_27 = arith.constant 0 : index
    %c0_28 = arith.constant 0 : index
    %36 = vector.load %arg8[%c0_27, %c0_28] : memref<256x128xf32, #tpu.memory_space<vmem>>, vector<256x128xf32>
    %c2 = arith.constant 2 : index
    %c0_29 = arith.constant 0 : index
    %c0_30 = arith.constant 0 : index
    %37 = vector.load %arg4[%c2, %c0_29, %c0_30] : memref<3x108x128xbf16, #tpu.memory_space<vmem>>, vector<1x108x128xbf16>
    %38 = vector.shape_cast %37 : vector<1x108x128xbf16> to vector<108x128xbf16>
    %cst_31 = arith.constant dense<0.000000e+00> : vector<256x128xf32>
    %39 = tpu.matmul %35, %38, %cst_31 {dimension_numbers = #tpu.dot_dimension_numbers<[1], [0], [0], [1], [0, 0, 1, 1], [], []>} : vector<256x108xbf16>, vector<108x128xbf16>, vector<256x128xf32> -> vector<256x128xf32>
    %40 = arith.addf %36, %39 : vector<256x128xf32>
    %c0_32 = arith.constant 0 : index
    %c0_33 = arith.constant 0 : index
    %41 = vector.load %arg8[%c0_32, %c0_33] : memref<256x128xf32, #tpu.memory_space<vmem>>, vector<256x128xf32>
    tpu.vector_store %arg8[%c0_32, %c0_33], %40 {strides = array<i32>} : memref<256x128xf32, #tpu.memory_space<vmem>>, vector<256x128xf32>,
    %c0_34 = arith.constant 0 : index
    %c0_35 = arith.constant 0 : index
    %42 = vector.load %arg8[%c0_34, %c0_35] : memref<256x128xf32, #tpu.memory_space<vmem>>, vector<256x128xf32>
    %43 = vector.extract_strided_slice %42 {offsets = [0, 0], sizes = [256, 96], strides = [1, 1]} : vector<256x128xf32> to vector<256x96xf32>
    %44 = arith.negf %43 : vector<256x96xf32>
    %45 = math.exp %44 : vector<256x96xf32>
    %cst_36 = arith.constant 1.000000e+00 : f32
    %46 = vector.broadcast %cst_36 : f32 to vector<256x96xf32>
    %47 = arith.addf %46, %45 : vector<256x96xf32>
    %48 = arith.divf %46, %47 : vector<256x96xf32>
    %49 = vector.extract_strided_slice %42 {offsets = [0, 96], sizes = [256, 32], strides = [1, 1]} : vector<256x128xf32> to vector<256x32xf32>
    %50 = math.tanh %49 : vector<256x32xf32>
    %51 = vector.extract_strided_slice %48 {offsets = [0, 0], sizes = [256, 32], strides = [1, 1]} : vector<256x96xf32> to vector<256x32xf32>
    %52 = vector.extract_strided_slice %48 {offsets = [0, 32], sizes = [256, 32], strides = [1, 1]} : vector<256x96xf32> to vector<256x32xf32>
    %53 = vector.extract_strided_slice %48 {offsets = [0, 64], sizes = [256, 32], strides = [1, 1]} : vector<256x96xf32> to vector<256x32xf32>
    %c0_37 = arith.constant 0 : index
    %c0_38 = arith.constant 0 : index
    %c0_39 = arith.constant 0 : index
    %54 = vector.load %arg3[%c0_37, %c0_38, %c0_39] : memref<1x256x32xf32, #tpu.memory_space<vmem>>, vector<1x256x32xf32>
    %55 = vector.shape_cast %54 : vector<1x256x32xf32> to vector<256x32xf32>
    %56 = arith.mulf %52, %55 : vector<256x32xf32>
    %57 = arith.mulf %51, %50 : vector<256x32xf32>
    %58 = arith.addf %56, %57 : vector<256x32xf32>
    %59 = math.tanh %58 : vector<256x32xf32>
    %60 = arith.mulf %53, %59 : vector<256x32xf32>
    %c0_40 = arith.constant 0 : index
    %c0_41 = arith.constant 0 : index
    %c0_42 = arith.constant 0 : index
    %61 = vector.load %arg6[%c0_40, %c0_41, %c0_42] : memref<1x256x32xf32, #tpu.memory_space<vmem>>, vector<1x256x32xf32>
    %62 = vector.shape_cast %61 : vector<1x256x32xf32> to vector<256x32xf32>
    %63 = vector.shape_cast %60 : vector<256x32xf32> to vector<1x256x32xf32>
    tpu.vector_store %arg6[%c0_40, %c0_41, %c0_42], %63 {strides = array<i32>} : memref<1x256x32xf32, #tpu.memory_space<vmem>>, vector<1x256x32xf32>,
    %c0_43 = arith.constant 0 : index
    %c0_44 = arith.constant 0 : index
    %c0_45 = arith.constant 0 : index
    %64 = vector.load %arg7[%c0_43, %c0_44, %c0_45] : memref<1x256x32xf32, #tpu.memory_space<vmem>>, vector<1x256x32xf32>
    %65 = vector.shape_cast %64 : vector<1x256x32xf32> to vector<256x32xf32>
    %66 = vector.shape_cast %58 : vector<256x32xf32> to vector<1x256x32xf32>
    tpu.vector_store %arg7[%c0_43, %c0_44, %c0_45], %66 {strides = array<i32>} : memref<1x256x32xf32, #tpu.memory_space<vmem>>, vector<1x256x32xf32>,
    return
  }
  func.func @transform_0(%arg0: i32) -> (i32, i32, i32, i32) {
    %c0_i32 = arith.constant 0 : i32
    %c0_i32_0 = arith.constant 0 : i32
    %c0_i32_1 = arith.constant 0 : i32
    %c0_i32_2 = arith.constant 0 : i32
    return %arg0, %c0_i32, %c0_i32_0, %c0_i32_1 : i32, i32, i32, i32
  }
  func.func @transform_1(%arg0: i32) -> (i32, i32, i32, i32) {
    %c0_i32 = arith.constant 0 : i32
    %c0_i32_0 = arith.constant 0 : i32
    %c0_i32_1 = arith.constant 0 : i32
    %c0_i32_2 = arith.constant 0 : i32
    return %arg0, %c0_i32, %c0_i32_0, %c0_i32_1 : i32, i32, i32, i32
  }
  func.func @transform_2(%arg0: i32) -> (i32, i32, i32) {
    %c0_i32 = arith.constant 0 : i32
    %c0_i32_0 = arith.constant 0 : i32
    %c0_i32_1 = arith.constant 0 : i32
    return %arg0, %c0_i32, %c0_i32_0 : i32, i32, i32
  }
  func.func @transform_3(%arg0: i32) -> (i32, i32, i32) {
    %c0_i32 = arith.constant 0 : i32
    %c0_i32_0 = arith.constant 0 : i32
    %c0_i32_1 = arith.constant 0 : i32
    %c0_i32_2 = arith.constant 0 : i32
    return %c0_i32, %c0_i32_0, %c0_i32_1 : i32, i32, i32
  }
  func.func @transform_4(%arg0: i32) -> (i32, i32) {
    %c0_i32 = arith.constant 0 : i32
    %c0_i32_0 = arith.constant 0 : i32
    %c0_i32_1 = arith.constant 0 : i32
    return %c0_i32, %c0_i32_0 : i32, i32
  }
  func.func @transform_5(%arg0: i32) -> (i32, i32, i32) {
    %c0_i32 = arith.constant 0 : i32
    %c0_i32_0 = arith.constant 0 : i32
    %c0_i32_1 = arith.constant 0 : i32
    return %arg0, %c0_i32, %c0_i32_0 : i32, i32, i32
  }
  func.func @transform_6(%arg0: i32) -> (i32, i32, i32) {
    %c0_i32 = arith.constant 0 : i32
    %c0_i32_0 = arith.constant 0 : i32
    %c0_i32_1 = arith.constant 0 : i32
    return %arg0, %c0_i32, %c0_i32_0 : i32, i32, i32
  }
}

module attributes {stable_mosaic.version = 11 : i64} {
  func.func @_convlstm_cell_kernel(%arg0: i32, %arg1: memref<1x16x16x32xf32, #tpu.memory_space<vmem>>, %arg2: memref<1x16x16x32xf32, #tpu.memory_space<vmem>>, %arg3: memref<1x256x32xf32, #tpu.memory_space<vmem>>, %arg4: memref<3x192x128xbf16, #tpu.memory_space<vmem>>, %arg5: memref<1x128xf32, #tpu.memory_space<vmem>>, %arg6: memref<1x256x32xf32, #tpu.memory_space<vmem>>, %arg7: memref<1x256x32xf32, #tpu.memory_space<vmem>>, %arg8: memref<256x128xf32, #tpu.memory_space<vmem>>) attributes {dimension_semantics = [#tpu.dimension_semantics<parallel>], iteration_bounds = array<i64: 2>, scalar_prefetch = 0 : i64, scratch_operands = 1 : i64, tpu.core_type = #tpu.core_type<tc>, window_params = [{transform_indices = @transform_0, window_bounds = array<i64: 1, 16, 16, 32>}, {transform_indices = @transform_1, window_bounds = array<i64: 1, 16, 16, 32>}, {transform_indices = @transform_2, window_bounds = array<i64: 1, 256, 32>}, {pipeline_mode = #tpu.pipeline_mode<synchronous>, transform_indices = @transform_3, window_bounds = array<i64: 3, 192, 128>}, {pipeline_mode = #tpu.pipeline_mode<synchronous>, transform_indices = @transform_4, window_bounds = array<i64: 1, 128>}, {transform_indices = @transform_5, window_bounds = array<i64: 1, 256, 32>}, {transform_indices = @transform_6, window_bounds = array<i64: 1, 256, 32>}]} {
    %c0 = arith.constant 0 : index
    %c0_0 = arith.constant 0 : index
    %c0_1 = arith.constant 0 : index
    %c0_2 = arith.constant 0 : index
    %0 = vector.load %arg1[%c0, %c0_0, %c0_1, %c0_2] : memref<1x16x16x32xf32, #tpu.memory_space<vmem>>, vector<1x16x16x32xf32>
    %1 = vector.shape_cast %0 : vector<1x16x16x32xf32> to vector<16x16x32xf32>
    %c0_3 = arith.constant 0 : index
    %c0_4 = arith.constant 0 : index
    %c0_5 = arith.constant 0 : index
    %c0_6 = arith.constant 0 : index
    %2 = vector.load %arg2[%c0_3, %c0_4, %c0_5, %c0_6] : memref<1x16x16x32xf32, #tpu.memory_space<vmem>>, vector<1x16x16x32xf32>
    %3 = vector.shape_cast %2 : vector<1x16x16x32xf32> to vector<16x16x32xf32>
    %4 = tpu.concatenate %1, %3 in 2 : vector<16x16x32xf32>, vector<16x16x32xf32> -> vector<16x16x64xf32>
    %cst = arith.constant 0.000000e+00 : f32
    %5 = vector.broadcast %cst : f32 to vector<16x1x64xf32>
    %6 = tpu.concatenate %5, %4, %5 in 1 : vector<16x1x64xf32>, vector<16x16x64xf32>, vector<16x1x64xf32> -> vector<16x18x64xf32>
    %7 = vector.extract_strided_slice %6 {offsets = [0, 0, 0], sizes = [16, 16, 64], strides = [1, 1, 1]} : vector<16x18x64xf32> to vector<16x16x64xf32>
    %8 = vector.extract_strided_slice %6 {offsets = [0, 1, 0], sizes = [16, 16, 64], strides = [1, 1, 1]} : vector<16x18x64xf32> to vector<16x16x64xf32>
    %9 = vector.extract_strided_slice %6 {offsets = [0, 2, 0], sizes = [16, 16, 64], strides = [1, 1, 1]} : vector<16x18x64xf32> to vector<16x16x64xf32>
    %10 = tpu.concatenate %7, %8, %9 in 2 : vector<16x16x64xf32>, vector<16x16x64xf32>, vector<16x16x64xf32> -> vector<16x16x192xf32>
    %11 = arith.truncf %10 : vector<16x16x192xf32> to vector<16x16x192xbf16>
    %cst_7 = arith.constant 0.000000e+00 : bf16
    %12 = vector.broadcast %cst_7 : bf16 to vector<1x16x192xbf16>
    %13 = tpu.concatenate %12, %11, %12 in 0 : vector<1x16x192xbf16>, vector<16x16x192xbf16>, vector<1x16x192xbf16> -> vector<18x16x192xbf16>
    %c0_8 = arith.constant 0 : index
    %c0_9 = arith.constant 0 : index
    %14 = vector.load %arg5[%c0_8, %c0_9] : memref<1x128xf32, #tpu.memory_space<vmem>>, vector<1x128xf32>
    %15 = vector.shape_cast %14 : vector<1x128xf32> to vector<1x128xf32>
    %16 = vector.broadcast %15 : vector<1x128xf32> to vector<256x128xf32>
    %c0_10 = arith.constant 0 : index
    %c0_11 = arith.constant 0 : index
    %17 = vector.load %arg8[%c0_10, %c0_11] : memref<256x128xf32, #tpu.memory_space<vmem>>, vector<256x128xf32>
    tpu.vector_store %arg8[%c0_10, %c0_11], %16 {strides = array<i32>} : memref<256x128xf32, #tpu.memory_space<vmem>>, vector<256x128xf32>,
    %18 = vector.extract_strided_slice %13 {offsets = [0, 0, 0], sizes = [16, 16, 192], strides = [1, 1, 1]} : vector<18x16x192xbf16> to vector<16x16x192xbf16>
    %19 = vector.shape_cast %18 : vector<16x16x192xbf16> to vector<256x192xbf16>
    %c0_12 = arith.constant 0 : index
    %c0_13 = arith.constant 0 : index
    %20 = vector.load %arg8[%c0_12, %c0_13] : memref<256x128xf32, #tpu.memory_space<vmem>>, vector<256x128xf32>
    %c0_14 = arith.constant 0 : index
    %c0_15 = arith.constant 0 : index
    %c0_16 = arith.constant 0 : index
    %21 = vector.load %arg4[%c0_14, %c0_15, %c0_16] : memref<3x192x128xbf16, #tpu.memory_space<vmem>>, vector<1x192x128xbf16>
    %22 = vector.shape_cast %21 : vector<1x192x128xbf16> to vector<192x128xbf16>
    %cst_17 = arith.constant dense<0.000000e+00> : vector<256x128xf32>
    %23 = tpu.matmul %19, %22, %cst_17 {dimension_numbers = #tpu.dot_dimension_numbers<[1], [0], [0], [1], [0, 0, 1, 1], [], []>} : vector<256x192xbf16>, vector<192x128xbf16>, vector<256x128xf32> -> vector<256x128xf32>
    %24 = arith.addf %20, %23 : vector<256x128xf32>
    %c0_18 = arith.constant 0 : index
    %c0_19 = arith.constant 0 : index
    %25 = vector.load %arg8[%c0_18, %c0_19] : memref<256x128xf32, #tpu.memory_space<vmem>>, vector<256x128xf32>
    tpu.vector_store %arg8[%c0_18, %c0_19], %24 {strides = array<i32>} : memref<256x128xf32, #tpu.memory_space<vmem>>, vector<256x128xf32>,
    %26 = vector.extract_strided_slice %13 {offsets = [1, 0, 0], sizes = [16, 16, 192], strides = [1, 1, 1]} : vector<18x16x192xbf16> to vector<16x16x192xbf16>
    %27 = vector.shape_cast %26 : vector<16x16x192xbf16> to vector<256x192xbf16>
    %c0_20 = arith.constant 0 : index
    %c0_21 = arith.constant 0 : index
    %28 = vector.load %arg8[%c0_20, %c0_21] : memref<256x128xf32, #tpu.memory_space<vmem>>, vector<256x128xf32>
    %c1 = arith.constant 1 : index
    %c0_22 = arith.constant 0 : index
    %c0_23 = arith.constant 0 : index
    %29 = vector.load %arg4[%c1, %c0_22, %c0_23] : memref<3x192x128xbf16, #tpu.memory_space<vmem>>, vector<1x192x128xbf16>
    %30 = vector.shape_cast %29 : vector<1x192x128xbf16> to vector<192x128xbf16>
    %cst_24 = arith.constant dense<0.000000e+00> : vector<256x128xf32>
    %31 = tpu.matmul %27, %30, %cst_24 {dimension_numbers = #tpu.dot_dimension_numbers<[1], [0], [0], [1], [0, 0, 1, 1], [], []>} : vector<256x192xbf16>, vector<192x128xbf16>, vector<256x128xf32> -> vector<256x128xf32>
    %32 = arith.addf %28, %31 : vector<256x128xf32>
    %c0_25 = arith.constant 0 : index
    %c0_26 = arith.constant 0 : index
    %33 = vector.load %arg8[%c0_25, %c0_26] : memref<256x128xf32, #tpu.memory_space<vmem>>, vector<256x128xf32>
    tpu.vector_store %arg8[%c0_25, %c0_26], %32 {strides = array<i32>} : memref<256x128xf32, #tpu.memory_space<vmem>>, vector<256x128xf32>,
    %34 = vector.extract_strided_slice %13 {offsets = [2, 0, 0], sizes = [16, 16, 192], strides = [1, 1, 1]} : vector<18x16x192xbf16> to vector<16x16x192xbf16>
    %35 = vector.shape_cast %34 : vector<16x16x192xbf16> to vector<256x192xbf16>
    %c0_27 = arith.constant 0 : index
    %c0_28 = arith.constant 0 : index
    %36 = vector.load %arg8[%c0_27, %c0_28] : memref<256x128xf32, #tpu.memory_space<vmem>>, vector<256x128xf32>
    %c2 = arith.constant 2 : index
    %c0_29 = arith.constant 0 : index
    %c0_30 = arith.constant 0 : index
    %37 = vector.load %arg4[%c2, %c0_29, %c0_30] : memref<3x192x128xbf16, #tpu.memory_space<vmem>>, vector<1x192x128xbf16>
    %38 = vector.shape_cast %37 : vector<1x192x128xbf16> to vector<192x128xbf16>
    %cst_31 = arith.constant dense<0.000000e+00> : vector<256x128xf32>
    %39 = tpu.matmul %35, %38, %cst_31 {dimension_numbers = #tpu.dot_dimension_numbers<[1], [0], [0], [1], [0, 0, 1, 1], [], []>} : vector<256x192xbf16>, vector<192x128xbf16>, vector<256x128xf32> -> vector<256x128xf32>
    %40 = arith.addf %36, %39 : vector<256x128xf32>
    %c0_32 = arith.constant 0 : index
    %c0_33 = arith.constant 0 : index
    %41 = vector.load %arg8[%c0_32, %c0_33] : memref<256x128xf32, #tpu.memory_space<vmem>>, vector<256x128xf32>
    tpu.vector_store %arg8[%c0_32, %c0_33], %40 {strides = array<i32>} : memref<256x128xf32, #tpu.memory_space<vmem>>, vector<256x128xf32>,
    %c0_34 = arith.constant 0 : index
    %c0_35 = arith.constant 0 : index
    %42 = vector.load %arg8[%c0_34, %c0_35] : memref<256x128xf32, #tpu.memory_space<vmem>>, vector<256x128xf32>
    %43 = vector.extract_strided_slice %42 {offsets = [0, 0], sizes = [256, 96], strides = [1, 1]} : vector<256x128xf32> to vector<256x96xf32>
    %44 = arith.negf %43 : vector<256x96xf32>
    %45 = math.exp %44 : vector<256x96xf32>
    %cst_36 = arith.constant 1.000000e+00 : f32
    %46 = vector.broadcast %cst_36 : f32 to vector<256x96xf32>
    %47 = arith.addf %46, %45 : vector<256x96xf32>
    %48 = arith.divf %46, %47 : vector<256x96xf32>
    %49 = vector.extract_strided_slice %42 {offsets = [0, 96], sizes = [256, 32], strides = [1, 1]} : vector<256x128xf32> to vector<256x32xf32>
    %50 = math.tanh %49 : vector<256x32xf32>
    %51 = vector.extract_strided_slice %48 {offsets = [0, 0], sizes = [256, 32], strides = [1, 1]} : vector<256x96xf32> to vector<256x32xf32>
    %52 = vector.extract_strided_slice %48 {offsets = [0, 32], sizes = [256, 32], strides = [1, 1]} : vector<256x96xf32> to vector<256x32xf32>
    %53 = vector.extract_strided_slice %48 {offsets = [0, 64], sizes = [256, 32], strides = [1, 1]} : vector<256x96xf32> to vector<256x32xf32>
    %c0_37 = arith.constant 0 : index
    %c0_38 = arith.constant 0 : index
    %c0_39 = arith.constant 0 : index
    %54 = vector.load %arg3[%c0_37, %c0_38, %c0_39] : memref<1x256x32xf32, #tpu.memory_space<vmem>>, vector<1x256x32xf32>
    %55 = vector.shape_cast %54 : vector<1x256x32xf32> to vector<256x32xf32>
    %56 = arith.mulf %52, %55 : vector<256x32xf32>
    %57 = arith.mulf %51, %50 : vector<256x32xf32>
    %58 = arith.addf %56, %57 : vector<256x32xf32>
    %59 = math.tanh %58 : vector<256x32xf32>
    %60 = arith.mulf %53, %59 : vector<256x32xf32>
    %c0_40 = arith.constant 0 : index
    %c0_41 = arith.constant 0 : index
    %c0_42 = arith.constant 0 : index
    %61 = vector.load %arg6[%c0_40, %c0_41, %c0_42] : memref<1x256x32xf32, #tpu.memory_space<vmem>>, vector<1x256x32xf32>
    %62 = vector.shape_cast %61 : vector<1x256x32xf32> to vector<256x32xf32>
    %63 = vector.shape_cast %60 : vector<256x32xf32> to vector<1x256x32xf32>
    tpu.vector_store %arg6[%c0_40, %c0_41, %c0_42], %63 {strides = array<i32>} : memref<1x256x32xf32, #tpu.memory_space<vmem>>, vector<1x256x32xf32>,
    %c0_43 = arith.constant 0 : index
    %c0_44 = arith.constant 0 : index
    %c0_45 = arith.constant 0 : index
    %64 = vector.load %arg7[%c0_43, %c0_44, %c0_45] : memref<1x256x32xf32, #tpu.memory_space<vmem>>, vector<1x256x32xf32>
    %65 = vector.shape_cast %64 : vector<1x256x32xf32> to vector<256x32xf32>
    %66 = vector.shape_cast %58 : vector<256x32xf32> to vector<1x256x32xf32>
    tpu.vector_store %arg7[%c0_43, %c0_44, %c0_45], %66 {strides = array<i32>} : memref<1x256x32xf32, #tpu.memory_space<vmem>>, vector<1x256x32xf32>,
    return
  }
  func.func @transform_0(%arg0: i32) -> (i32, i32, i32, i32) {
    %c0_i32 = arith.constant 0 : i32
    %c0_i32_0 = arith.constant 0 : i32
    %c0_i32_1 = arith.constant 0 : i32
    %c0_i32_2 = arith.constant 0 : i32
    return %arg0, %c0_i32, %c0_i32_0, %c0_i32_1 : i32, i32, i32, i32
  }
  func.func @transform_1(%arg0: i32) -> (i32, i32, i32, i32) {
    %c0_i32 = arith.constant 0 : i32
    %c0_i32_0 = arith.constant 0 : i32
    %c0_i32_1 = arith.constant 0 : i32
    %c0_i32_2 = arith.constant 0 : i32
    return %arg0, %c0_i32, %c0_i32_0, %c0_i32_1 : i32, i32, i32, i32
  }
  func.func @transform_2(%arg0: i32) -> (i32, i32, i32) {
    %c0_i32 = arith.constant 0 : i32
    %c0_i32_0 = arith.constant 0 : i32
    %c0_i32_1 = arith.constant 0 : i32
    return %arg0, %c0_i32, %c0_i32_0 : i32, i32, i32
  }
  func.func @transform_3(%arg0: i32) -> (i32, i32, i32) {
    %c0_i32 = arith.constant 0 : i32
    %c0_i32_0 = arith.constant 0 : i32
    %c0_i32_1 = arith.constant 0 : i32
    %c0_i32_2 = arith.constant 0 : i32
    return %c0_i32, %c0_i32_0, %c0_i32_1 : i32, i32, i32
  }
  func.func @transform_4(%arg0: i32) -> (i32, i32) {
    %c0_i32 = arith.constant 0 : i32
    %c0_i32_0 = arith.constant 0 : i32
    %c0_i32_1 = arith.constant 0 : i32
    return %c0_i32, %c0_i32_0 : i32, i32
  }
  func.func @transform_5(%arg0: i32) -> (i32, i32, i32) {
    %c0_i32 = arith.constant 0 : i32
    %c0_i32_0 = arith.constant 0 : i32
    %c0_i32_1 = arith.constant 0 : i32
    return %arg0, %c0_i32, %c0_i32_0 : i32, i32, i32
  }
  func.func @transform_6(%arg0: i32) -> (i32, i32, i32) {
    %c0_i32 = arith.constant 0 : i32
    %c0_i32_0 = arith.constant 0 : i32
    %c0_i32_1 = arith.constant 0 : i32
    return %arg0, %c0_i32, %c0_i32_0 : i32, i32, i32
  }
}

</mosaic_0001>

<bundles_post_ra>
// kernel: _forward_impl.2
= control target key start
LH: loop header
LB: loop body
LE: loop exit
PB: predicated region body
PF: predicated region fallthrough
CT: control target
= control target key end

     0   :  { %s4645_s21 = smov 0   ;;  %s6379_s0 = inlined_call_operand.vmem [shape: f32[2,16,16,4], index: 0, kind: input, shape index: {}]   ;;  %s6380_s1 = inlined_call_operand.vmem [shape: f32[2,16,16,32], index: 1, kind: input, shape index: {}]   ;;  %s6381_s2 = inlined_call_operand.vmem [shape: f32[2,256,32], index: 2, kind: input, shape index: {}, may-alias: {2,6}]   ;;  %s6382_s3 = inlined_call_operand.vmem [shape: bf16[3,108,128], index: 3, kind: input, shape index: {}]   ;;  %s6383_s4 = inlined_call_operand.vmem [shape: f32[1,128], index: 4, kind: input, shape index: {}]   ;;  %s6384_s5 = inlined_call_operand.vmem [shape: f32[2,256,32], index: 5, kind: output, shape index: {0}]   ;;  %s6385_s6 = inlined_call_operand.vmem [shape: f32[2,256,32], index: 6, kind: output, shape index: {1}, may-alias: {2,6}]  }
   0x1 LB: > { %s3591_s22 = sadd.s32 4294967295, %s4601_s21   ;;  %p3595_p0 = scmp.ge.s32.totalorder %s4601_s21, 1  ;;  %s4601_s21 = sphi %s4645_s21, %s17_s21  }
   0x2   : > { %p235_p1 = scmp.lt.s32.totalorder %s4601_s21, 3 }
   0x4   : > { %p236_p2 = pnand %p3595_p0, %p235_p1 }
   0x6   : > { %239 = sbr.rel (%p236_p2) target bundleno = 1153 (0x481), region = 40 }
   0xd   : > { %p280_p3 = scmp.lt.s32.totalorder %s3591_s22, 1  ;;  %s4603_s27 = smov 4   ;;  %v4317_v45 = vld [vmem:[%s6382_s3] sm:$0xff]   ;;  %v4318_v46 = vld [vmem:[%s6382_s3 + $0x8] sm:$0xff]   ;;  %v4715_v47 = vld [vmem:[%s6382_s3 + $0x38] sm:$0xff]   ;;  %vm498_vm0 = vcmask 31744  }
   0xe   : > { %v4720_v48 = vld [vmem:[%s6382_s3 + $0x40] sm:$0xff]   ;;  %3810 = vmatprep.subr.bf16.mxu1 %v4317_v45  ;;  %3856 = vmatprep.subr.bf16.mxu0 %v4715_v47  ;;  %v4320_v49 = vld [vmem:[%s6382_s3 + $0x10] sm:$0xff]   ;;  %v4731_v50 = vld [vmem:[%s6382_s3 + $0x48] sm:$0xff]   ;;  %vm563_vm1 = vcmask 1040384   ;;  %vm901_vm2 = vcmask 1045504   ;;  %vm724_vm3 = vcmask 1046528  }
   0xf   : > { %s6425_s22 = smov (!%p280_p3, %s3591_s22), 1  ;;  %3811 = vmatpush3.bf16.msra.mxu1 %v4317_v45  ;;  %3857 = vmatpush3.bf16.msra.mxu0 %v4715_v47  ;;  %v4322_v51 = vld [vmem:[%s6382_s3 + $0x18] sm:$0xff]   ;;  %v4741_v52 = vld [vmem:[%s6382_s3 + $0x50] sm:$0xff]   ;;  %v4324_v53 = vld [vmem:[%s6382_s3 + $0x20] sm:$0xff]   ;;  %s4604_s14 = smov 72   ;;  %vm1078_vm4 = vcmask 293888  }
  0x10   : > { %s4653_s23 = sshll.u32 %s6425_s22, 8  ;;  %3812 = vmatprep.subr.bf16.mxu1 %v4318_v46  ;;  %3858 = vmatprep.subr.bf16.mxu0 %v4720_v48  ;;  %v4751_v54 = vld [vmem:[%s6382_s3 + $0x58] sm:$0xff]   ;;  %v4326_v55 = vld [vmem:[%s6382_s3 + $0x28] sm:$0xff]   ;;  %s4605_s15 = smov 36   ;;  %vm1111_vm5 = vcmask 588800   ;;  %vm1286_vm6 = vcmask 883712  }
  0x11   : > { %s4659_s26 = scalar_lea.vmem %s6380_s1, %s4653_s23  ;;  %s4763_s8 = scalar_lea.vmem %s6379_s0, %s4653_s23  ;;  %vm3286_vm7 = vcmask 261120  }
  0x12   : > { %v338_v0 = vld [vmem:[%s4659_s26] sm:$0xff]  ;;  %v339_v1 = vld [vmem:[%s4659_s26 + $0x8] sm:$0xff]  ;;  %v340_v2 = vld [vmem:[%s4659_s26 + $0x10] sm:$0xff]  ;;  %s5458_s12 = scalar_lea.vmem %s6381_s2, %s4653_s23  ;;  %s4607_s13 = smov 32  }
  0x13   : > { %v4077_v3 = vpack.i.bf16 %v339_v1, %v338_v0  ;;  %v341_v4 = vld [vmem:[%s4659_s26 + $0x18] sm:$0xff]  ;;  %v342_v5 = vld [vmem:[%s4659_s26 + $0x20] sm:$0xff]  ;;  %v343_v6 = vld [vmem:[%s4659_s26 + $0x28] sm:$0xff]  ;;  %3813 = vmatpush3.bf16.msra.mxu1 %v4318_v46  ;;  %3859 = vmatpush3.bf16.msra.mxu0 %v4720_v48  ;;  %s6154_s18 = scalar_lea.vmem %s6385_s6, %s4653_s23  ;;  %s4609_s19 = smov 64  }
  0x14   : > { %v4087_v7 = vpack.i.bf16 %v343_v6, %v342_v5  ;;  %v344_v8 = vld [vmem:[%s4659_s26 + $0x30] sm:$0xff]  ;;  %v345_v9 = vld [vmem:[%s4659_s26 + $0x38] sm:$0xff]  ;;  %v4082_v10 = vpack.i.bf16 %v341_v4, %v340_v2  ;;  %v346_v12 = vld [vmem:[%s4659_s26 + $0x40] sm:$0xff]  ;;  %3814 = vmatprep.subr.bf16.mxu1 %v4320_v49  ;;  %3860 = vmatprep.subr.bf16.mxu0 %v4731_v50  ;;  %s6298_s24 = scalar_lea.vmem %s6384_s5, %s4653_s23 }
  0x15   : > { %4078 = vrot.lane.b32.xlu0 %v4077_v3, %s4603_s27  ;;  %v4092_v11 = vpack.i.bf16 %v345_v9, %v344_v8  ;;  %v347_v13 = vld [vmem:[%s4659_s26 + $0x48] sm:$0xff]  ;;  %v348_v14 = vld [vmem:[%s4659_s26 + $0x50] sm:$0xff]  ;;  %v349_v15 = vld [vmem:[%s4659_s26 + $0x58] sm:$0xff] }
  0x16   : > { %4088 = vrot.lane.b32.xlu1 %v4087_v7, %s4603_s27  ;;  %v4097_v16 = vpack.i.bf16 %v347_v13, %v346_v12  ;;  %v4102_v17 = vpack.i.bf16 %v349_v15, %v348_v14  ;;  %v350_v18 = vld [vmem:[%s4659_s26 + $0x60] sm:$0xff]  ;;  %v351_v19 = vld [vmem:[%s4659_s26 + $0x68] sm:$0xff]  ;;  %v352_v20 = vld [vmem:[%s4659_s26 + $0x70] sm:$0xff] }
  0x17   : > { %v353_v21 = vld [vmem:[%s4659_s26 + $0x78] sm:$0xff]  ;;  %v4107_v22 = vpack.i.bf16 %v351_v19, %v350_v18  ;;  %v354_v24 = vld [vmem:[%s4659_s26 + $0x80] sm:$0xff]  ;;  %v355_v25 = vld [vmem:[%s4659_s26 + $0x88] sm:$0xff]  ;;  %3815 = vmatpush3.bf16.msra.mxu1 %v4320_v49  ;;  %3861 = vmatpush3.bf16.msra.mxu0 %v4731_v50 }
  0x18   : > { %v4112_v23 = vpack.i.bf16 %v353_v21, %v352_v20  ;;  %v356_v26 = vld [vmem:[%s4659_s26 + $0x90] sm:$0xff]  ;;  %v357_v27 = vld [vmem:[%s4659_s26 + $0x98] sm:$0xff]  ;;  %v358_v28 = vld [vmem:[%s4659_s26 + $0xa0] sm:$0xff]  ;;  %v4117_v30 = vpack.i.bf16 %v355_v25, %v354_v24  ;;  %3816 = vmatprep.subr.bf16.mxu1 %v4322_v51  ;;  %3862 = vmatprep.subr.bf16.mxu0 %v4741_v52 }
  0x19   : > { %4083 = vrot.lane.b32.xlu0 %v4082_v10, %s4603_s27  ;;  %v359_v29 = vld [vmem:[%s4659_s26 + $0xa8] sm:$0xff]  ;;  %v4122_v31 = vpack.i.bf16 %v357_v27, %v356_v26  ;;  %v360_v32 = vld [vmem:[%s4659_s26 + $0xb0] sm:$0xff]  ;;  %v361_v33 = vld [vmem:[%s4659_s26 + $0xb8] sm:$0xff] }
  0x1a   : > { %4093 = vrot.lane.b32.xlu1 %v4092_v11, %s4603_s27  ;;  %v362_v34 = vld [vmem:[%s4659_s26 + $0xc0] sm:$0xff]  ;;  %v363_v35 = vld [vmem:[%s4659_s26 + $0xc8] sm:$0xff]  ;;  %v4127_v36 = vpack.i.bf16 %v359_v29, %v358_v28  ;;  %v4132_v37 = vpack.i.bf16 %v361_v33, %v360_v32  ;;  %v364_v38 = vld [vmem:[%s4659_s26 + $0xd0] sm:$0xff] }
  0x1b   : > { %v365_v39 = vld [vmem:[%s4659_s26 + $0xd8] sm:$0xff]  ;;  %v366_v40 = vld [vmem:[%s4659_s26 + $0xe0] sm:$0xff]  ;;  %v4137_v41 = vpack.i.bf16 %v363_v35, %v362_v34  ;;  %v367_v43 = vld [vmem:[%s4659_s26 + $0xe8] sm:$0xff]  ;;  %3817 = vmatpush3.bf16.msra.mxu1 %v4322_v51  ;;  %3863 = vmatpush3.bf16.msra.mxu0 %v4741_v52 }
  0x1c   : > { %v4142_v42 = vpack.i.bf16 %v365_v39, %v364_v38  ;;  %v4147_v44 = vpack.i.bf16 %v367_v43, %v366_v40  ;;  %3818 = vmatprep.subr.bf16.mxu1 %v4324_v53  ;;  %3864 = vmatprep.subr.bf16.mxu0 %v4751_v54  ;;  %v306_v56 = vld [vmem:[%s4763_s8] sm:$0xff]  ;;  %v307_v58 = vld [vmem:[%s4763_s8 + $0x8] sm:$0xff]  ;;  %v4768_v59 = vld [vmem:[%s4659_s26 + $0xf0] sm:$0xff] }
  0x1d   : > { %4098 = vrot.lane.b32.xlu0 %v4097_v16, %s4603_s27  ;;  %v4771_v60 = vld [vmem:[%s4659_s26 + $0xf8] sm:$0xff]  ;;  %v310_v0 = vld [vmem:[%s4763_s8 + $0x20] sm:$0xff]  ;;  %v311_v1 = vld [vmem:[%s4763_s8 + $0x28] sm:$0xff] }
  0x1e   : > { %4103 = vrot.lane.b32.xlu1 %v4102_v17, %s4603_s27  ;;  %v4207_v6 = vpack.i.bf16 %v4771_v60, %v4768_v59  ;;  %v308_v10 = vld [vmem:[%s4763_s8 + $0x10] sm:$0xff]  ;;  %v309_v11 = vld [vmem:[%s4763_s8 + $0x18] sm:$0xff]  ;;  %v4803_v26 = vld [vmem:[%s6382_s3 + $0x60] sm:$0xff]  }
  0x1f   : > { %3819 = vmatpush3.bf16.msra.mxu1 %v4324_v53  ;;  %3865 = vmatpush3.bf16.msra.mxu0 %v4751_v54  ;;  %v312_v19 = vld [vmem:[%s4763_s8 + $0x30] sm:$0xff]  ;;  %v313_v20 = vld [vmem:[%s4763_s8 + $0x38] sm:$0xff]  ;;  %v4854_v53 = vld [vmem:[%s6382_s3 + $0x68] sm:$0x3f]  }
  0x20   : > { %3820 = vmatprep.subr.bf16.mxu1 %v4326_v55  ;;  %v4798_v25 = vld [vmem:[%s6382_s3 + $0x30] sm:$0x3f]   ;;  %3866 = vmatprep.subr.bf16.mxu0 %v4803_v26 }
  0x21   : > { %4108 = vrot.lane.b32.xlu0 %v4107_v22, %s4603_s27 }
  0x22   : > { %4113 = vrot.lane.b32.xlu1 %v4112_v23, %s4603_s27 }
  0x23   : > { %3821 = vmatpush3.bf16.msra.mxu1 %v4326_v55  ;;  %3867 = vmatpush3.bf16.msra.mxu0 %v4803_v26 }
  0x24   : > { %4058 = vmatprep.subr.msk.bf16.mxu1 %vm901_vm2, %v4798_v25  ;;  %4059 = vmatprep.subr.msk.bf16.mxu0 %vm901_vm2, %v4854_v53 }
  0x25   : > { %4118 = vrot.lane.b32.xlu0 %v4117_v30, %s4603_s27 }
  0x26   : > { %4123 = vrot.lane.b32.xlu1 %v4122_v31, %s4603_s27 }
  0x29   : > { %4128 = vrot.lane.b32.xlu0 %v4127_v36, %s4603_s27 }
  0x2a   : > { %4133 = vrot.lane.b32.xlu1 %v4132_v37, %s4603_s27 }
  0x2d   : > { %4138 = vrot.lane.b32.xlu0 %v4137_v41, %s4603_s27 }
  0x2e   : > { %4143 = vrot.lane.b32.xlu1 %v4142_v42, %s4603_s27 }
  0x31   : > { %4148 = vrot.lane.b32.xlu0 %v4147_v44, %s4603_s27  ;;  %v315_v44 = vld [vmem:[%s4763_s8 + $0x48] sm:$0xff] }
  0x87   : > { %v4079_v57 = vpop.permute.xlu0 %4078 }
  0x88   : > { %v4081_v61 = vunpack.i.h.bf16 %v4079_v57  ;;  %v4080_v62 = vunpack.i.l.bf16 %v4079_v57  ;;  %v4089_v63 = vpop.permute.xlu1 %4088 }
  0x89   : > { %v4091_v2 = vunpack.i.h.bf16 %v4089_v63  ;;  %v4090_v3 = vunpack.i.l.bf16 %v4089_v63 }
  0x8a   : > { %v499_v4 = vsel %vm498_vm0, %v306_v56, %v4080_v62  ;;  %v500_v5 = vsel %vm498_vm0, %v307_v58, %v4081_v61  ;;  %v314_v61 = vld [vmem:[%s4763_s8 + $0x40] sm:$0xff] }
  0x8b   : > { %v564_v7 = vrot.slane %v499_v4, 7  ;;  %v565_v8 = vrot.slane %v500_v5, 7  ;;  %v4084_v9 = vpop.permute.xlu0 %4083  ;;  %v4782_v12 = vsel %vm498_vm0, %v310_v0, %v4090_v3  ;;  %v4785_v13 = vsel %vm498_vm0, %v311_v1, %v4091_v2 }
  0x8c   : > { %v4086_v14 = vunpack.i.h.bf16 %v4084_v9  ;;  %v4085_v15 = vunpack.i.l.bf16 %v4084_v9  ;;  %v570_v16 = vrot.slane %v4782_v12, 7  ;;  %v571_v17 = vrot.slane %v4785_v13, 7  ;;  %v4094_v18 = vpop.permute.xlu1 %4093 }
  0x8d   : > { %v4792_v21 = vsel %vm563_vm1, 0.0, %v564_v7  ;;  %v676_v22 = vsel %vm563_vm1, %v565_v8, 0.0  ;;  %v4096_v23 = vunpack.i.h.bf16 %v4094_v18  ;;  %v4095_v24 = vunpack.i.l.bf16 %v4094_v18 }
  0x8e   : > { %v501_v27 = vsel %vm498_vm0, %v308_v10, %v4085_v15  ;;  %v502_v28 = vsel %vm498_vm0, %v309_v11, %v4086_v14  ;;  %v4810_v29 = vsel %vm563_vm1, 0.0, %v570_v16  ;;  %v4815_v30 = vsel %vm563_vm1, %v571_v17, 0.0 }
  0x8f   : > { %v567_v31 = vrot.slane %v501_v27, 7  ;;  %v568_v32 = vrot.slane %v502_v28, 7  ;;  %v4818_v33 = vsel %vm498_vm0, %v312_v19, %v4095_v24  ;;  %v4821_v34 = vsel %vm498_vm0, %v313_v20, %v4096_v23  ;;  %v4099_v39 = vpop.permute.xlu0 %4098  ;;  %v317_v20 = vld [vmem:[%s4763_s8 + $0x58] sm:$0xff]  ;;  %v316_v28 = vld [vmem:[%s4763_s8 + $0x50] sm:$0xff] }
  0x90   : > { %v573_v35 = vrot.slane %v4818_v33, 7  ;;  %v574_v36 = vrot.slane %v4821_v34, 7  ;;  %v4829_v37 = vsel %vm563_vm1, %v564_v7, %v565_v8  ;;  %v902_v38 = vrot.slane %v4792_v21, 2  ;;  %v4104_v7 = vpop.permute.xlu1 %4103 }
  0x91   : > { %v4834_v40 = vsel %vm563_vm1, 0.0, %v567_v31  ;;  %v677_v41 = vsel %vm563_vm1, %v568_v32, 0.0  ;;  %v903_v42 = vrot.slane %v4829_v37, 2  ;;  %v905_v43 = vrot.slane %v676_v22, 2 }
  0x92   : > { %v4842_v45 = vsel %vm563_vm1, 0.0, %v573_v35  ;;  %v4847_v46 = vsel %vm563_vm1, %v574_v36, 0.0  ;;  %v725_v49 = vrot.slane %v4792_v21, 1  ;;  %v726_v51 = vrot.slane %v4829_v37, 1 }
  0x93   : > { %v904_v55 = vsel %vm901_vm2, %v902_v38, %v903_v42  ;;  %v906_v56 = vsel %vm901_vm2, %v903_v42, %v905_v43  ;;  %v728_v57 = vrot.slane %v676_v22, 1  ;;  %v4101_v58 = vunpack.i.h.bf16 %v4099_v39 }
  0x94   : > { %v4157_v62 = vpack.i.bf16 %v906_v56, %v904_v55  ;;  %v727_v63 = vsel %vm724_vm3, %v725_v49, %v726_v51  ;;  %v4100_v0 = vunpack.i.l.bf16 %v4099_v39  ;;  %v4861_v1 = vsel %vm563_vm1, %v567_v31, %v568_v32  ;;  %v4109_v49 = vpop.permute.xlu0 %4108 }
  0x95   : > { %v729_v2 = vsel %vm724_vm3, %v726_v51, %v728_v57  ;;  %v4867_v3 = vsel %vm498_vm0, %v315_v44, %v4101_v58  ;;  %v907_v4 = vrot.slane %v4834_v40, 2  ;;  %v908_v5 = vrot.slane %v4861_v1, 2  ;;  %v319_v58 = vld [vmem:[%s4763_s8 + $0x68] sm:$0xff] }
  0x96   : > { %4158 = vrot.lane.b32.xlu0 %v4157_v62, %s4604_s14  ;;  %v4152_v8 = vpack.i.bf16 %v729_v2, %v727_v63  ;;  %v4873_v9 = vsel %vm498_vm0, %v314_v61, %v4100_v0  ;;  %v577_v10 = vrot.slane %v4867_v3, 7  ;;  %v910_v11 = vrot.slane %v677_v41, 2  ;;  %v318_v2 = vld [vmem:[%s4763_s8 + $0x60] sm:$0xff] }
  0x97   : > { %v576_v14 = vrot.slane %v4873_v9, 7  ;;  %v909_v15 = vsel %vm901_vm2, %v907_v4, %v908_v5  ;;  %v730_v18 = vrot.slane %v4834_v40, 1  ;;  %v731_v19 = vrot.slane %v4861_v1, 1 }
  0x98   : > { %4153 = vrot.lane.b32.xlu1 %v4152_v8, %s4605_s15  ;;  %v4885_v22 = vsel %vm563_vm1, %v577_v10, 0.0  ;;  %v911_v23 = vsel %vm901_vm2, %v908_v5, %v910_v11  ;;  %v733_v24 = vrot.slane %v677_v41, 1  ;;  %v4106_v27 = vunpack.i.h.bf16 %v4104_v7 }
  0x99   : > { %v4892_v31 = vsel %vm563_vm1, 0.0, %v576_v14  ;;  %v4167_v32 = vpack.i.bf16 %v911_v23, %v909_v15  ;;  %v732_v38 = vsel %vm724_vm3, %v730_v18, %v731_v19  ;;  %v4105_v39 = vunpack.i.l.bf16 %v4104_v7 }
  0x9a   : > { %v734_v42 = vsel %vm724_vm3, %v731_v19, %v733_v24  ;;  %v4897_v43 = vsel %vm498_vm0, %v317_v20, %v4106_v27  ;;  %v4904_v41 = vsel %vm563_vm1, %v570_v16, %v571_v17  ;;  %v912_v44 = vrot.slane %v4810_v29, 2  ;;  %v4114_v19 = vpop.permute.xlu1 %4113 }
  0x9b   : > { %4168 = vrot.lane.b32.xlu0 %v4167_v32, %s4604_s14  ;;  %v4162_v51 = vpack.i.bf16 %v734_v42, %v732_v38  ;;  %v4909_v55 = vsel %vm498_vm0, %v316_v28, %v4105_v39  ;;  %v580_v56 = vrot.slane %v4897_v43, 7  ;;  %v913_v57 = vrot.slane %v4904_v41, 2 }
  0x9c   : > { %v579_v13 = vrot.slane %v4909_v55, 7  ;;  %v915_v12 = vrot.slane %v4815_v30, 2  ;;  %v735_v16 = vrot.slane %v4810_v29, 1  ;;  %v736_v17 = vrot.slane %v4904_v41, 1 }
  0x9d   : > { %4163 = vrot.lane.b32.xlu1 %v4162_v51, %s4605_s15  ;;  %v4922_v61 = vsel %vm563_vm1, %v580_v56, 0.0  ;;  %v914_v62 = vsel %vm901_vm2, %v912_v44, %v913_v57  ;;  %v738_v63 = vrot.slane %v4815_v30, 1  ;;  %v4111_v0 = vunpack.i.h.bf16 %v4109_v49  ;;  %v320_v44 = vld [vmem:[%s4763_s8 + $0x70] sm:$0xff] }
  0x9e   : > { %v4930_v4 = vsel %vm563_vm1, 0.0, %v579_v13  ;;  %v916_v5 = vsel %vm901_vm2, %v913_v57, %v915_v12  ;;  %v737_v7 = vsel %vm724_vm3, %v735_v16, %v736_v17  ;;  %v4110_v8 = vunpack.i.l.bf16 %v4109_v49 }
  0x9f   : > { %v4177_v11 = vpack.i.bf16 %v916_v5, %v914_v62  ;;  %v739_v15 = vsel %vm724_vm3, %v736_v17, %v738_v63  ;;  %v4936_v18 = vsel %vm498_vm0, %v319_v58, %v4111_v0  ;;  %v4943_v30 = vsel %vm563_vm1, %v573_v35, %v574_v36  ;;  %v321_v36 = vld [vmem:[%s4763_s8 + $0x78] sm:$0xff]  ;;  %v4119_v5 = vpop.permute.xlu0 %4118 }
  0xa0   : > { %v4172_v20 = vpack.i.bf16 %v739_v15, %v737_v7  ;;  %v4946_v23 = vsel %vm498_vm0, %v318_v2, %v4110_v8  ;;  %v583_v24 = vrot.slane %v4936_v18, 7  ;;  %v917_v27 = vrot.slane %v4842_v45, 2 }
  0xa1   : > { %4178 = vrot.lane.b32.xlu0 %v4177_v11, %s4604_s14  ;;  %v582_v28 = vrot.slane %v4946_v23, 7  ;;  %v918_v34 = vrot.slane %v4943_v30, 2  ;;  %v920_v33 = vrot.slane %v4847_v46, 2  ;;  %v740_v35 = vrot.slane %v4842_v45, 1 }
  0xa2   : > { %4173 = vrot.lane.b32.xlu1 %v4172_v20, %s4605_s15  ;;  %v4960_v32 = vsel %vm563_vm1, %v583_v24, 0.0  ;;  %v741_v38 = vrot.slane %v4943_v30, 1  ;;  %v743_v39 = vrot.slane %v4847_v46, 1  ;;  %v4116_v42 = vunpack.i.h.bf16 %v4114_v19 }
  0xa3   : > { %v4968_v49 = vsel %vm563_vm1, 0.0, %v582_v28  ;;  %v919_v51 = vsel %vm901_vm2, %v917_v27, %v918_v34  ;;  %v921_v57 = vsel %vm901_vm2, %v918_v34, %v920_v33  ;;  %v4115_v12 = vunpack.i.l.bf16 %v4114_v19  ;;  %v323_v19 = vld [vmem:[%s4763_s8 + $0x88] sm:$0xff] }
  0xa4   : > { %v4187_v16 = vpack.i.bf16 %v921_v57, %v919_v51  ;;  %v742_v17 = vsel %vm724_vm3, %v740_v35, %v741_v38  ;;  %v744_v58 = vsel %vm724_vm3, %v741_v38, %v743_v39  ;;  %v4975_v62 = vsel %vm498_vm0, %v321_v36, %v4116_v42  ;;  %v322_v35 = vld [vmem:[%s4763_s8 + $0x80] sm:$0xff] }
  0xa5   : > { %v4182_v46 = vpack.i.bf16 %v744_v58, %v742_v17  ;;  %v4978_v63 = vsel %vm498_vm0, %v320_v44, %v4115_v12  ;;  %v586_v0 = vrot.slane %v4975_v62, 7  ;;  %v4986_v2 = vsel %vm563_vm1, %v576_v14, %v577_v10  ;;  %v4124_v12 = vpop.permute.xlu1 %4123 }
  0xa6   : > { %4188 = vrot.lane.b32.xlu0 %v4187_v16, %s4604_s14  ;;  %v585_v7 = vrot.slane %v4978_v63, 7  ;;  %v922_v8 = vrot.slane %v4892_v31, 2  ;;  %v923_v11 = vrot.slane %v4986_v2, 2  ;;  %v925_v15 = vrot.slane %v4885_v22, 2  ;;  %v325_v63 = vld [vmem:[%s4763_s8 + $0x98] sm:$0xff] }
  0xa7   : > { %4183 = vrot.lane.b32.xlu1 %v4182_v46, %s4605_s15  ;;  %v4997_v3 = vsel %vm563_vm1, %v586_v0, 0.0  ;;  %v745_v9 = vrot.slane %v4892_v31, 1  ;;  %v746_v10 = vrot.slane %v4986_v2, 1  ;;  %v748_v14 = vrot.slane %v4885_v22, 1 }
  0xa8   : > { %v5004_v20 = vsel %vm563_vm1, 0.0, %v585_v7  ;;  %v924_v27 = vsel %vm901_vm2, %v922_v8, %v923_v11  ;;  %v926_v34 = vsel %vm901_vm2, %v923_v11, %v925_v15  ;;  %v4121_v33 = vunpack.i.h.bf16 %v4119_v5 }
  0xa9   : > { %v4197_v36 = vpack.i.bf16 %v926_v34, %v924_v27  ;;  %v747_v38 = vsel %vm724_vm3, %v745_v9, %v746_v10  ;;  %v749_v39 = vsel %vm724_vm3, %v746_v10, %v748_v14  ;;  %v4120_v42 = vunpack.i.l.bf16 %v4119_v5  ;;  %v4129_v27 = vpop.permute.xlu0 %4128 }
  0xaa   : > { %v4192_v44 = vpack.i.bf16 %v749_v39, %v747_v38  ;;  %v5012_v22 = vsel %vm498_vm0, %v323_v19, %v4121_v33  ;;  %v5019_v51 = vsel %vm563_vm1, %v579_v13, %v580_v56  ;;  %v927_v57 = vrot.slane %v4930_v4, 2  ;;  %v324_v19 = vld [vmem:[%s4763_s8 + $0x90] sm:$0xff] }
  0xab   : > { %4198 = vrot.lane.b32.xlu0 %v4197_v36, %s4604_s14  ;;  %v5024_v16 = vsel %vm498_vm0, %v322_v35, %v4120_v42  ;;  %v589_v17 = vrot.slane %v5012_v22, 7  ;;  %v928_v58 = vrot.slane %v5019_v51, 2  ;;  %v930_v43 = vrot.slane %v4922_v61, 2 }
  0xac   : > { %4193 = vrot.lane.b32.xlu1 %v4192_v44, %s4605_s15  ;;  %v588_v55 = vrot.slane %v5024_v16, 7  ;;  %v750_v56 = vrot.slane %v4930_v4, 1  ;;  %v751_v13 = vrot.slane %v5019_v51, 1  ;;  %v753_v46 = vrot.slane %v4922_v61, 1 }
  0xad   : > { %v5038_v5 = vsel %vm563_vm1, %v589_v17, 0.0  ;;  %v929_v8 = vsel %vm901_vm2, %v927_v57, %v928_v58  ;;  %v931_v11 = vsel %vm901_vm2, %v928_v58, %v930_v43  ;;  %v4126_v15 = vunpack.i.h.bf16 %v4124_v12  ;;  %v326_v57 = vld [vmem:[%s4763_s8 + $0xa0] sm:$0xff] }
  0xae   : > { %v5045_v9 = vsel %vm563_vm1, 0.0, %v588_v55  ;;  %v4212_v10 = vpack.i.bf16 %v931_v11, %v929_v8  ;;  %v752_v61 = vsel %vm724_vm3, %v750_v56, %v751_v13  ;;  %v754_v14 = vsel %vm724_vm3, %v751_v13, %v753_v46 }
  0xaf   : > { %v4202_v34 = vpack.i.bf16 %v754_v14, %v752_v61  ;;  %v4125_v33 = vunpack.i.l.bf16 %v4124_v12  ;;  %v5051_v35 = vsel %vm498_vm0, %v325_v63, %v4126_v15  ;;  %v5058_v36 = vsel %vm563_vm1, %v582_v28, %v583_v24  ;;  %v327_v12 = vld [vmem:[%s4763_s8 + $0xa8] sm:$0xff] }
  0xb0   : > { %4213 = vrot.lane.b32.xlu0 %v4212_v10, %s4604_s14  ;;  %v592_v38 = vrot.slane %v5051_v35, 7  ;;  %v755_v39 = vrot.slane %v4968_v49, 1  ;;  %v756_v42 = vrot.slane %v5058_v36, 1  ;;  %v758_v44 = vrot.slane %v4960_v32, 1 }
  0xb1   : > { %4203 = vrot.lane.b32.xlu1 %v4202_v34, %s4605_s15  ;;  %v5069_v18 = vsel %vm498_vm0, %v324_v19, %v4125_v33  ;;  %v4131_v23 = vunpack.i.h.bf16 %v4129_v27  ;;  %v4130_v24 = vunpack.i.l.bf16 %v4129_v27  ;;  %v5074_v28 = vsel %vm563_vm1, %v585_v7, %v586_v0  ;;  %v4134_v7 = vpop.permute.xlu1 %4133  ;;  %v329_v34 = vld [vmem:[%s4763_s8 + $0xb8] sm:$0xff] }
  0xb2   : > { %v591_v58 = vrot.slane %v5069_v18, 7  ;;  %v5080_v43 = vsel %vm563_vm1, %v592_v38, 0.0  ;;  %v757_v56 = vsel %vm724_vm3, %v755_v39, %v756_v42  ;;  %v759_v13 = vsel %vm724_vm3, %v756_v42, %v758_v44 }
  0xb3   : > { %v4217_v46 = vpack.i.bf16 %v759_v13, %v757_v56  ;;  %v5085_v63 = vsel %vm498_vm0, %v326_v57, %v4130_v24  ;;  %v5088_v62 = vsel %vm498_vm0, %v327_v12, %v4131_v23  ;;  %v760_v0 = vrot.slane %v5004_v20, 1  ;;  %v4139_v56 = vpop.permute.xlu0 %4138 }
  0xb4   : > { %v5092_v8 = vsel %vm563_vm1, 0.0, %v591_v58  ;;  %v6390_v11 = vrot.slane %v5085_v63, 7  ;;  %v595_v15 = vrot.slane %v5088_v62, 7  ;;  %v761_v10 = vrot.slane %v5074_v28, 1 }
  0xb5   : > { %4218 = vrot.lane.b32.xlu0 %v4217_v46, %s4605_s15  ;;  %4208 = vrot.lane.b32.xlu1 %v4207_v6, %s4603_s27  ;;  %v763_v61 = vrot.slane %v4997_v3, 1  ;;  %v932_v14 = vrot.slane %v4968_v49, 2  ;;  %v933_v19 = vrot.slane %v5058_v36, 2  ;;  %v935_v27 = vrot.slane %v4960_v32, 2  ;;  %v328_v6 = vld [vmem:[%s4763_s8 + $0xb0] sm:$0xff]  ;;  %s4608_s27 = smov 96  }
  0xb6   : > { %v5110_v33 = vsel %vm563_vm1, 0.0, %v6390_v11  ;;  %v5115_v39 = vsel %vm563_vm1, %v595_v15, 0.0  ;;  %v762_v59 = vsel %vm724_vm3, %v760_v0, %v761_v10  ;;  %v4136_v60 = vunpack.i.h.bf16 %v4134_v7 }
  0xb7   : > { %v764_v42 = vsel %vm724_vm3, %v761_v10, %v763_v61  ;;  %v934_v44 = vsel %vm901_vm2, %v932_v14, %v933_v19  ;;  %v936_v32 = vsel %vm901_vm2, %v933_v19, %v935_v27  ;;  %v4135_v57 = vunpack.i.l.bf16 %v4134_v7  ;;  %v331_v10 = vld [vmem:[%s4763_s8 + $0xc8] sm:$0xff]  ;;  %v4149_v11 = vpop.permute.xlu0 %4148 }
  0xb8   : > { %v4227_v12 = vpack.i.bf16 %v764_v42, %v762_v59  ;;  %v4222_v18 = vpack.i.bf16 %v936_v32, %v934_v44  ;;  %v5123_v23 = vsel %vm498_vm0, %v329_v34, %v4136_v60  ;;  %v5130_v24 = vsel %vm563_vm1, %v588_v55, %v589_v17  ;;  %v330_v34 = vld [vmem:[%s4763_s8 + $0xc0] sm:$0xff] }
  0xb9   : > { %v5133_v13 = vsel %vm498_vm0, %v328_v6, %v4135_v57  ;;  %v6388_v46 = vrot.slane %v5123_v23, 7  ;;  %v765_v0 = vrot.slane %v5045_v9, 1  ;;  %v766_v7 = vrot.slane %v5130_v24, 1 }
  0xba   : > { %4228 = vrot.lane.b32.xlu0 %v4227_v12, %s4605_s15  ;;  %4223 = vrot.lane.b32.xlu1 %v4222_v18, %s4604_s14  ;;  %v6387_v22 = vrot.slane %v5133_v13, 7  ;;  %v768_v16 = vrot.slane %v5038_v5, 1  ;;  %v937_v17 = vrot.slane %v5004_v20, 2  ;;  %v938_v55 = vrot.slane %v5074_v28, 2  ;;  %v4144_v12 = vpop.permute.xlu1 %4143 }
  0xbb   : > { %v5148_v61 = vsel %vm563_vm1, %v6388_v46, 0.0  ;;  %v767_v14 = vsel %vm724_vm3, %v765_v0, %v766_v7  ;;  %v940_v19 = vrot.slane %v4997_v3, 2  ;;  %v4141_v27 = vunpack.i.h.bf16 %v4139_v56 }
  0xbc   : > { %v5156_v59 = vsel %vm563_vm1, 0.0, %v6387_v22  ;;  %v769_v60 = vsel %vm724_vm3, %v766_v7, %v768_v16  ;;  %v939_v6 = vsel %vm901_vm2, %v937_v17, %v938_v55  ;;  %v4140_v42 = vunpack.i.l.bf16 %v4139_v56 }
  0xbd   : > { %v4237_v44 = vpack.i.bf16 %v769_v60, %v767_v14  ;;  %v941_v32 = vsel %vm901_vm2, %v938_v55, %v940_v19  ;;  %v5162_v57 = vsel %vm498_vm0, %v331_v10, %v4141_v27  ;;  %v5167_v3 = vsel %vm563_vm1, %v591_v58, %v592_v38  ;;  %v333_v58 = vld [vmem:[%s4763_s8 + $0xd8] sm:$0xff]  ;;  %v332_v27 = vld [vmem:[%s4763_s8 + $0xd0] sm:$0xff] }
  0xbe   : > { %v4232_v18 = vpack.i.bf16 %v941_v32, %v939_v6  ;;  %v5170_v0 = vsel %vm498_vm0, %v330_v34, %v4140_v42  ;;  %v6386_v7 = vrot.slane %v5162_v57, 7  ;;  %v770_v56 = vrot.slane %v5092_v8, 1 }
  0xbf   : > { %4238 = vrot.lane.b32.xlu0 %v4237_v44, %s4605_s15  ;;  %v6389_v16 = vrot.slane %v5170_v0, 7  ;;  %v771_v17 = vrot.slane %v5167_v3, 1  ;;  %v773_v35 = vrot.slane %v5080_v43, 1  ;;  %v942_v38 = vrot.slane %v5045_v9, 2 }
  0xc0   : > { %4233 = vrot.lane.b32.xlu1 %v4232_v18, %s4604_s14  ;;  %v5184_v55 = vsel %vm563_vm1, %v6386_v7, 0.0  ;;  %v943_v10 = vrot.slane %v5130_v24, 2  ;;  %v945_v14 = vrot.slane %v5038_v5, 2  ;;  %v4146_v19 = vunpack.i.h.bf16 %v4144_v12 }
  0xc1   : > { %v5192_v34 = vsel %vm563_vm1, 0.0, %v6389_v16  ;;  %v772_v60 = vsel %vm724_vm3, %v770_v56, %v771_v17  ;;  %v774_v6 = vsel %vm724_vm3, %v771_v17, %v773_v35  ;;  %v4145_v42 = vunpack.i.l.bf16 %v4144_v12 }
  0xc2   : > { %v4247_v44 = vpack.i.bf16 %v774_v6, %v772_v60  ;;  %v944_v32 = vsel %vm901_vm2, %v942_v38, %v943_v10  ;;  %v946_v18 = vsel %vm901_vm2, %v943_v10, %v945_v14  ;;  %v526_v7 = vsel %vm498_vm0, %v333_v58, %v4146_v19  ;;  %v335_v14 = vld [vmem:[%s4763_s8 + $0xe8] sm:$0xff]  ;;  %v334_v19 = vld [vmem:[%s4763_s8 + $0xe0] sm:$0xff] }
  0xc3   : > { %v4242_v5 = vpack.i.bf16 %v946_v18, %v944_v32  ;;  %v525_v22 = vsel %vm498_vm0, %v332_v27, %v4145_v42  ;;  %v604_v46 = vrot.slane %v526_v7, 7  ;;  %v947_v16 = vrot.slane %v5092_v8, 2 }
  0xc4   : > { %4248 = vrot.lane.b32.xlu0 %v4247_v44, %s4605_s15  ;;  %v603_v56 = vrot.slane %v525_v22, 7  ;;  %v948_v12 = vrot.slane %v5167_v3, 2  ;;  %v950_v17 = vrot.slane %v5080_v43, 2  ;;  %v6397_v35 = vrot.slane %v5085_v63, 7 }
  0xc5   : > { %4243 = vrot.lane.b32.xlu1 %v4242_v5, %s4604_s14  ;;  %v5213_v7 = vsel %vm563_vm1, %v604_v46, 0.0  ;;  %v775_v58 = vrot.slane %v5110_v33, 1  ;;  %v778_v10 = vrot.slane %v5115_v39, 1  ;;  %v4150_v42 = vunpack.i.l.bf16 %v4149_v11 }
  0xc6   : > { %v5209_v38 = vsel %vm563_vm1, %v6397_v35, %v595_v15  ;;  %v5220_v43 = vsel %vm563_vm1, 0.0, %v603_v56  ;;  %v949_v63 = vsel %vm901_vm2, %v947_v16, %v948_v12  ;;  %v951_v62 = vsel %vm901_vm2, %v948_v12, %v950_v17 }
  0xc7   : > { %v776_v22 = vrot.slane %v5209_v38, 1  ;;  %v4151_v15 = vunpack.i.h.bf16 %v4149_v11  ;;  %v4257_v27 = vpack.i.bf16 %v951_v62, %v949_v63  ;;  %v6398_v18 = vrot.slane %v5123_v23, 7 }
  0xc8   : > { %v6399_v5 = vrot.slane %v5133_v13, 7  ;;  %v780_v16 = vrot.slane %v5156_v59, 1  ;;  %v527_v12 = vsel %vm498_vm0, %v334_v19, %v4150_v42  ;;  %v783_v11 = vrot.slane %v5148_v61, 1 }
  0xc9   : > { %v777_v60 = vsel %vm724_vm3, %v775_v58, %v776_v22  ;;  %v779_v6 = vsel %vm724_vm3, %v776_v22, %v778_v10  ;;  %v528_v32 = vsel %vm498_vm0, %v335_v14, %v4151_v15  ;;  %4258 = vrot.lane.b32.xlu0 %v4257_v27, %s4604_s14  ;;  %v606_v22 = vrot.slane %v527_v12, 7 }
  0xca   : > { %v4252_v44 = vpack.i.bf16 %v779_v6, %v777_v60  ;;  %v5233_v35 = vsel %vm563_vm1, %v6399_v5, %v6398_v18  ;;  %v607_v17 = vrot.slane %v528_v32, 7  ;;  %v952_v23 = vrot.slane %v5110_v33, 2 }
  0xcb   : > { %v781_v58 = vrot.slane %v5233_v35, 1  ;;  %v953_v13 = vrot.slane %v5209_v38, 2  ;;  %v955_v10 = vrot.slane %v5115_v39, 2  ;;  %v957_v15 = vrot.slane %v5156_v59, 2 }
  0xcc   : > { %4253 = vrot.lane.b32.xlu1 %v4252_v44, %s4605_s15  ;;  %v690_v14 = vsel %vm563_vm1, %v607_v17, 0.0  ;;  %v5249_v19 = vsel %vm563_vm1, 0.0, %v606_v22  ;;  %v958_v44 = vrot.slane %v5233_v35, 2  ;;  %v960_v39 = vrot.slane %v5148_v61, 2 }
  0xcd   : > { %v782_v63 = vsel %vm724_vm3, %v780_v16, %v781_v58  ;;  %v784_v62 = vsel %vm724_vm3, %v781_v58, %v783_v11  ;;  %v954_v60 = vsel %vm901_vm2, %v952_v23, %v953_v13  ;;  %v956_v6 = vsel %vm901_vm2, %v953_v13, %v955_v10 }
  0xce   : > { %v4267_v27 = vpack.i.bf16 %v784_v62, %v782_v63  ;;  %v4262_v42 = vpack.i.bf16 %v956_v6, %v954_v60  ;;  %v6400_v32 = vrot.slane %v5162_v57, 7  ;;  %v6401_v18 = vrot.slane %v5170_v0, 7 }
  0xcf   : > { %v785_v16 = vrot.slane %v5192_v34, 1  ;;  %v788_v58 = vrot.slane %v5184_v55, 1  ;;  %v5267_v11 = vsel %vm563_vm1, %v603_v56, %v604_v46  ;;  %v959_v61 = vsel %vm901_vm2, %v957_v15, %v958_v44 }
  0xd0   : > { %v5260_v5 = vsel %vm563_vm1, %v6401_v18, %v6400_v32  ;;  %4268 = vrot.lane.b32.xlu0 %v4267_v27, %s4605_s15  ;;  %4263 = vrot.lane.b32.xlu1 %v4262_v42, %s4604_s14  ;;  %v961_v57 = vsel %vm901_vm2, %v958_v44, %v960_v39  ;;  %v790_v0 = vrot.slane %v5220_v43, 1  ;;  %v791_v23 = vrot.slane %v5267_v11, 1 }
  0xd1   : > { %v786_v12 = vrot.slane %v5260_v5, 1  ;;  %v4277_v13 = vpack.i.bf16 %v961_v57, %v959_v61  ;;  %v793_v62 = vrot.slane %v5213_v7, 1  ;;  %v962_v56 = vrot.slane %v5192_v34, 2 }
  0xd2   : > { %v792_v46 = vsel %vm724_vm3, %v790_v0, %v791_v23  ;;  %v963_v15 = vrot.slane %v5260_v5, 2  ;;  %v965_v6 = vrot.slane %v5184_v55, 2  ;;  %v967_v42 = vrot.slane %v5220_v43, 2 }
  0xd3   : > { %v787_v10 = vsel %vm724_vm3, %v785_v16, %v786_v12  ;;  %v789_v63 = vsel %vm724_vm3, %v786_v12, %v788_v58  ;;  %v794_v60 = vsel %vm724_vm3, %v791_v23, %v793_v62  ;;  %v968_v44 = vrot.slane %v5267_v11, 2 }
  0xd4   : > { %v4272_v27 = vpack.i.bf16 %v789_v63, %v787_v10  ;;  %4278 = vrot.lane.b32.xlu0 %v4277_v13, %s4604_s14  ;;  %v4287_v39 = vpack.i.bf16 %v794_v60, %v792_v46  ;;  %v964_v32 = vsel %vm901_vm2, %v962_v56, %v963_v15  ;;  %v970_v18 = vrot.slane %v5213_v7, 2 }
  0xd5   : > { %v5289_v16 = vsel %vm563_vm1, %v606_v22, %v607_v17  ;;  %v966_v12 = vsel %vm901_vm2, %v963_v15, %v965_v6  ;;  %v969_v58 = vsel %vm901_vm2, %v967_v42, %v968_v44  ;;  %v795_v55 = vrot.slane %v5249_v19, 1 }
  0xd6   : > { %4273 = vrot.lane.b32.xlu1 %v4272_v27, %s4605_s15  ;;  %v796_v61 = vrot.slane %v5289_v16, 1  ;;  %v4282_v57 = vpack.i.bf16 %v966_v12, %v964_v32  ;;  %v971_v0 = vsel %vm901_vm2, %v968_v44, %v970_v18  ;;  %v798_v23 = vrot.slane %v690_v14, 1  ;;  %v4331_v27 = vld [vmem:[%s6382_s3 + $0x70] sm:$0xff]  }
  0xd7   : > { %v972_v13 = vrot.slane %v5249_v19, 2  ;;  %v4297_v7 = vpack.i.bf16 %v971_v0, %v969_v58  ;;  %v973_v22 = vrot.slane %v5289_v16, 2  ;;  %v975_v10 = vrot.slane %v690_v14, 2 }
  0xd8   : > { %4288 = vrot.lane.b32.xlu0 %v4287_v39, %s4605_s15  ;;  %v797_v17 = vsel %vm724_vm3, %v795_v55, %v796_v61  ;;  %v799_v63 = vsel %vm724_vm3, %v796_v61, %v798_v23  ;;  %v1336_v62 = vsel %vm901_vm2, %v4798_v25, 0  ;;  %v4606_v60 = vmov 0  }
  0xd9   : > { %v4292_v46 = vpack.i.bf16 %v799_v63, %v797_v17  ;;  %v974_v56 = vsel %vm901_vm2, %v972_v13, %v973_v22  ;;  %v976_v15 = vsel %vm901_vm2, %v973_v22, %v975_v10  ;;  %3823 = vmatpush3.bf16.msra.mxu1 %v1336_v62  ;;  %3824 = vmatprep.mubr.bf16.mxu1 %v4606_v60  ;;  %v5312_v14 = vsel %vm901_vm2, %v4854_v53, 0 }
  0xda   : > { %4283 = vrot.lane.b32.xlu1 %v4282_v57, %s4604_s14  ;;  %3948 = vmatprep.subr.bf16.mxu1 %v4715_v47  ;;  %v4302_v25 = vpack.i.bf16 %v976_v15, %v974_v56 }
  0xdb   : > { %3869 = vmatpush3.bf16.msra.mxu0 %v5312_v14 }
  0xdc   : > { %4298 = vrot.lane.b32.xlu0 %v4297_v7, %s4604_s14  ;;  %3902 = vmatprep.subr.bf16.mxu0 %v4331_v27 }
  0xde   : > { %4293 = vrot.lane.b32.xlu1 %v4292_v46, %s4605_s15 }
  0xe2   : > { %4303 = vrot.lane.b32.xlu1 %v4302_v25, %s4604_s14 }
 0x108   : > { %v4159_v6 = vpop.permute.xlu0 %4158 }
 0x109   : > { %v4161_v42 = vunpack.i.h.bf16 %v4159_v6  ;;  %v4160_v44 = vunpack.i.l.bf16 %v4159_v6 }
 0x10a   : > { %v4154_v39 = vpop.permute.xlu1 %4153 }
 0x10b   : > { %v4156_v32 = vunpack.i.h.bf16 %v4154_v39  ;;  %v4155_v18 = vunpack.i.l.bf16 %v4154_v39 }
 0x10d   : > { %v1080_v12 = vsel %vm1078_vm4, %v4829_v37, %v4156_v32  ;;  %v1079_v58 = vsel %vm1078_vm4, %v4792_v21, %v4155_v18  ;;  %v4169_v55 = vpop.permute.xlu0 %4168 }
 0x10e   : > { %v1112_v61 = vsel %vm1111_vm5, %v1079_v58, %v4160_v44  ;;  %v1113_v57 = vsel %vm1111_vm5, %v1080_v12, %v4161_v42  ;;  %v4171_v0 = vunpack.i.h.bf16 %v4169_v55  ;;  %v4170_v23 = vunpack.i.l.bf16 %v4169_v55 }
 0x10f   : > { %v4164_v13 = vpop.permute.xlu1 %4163  ;;  %v1144_v7 = vpack.c.bf16 %v1113_v57, %v1112_v61 }
 0x110   : > { %v4166_v17 = vunpack.i.h.bf16 %v4164_v13  ;;  %v4165_v22 = vunpack.i.l.bf16 %v4164_v13 }
 0x111   : > { %3825 = vmatmul.mubr.msk.bf16.vlgmr.msra.gmra.mrb[0].mxu1 %vm1286_vm6, %v1144_v7  ;;  %3870 = vmatprep.mubr.msk.bf16.mxu0 %vm1286_vm6, %v1144_v7 }
 0x112   : > { %v1082_v37 = vsel %vm1078_vm4, %v4861_v1, %v4166_v17  ;;  %v1081_v21 = vsel %vm1078_vm4, %v4834_v40, %v4165_v22  ;;  %3955 = vmatpush3.bf16.msra.mxu1 %v4715_v47  ;;  %v4332_v1 = vld [vmem:[%s6382_s3 + $0x78] sm:$0xff]  }
 0x113   : > { %v4179_v10 = vpop.permute.xlu0 %4178  ;;  %v1114_v63 = vsel %vm1111_vm5, %v1081_v21, %v4170_v23  ;;  %v1115_v62 = vsel %vm1111_vm5, %v1082_v37, %v4171_v0  ;;  %3949 = vmatprep.subr.bf16.mxu1 %v4720_v48 }
 0x114   : > { %v4181_v46 = vunpack.i.h.bf16 %v4179_v10  ;;  %v4180_v56 = vunpack.i.l.bf16 %v4179_v10  ;;  %v4174_v15 = vpop.permute.xlu1 %4173  ;;  %v5335_v25 = vpack.c.bf16 %v1115_v62, %v1114_v63 }
 0x115   : > { %v4176_v6 = vunpack.i.h.bf16 %v4174_v15  ;;  %v4175_v40 = vunpack.i.l.bf16 %v4174_v15 }
 0x116   : > { %3828 = vmatprep.mubr.msk.bf16.mxu1 %vm1286_vm6, %v5335_v25  ;;  %3871 = vmatmul.mubr.msk.bf16.vlgmr.msra.gmra.mrb[0].mxu0 %vm1286_vm6, %v5335_v25 }
 0x117   : > { %v1084_v47 = vsel %vm1078_vm4, %v4904_v41, %v4176_v6  ;;  %v1083_v42 = vsel %vm1078_vm4, %v4810_v29, %v4175_v40  ;;  %3903 = vmatpush3.bf16.msra.mxu0 %v4331_v27  ;;  %3956 = vmatpush3.bf16.msra.mxu1 %v4720_v48  ;;  %v4333_v29 = vld [vmem:[%s6382_s3 + $0x80] sm:$0xff]   ;;  %v4594_v40 = vld [vmem:[%s6382_s3 + $0x58] sm:$0xff]  }
 0x118   : > { %v4189_v44 = vpop.permute.xlu0 %4188  ;;  %v1116_v39 = vsel %vm1111_vm5, %v1083_v42, %v4180_v56  ;;  %v1117_v32 = vsel %vm1111_vm5, %v1084_v47, %v4181_v46  ;;  %3904 = vmatprep.subr.bf16.mxu0 %v4332_v1  ;;  %3950 = vmatprep.subr.bf16.mxu1 %v4731_v50  ;;  %v336_v42 = vld [vmem:[%s4763_s8 + $0xf0] sm:$0xff] }
 0x119   : > { %v4191_v18 = vunpack.i.h.bf16 %v4189_v44  ;;  %v4190_v12 = vunpack.i.l.bf16 %v4189_v44  ;;  %v4184_v58 = vpop.permute.xlu1 %4183  ;;  %v5352_v55 = vpack.c.bf16 %v1117_v32, %v1116_v39  ;;  %v337_v44 = vld [vmem:[%s4763_s8 + $0xf8] sm:$0xff] }
 0x11a   : > { %v4186_v41 = vunpack.i.h.bf16 %v4184_v58  ;;  %v4185_v27 = vunpack.i.l.bf16 %v4184_v58  ;;  %v4337_v58 = vld [vmem:[%s6382_s3 + $0xa0] sm:$0x3f]  }
 0x11b   : > { %3829 = vmatmul.mubr.msk.bf16.gmra.mrb[4].mxu1 %vm1286_vm6, %v5352_v55  ;;  %3874 = vmatprep.mubr.msk.bf16.mxu0 %vm1286_vm6, %v5352_v55 }
 0x11c   : > { %v1086_v48 = vsel %vm1078_vm4, %v4943_v30, %v4186_v41  ;;  %v1085_v61 = vsel %vm1078_vm4, %v4842_v45, %v4185_v27  ;;  %3905 = vmatpush3.bf16.msra.mxu0 %v4332_v1  ;;  %3957 = vmatpush3.bf16.msra.mxu1 %v4731_v50  ;;  %v4334_v45 = vld [vmem:[%s6382_s3 + $0x88] sm:$0xff]  }
 0x11d   : > { %v4199_v57 = vpop.permute.xlu0 %4198  ;;  %v1118_v0 = vsel %vm1111_vm5, %v1085_v61, %v4190_v12  ;;  %v1119_v23 = vsel %vm1111_vm5, %v1086_v48, %v4191_v18  ;;  %3906 = vmatprep.subr.bf16.mxu0 %v4333_v29  ;;  %3951 = vmatprep.subr.bf16.mxu1 %v4741_v52 }
 0x11e   : > { %v4201_v13 = vunpack.i.h.bf16 %v4199_v57  ;;  %v4200_v7 = vunpack.i.l.bf16 %v4199_v57  ;;  %v4194_v17 = vpop.permute.xlu1 %4193  ;;  %v5369_v22 = vpack.c.bf16 %v1119_v23, %v1118_v0 }
 0x11f   : > { %v4196_v30 = vunpack.i.h.bf16 %v4194_v17  ;;  %v4195_v37 = vunpack.i.l.bf16 %v4194_v17 }
 0x120   : > { %3832 = vmatprep.mubr.msk.bf16.mxu1 %vm1286_vm6, %v5369_v22  ;;  %3875 = vmatmul.mubr.msk.bf16.gmra.mrb[4].mxu0 %vm1286_vm6, %v5369_v22 }
 0x121   : > { %v1088_v50 = vsel %vm1078_vm4, %v4986_v2, %v4196_v30  ;;  %v1087_v21 = vsel %vm1078_vm4, %v4892_v31, %v4195_v37  ;;  %3907 = vmatpush3.bf16.msra.mxu0 %v4333_v29  ;;  %3958 = vmatpush3.bf16.msra.mxu1 %v4741_v52  ;;  %v4335_v31 = vld [vmem:[%s6382_s3 + $0x90] sm:$0xff]  }
 0x122   : > { %v4214_v10 = vpop.permute.xlu0 %4213  ;;  %v1120_v63 = vsel %vm1111_vm5, %v1087_v21, %v4200_v7  ;;  %v1121_v62 = vsel %vm1111_vm5, %v1088_v50, %v4201_v13  ;;  %3908 = vmatprep.subr.bf16.mxu0 %v4334_v45  ;;  %3952 = vmatprep.subr.bf16.mxu1 %v4751_v54  ;;  %v1971_v7 = vsel %vm901_vm2, %v4337_v58, 0 }
 0x123   : > { %v4216_v46 = vunpack.i.h.bf16 %v4214_v10  ;;  %v4215_v56 = vunpack.i.l.bf16 %v4214_v10  ;;  %v4204_v15 = vpop.permute.xlu1 %4203  ;;  %v5386_v2 = vpack.c.bf16 %v1121_v62, %v1120_v63 }
 0x124   : > { %v4206_v52 = vunpack.i.h.bf16 %v4204_v15  ;;  %v4205_v1 = vunpack.i.l.bf16 %v4204_v15 }
 0x125   : > { %3833 = vmatmul.mubr.msk.bf16.gmra.mrb[8].mxu1 %vm1286_vm6, %v5386_v2  ;;  %3878 = vmatprep.mubr.msk.bf16.mxu0 %vm1286_vm6, %v5386_v2 }
 0x126   : > { %v1090_v54 = vsel %vm1078_vm4, %v5019_v51, %v4206_v52  ;;  %v1089_v6 = vsel %vm1078_vm4, %v4930_v4, %v4205_v1  ;;  %3909 = vmatpush3.bf16.msra.mxu0 %v4334_v45  ;;  %3959 = vmatpush3.bf16.msra.mxu1 %v4594_v40  ;;  %v4336_v4 = vld [vmem:[%s6382_s3 + $0x98] sm:$0xff]  }
 0x127   : > { %v4219_v47 = vpop.permute.xlu0 %4218  ;;  %v4209_v39 = vpop.permute.xlu1 %4208  ;;  %v1122_v32 = vsel %vm1111_vm5, %v1089_v6, %v4215_v56  ;;  %v1123_v18 = vsel %vm1111_vm5, %v1090_v54, %v4216_v46  ;;  %3910 = vmatprep.subr.bf16.mxu0 %v4335_v31  ;;  %3953 = vmatprep.subr.bf16.mxu1 %v4803_v26 }
 0x128   : > { %v4211_v51 = vunpack.i.h.bf16 %v4209_v39  ;;  %v4210_v12 = vunpack.i.l.bf16 %v4209_v39  ;;  %v4221_v29 = vunpack.i.h.bf16 %v4219_v47  ;;  %v4220_v41 = vunpack.i.l.bf16 %v4219_v47 }
 0x129   : > { %v5413_v27 = vpack.c.bf16 %v1123_v18, %v1122_v32 }
 0x12a   : > { %v530_v48 = vsel %vm498_vm0, %v337_v44, %v4211_v51  ;;  %v529_v61 = vsel %vm498_vm0, %v336_v42, %v4210_v12  ;;  %3911 = vmatpush3.bf16.msra.mxu0 %v4335_v31  ;;  %3960 = vmatpush3.bf16.msra.mxu1 %v4803_v26  ;;  %v1092_v17 = vsel %vm1078_vm4, %v5058_v36, %v4221_v29 }
 0x12b   : > { %v610_v57 = vrot.slane %v530_v48, 7  ;;  %v609_v0 = vrot.slane %v529_v61, 7  ;;  %3836 = vmatprep.mubr.msk.bf16.mxu1 %vm1286_vm6, %v5413_v27  ;;  %3879 = vmatmul.mubr.msk.bf16.gmra.mrb[8].mxu0 %vm1286_vm6, %v5413_v27  ;;  %v1091_v45 = vsel %vm1078_vm4, %v4968_v49, %v4220_v41  ;;  %v2455_v61 = vld [vmem:[%s5458_s12 + $0x8] sm:$0xff] }
 0x12c   : > { %v4229_v23 = vpop.permute.xlu0 %4228  ;;  %v4224_v13 = vpop.permute.xlu1 %4223  ;;  %3912 = vmatprep.subr.bf16.mxu0 %v4336_v4  ;;  %4060 = vmatprep.subr.msk.bf16.mxu1 %vm901_vm2, %v4854_v53 }
 0x12d   : > { %v691_v30 = vsel %vm563_vm1, %v610_v57, 0.0  ;;  %v5429_v37 = vsel %vm563_vm1, 0.0, %v609_v0  ;;  %v4226_v50 = vunpack.i.h.bf16 %v4224_v13  ;;  %v4225_v21 = vunpack.i.l.bf16 %v4224_v13 }
 0x12e   : > { %v5434_v10 = vsel %vm563_vm1, %v609_v0, %v610_v57  ;;  %v977_v26 = vrot.slane %v5429_v37, 2  ;;  %3913 = vmatpush3.bf16.msra.mxu0 %v4336_v4  ;;  %v4231_v36 = vunpack.i.h.bf16 %v4229_v23  ;;  %v4230_v63 = vunpack.i.l.bf16 %v4229_v23  ;;  %3961 = vmatpush3.bf16.msra.mxu1 %v5312_v14 }
 0x12f   : > { %v978_v49 = vrot.slane %v5434_v10, 2  ;;  %v980_v62 = vrot.slane %v691_v30, 2  ;;  %4061 = vmatprep.subr.msk.bf16.mxu0 %vm901_vm2, %v4337_v58  ;;  %v1125_v46 = vsel %vm1111_vm5, %v1092_v17, %v4226_v50  ;;  %v1124_v56 = vsel %vm1111_vm5, %v1091_v45, %v4225_v21  ;;  %v2457_v50 = vld [vmem:[%s5458_s12 + $0x18] sm:$0xff] }
 0x130   : > { %v800_v53 = vrot.slane %v5429_v37, 1  ;;  %v801_v15 = vrot.slane %v5434_v10, 1  ;;  %v5444_v52 = vpack.c.bf16 %v1125_v46, %v1124_v56  ;;  %v803_v6 = vrot.slane %v691_v30, 1 }
 0x131   : > { %v4239_v31 = vpop.permute.xlu0 %4238  ;;  %v979_v1 = vsel %vm901_vm2, %v977_v26, %v978_v49  ;;  %v981_v54 = vsel %vm901_vm2, %v978_v49, %v980_v62  ;;  %v1094_v32 = vsel %vm1078_vm4, %v5074_v28, %v4231_v36  ;;  %v1093_v18 = vsel %vm1078_vm4, %v5004_v20, %v4230_v63  ;;  %v2454_v28 = vld [vmem:[%s5458_s12] sm:$0xff] }
 0x132   : > { %v4234_v40 = vpop.permute.xlu1 %4233  ;;  %v4312_v47 = vpack.i.bf16 %v981_v54, %v979_v1  ;;  %v802_v42 = vsel %vm724_vm3, %v800_v53, %v801_v15  ;;  %3915 = vmatpush3.bf16.msra.mxu0 %v1971_v7  ;;  %3837 = vmatmul.mubr.msk.bf16.gmra.mrb[12].mxu1 %vm1286_vm6, %v5444_v52  ;;  %v804_v14 = vsel %vm724_vm3, %v801_v15, %v803_v6  ;;  %v4241_v12 = vunpack.i.h.bf16 %v4239_v31 }
 0x133   : > { %v4236_v44 = vunpack.i.h.bf16 %v4234_v40  ;;  %v4235_v39 = vunpack.i.l.bf16 %v4234_v40  ;;  %3882 = vmatprep.mubr.msk.bf16.mxu0 %vm1286_vm6, %v5444_v52  ;;  %v4307_v51 = vpack.i.bf16 %v804_v14, %v802_v42  ;;  %v4240_v4 = vunpack.i.l.bf16 %v4239_v31  ;;  %v2459_v31 = vld [vmem:[%s5458_s12 + $0x28] sm:$0xff] }
 0x134   : > { %4313 = vrot.lane.b32.xlu1 %v4312_v47, %s4604_s14  ;;  %v1096_v23 = vsel %vm1078_vm4, %v5130_v24, %v4241_v12 }
 0x135   : > { %v1127_v58 = vsel %vm1111_vm5, %v1094_v32, %v4236_v44  ;;  %v1126_v29 = vsel %vm1111_vm5, %v1093_v18, %v4235_v39  ;;  %4308 = vrot.lane.b32.xlu0 %v4307_v51, %s4605_s15  ;;  %v1095_v13 = vsel %vm1078_vm4, %v5045_v9, %v4240_v4  ;;  %v2456_v9 = vld [vmem:[%s5458_s12 + $0x10] sm:$0xff]  ;;  %v2461_v39 = vld [vmem:[%s5458_s12 + $0x38] sm:$0xff] }
 0x136   : > { %v4249_v41 = vpop.permute.xlu0 %4248  ;;  %v5468_v48 = vpack.c.bf16 %v1127_v58, %v1126_v29  ;;  %v2460_v44 = vld [vmem:[%s5458_s12 + $0x30] sm:$0xff] }
 0x137   : > { %v4244_v57 = vpop.permute.xlu1 %4243  ;;  %v4251_v7 = vunpack.i.h.bf16 %v4249_v41  ;;  %v4250_v17 = vunpack.i.l.bf16 %v4249_v41 }
 0x138   : > { %v4246_v0 = vunpack.i.h.bf16 %v4244_v57  ;;  %v4245_v20 = vunpack.i.l.bf16 %v4244_v57  ;;  %3840 = vmatprep.mubr.msk.bf16.mxu1 %vm1286_vm6, %v5468_v48  ;;  %3883 = vmatmul.mubr.msk.bf16.gmra.mrb[12].mxu0 %vm1286_vm6, %v5468_v48  ;;  %v2462_v57 = vld [vmem:[%s5458_s12 + $0x40] sm:$0xff] }
 0x139   : > { %3916 = vmatprep.mubr.msk.bf16.mxu0 %vm1286_vm6, %v5335_v25  ;;  %2520 = vrot.lane.b32.xlu1 %v2455_v61, %s4607_s13  ;;  %v1098_v25 = vsel %vm1078_vm4, %v5167_v3, %v4251_v7  ;;  %v1097_v49 = vsel %vm1078_vm4, %v5092_v8, %v4250_v17  ;;  %v2458_v3 = vld [vmem:[%s5458_s12 + $0x20] sm:$0xff] }
 0x13a   : > { %v1129_v45 = vsel %vm1111_vm5, %v1096_v23, %v4246_v0  ;;  %v1128_v30 = vsel %vm1111_vm5, %v1095_v13, %v4245_v20  ;;  %2518 = vrot.lane.b32.xlu0 %v2454_v28, %s4607_s13 }
 0x13b   : > { %v4259_v21 = vpop.permute.xlu0 %4258  ;;  %v5487_v24 = vpack.c.bf16 %v1129_v45, %v1128_v30  ;;  %v2464_v45 = vld [vmem:[%s5458_s12 + $0x50] sm:$0xff] }
 0x13c   : > { %v4261_v26 = vunpack.i.h.bf16 %v4259_v21  ;;  %v4260_v36 = vunpack.i.l.bf16 %v4259_v21  ;;  %v2465_v21 = vld [vmem:[%s5458_s12 + $0x58] sm:$0xff] }
 0x13d   : > { %3841 = vmatmul.mubr.msk.bf16.gmra.mrb[16].mxu1 %vm1286_vm6, %v5487_v24  ;;  %2524 = vrot.lane.b32.xlu1 %v2457_v50, %s4607_s13 }
 0x13e   : > { %v4254_v63 = vpop.permute.xlu1 %4253  ;;  %v1130_v62 = vsel %vm1111_vm5, %v1097_v49, %v4260_v36  ;;  %v1131_v46 = vsel %vm1111_vm5, %v1098_v25, %v4261_v26  ;;  %2522 = vrot.lane.b32.xlu0 %v2456_v9, %s4607_s13 }
 0x13f   : > { %v4256_v56 = vunpack.i.h.bf16 %v4254_v63  ;;  %v4255_v53 = vunpack.i.l.bf16 %v4254_v63  ;;  %v5500_v15 = vpack.c.bf16 %v1131_v46, %v1130_v62 }
 0x140   : > { %3917 = vmatmul.mubr.msk.bf16.vlgmr.msra.gmra.mrb[0].mxu0 %vm1286_vm6, %v5352_v55 }
 0x141   : > { %3844 = vmatprep.mubr.msk.bf16.mxu1 %vm1286_vm6, %v5500_v15  ;;  %3920 = vmatprep.mubr.msk.bf16.mxu0 %vm1286_vm6, %v5369_v22  ;;  %v1100_v42 = vsel %vm1078_vm4, %v5209_v38, %v4256_v56  ;;  %v1099_v55 = vsel %vm1078_vm4, %v5110_v33, %v4255_v53  ;;  %v2466_v56 = vld [vmem:[%s5458_s12 + $0x60] sm:$0xff] }
 0x142   : > { %v4269_v8 = vpop.permute.xlu0 %4268  ;;  %v4264_v1 = vpop.permute.xlu1 %4263  ;;  %2526 = vrot.lane.b32.xlu0 %v2458_v3, %s4607_s13  ;;  %2528 = vrot.lane.b32.xlu1 %v2459_v31, %s4607_s13 }
 0x143   : > { %v4271_v54 = vunpack.i.h.bf16 %v4269_v8  ;;  %v4270_v6 = vunpack.i.l.bf16 %v4269_v8  ;;  %v4266_v40 = vunpack.i.h.bf16 %v4264_v1  ;;  %v4265_v47 = vunpack.i.l.bf16 %v4264_v1 }
 0x145   : > { %v1132_v14 = vsel %vm1111_vm5, %v1099_v55, %v4265_v47  ;;  %v1133_v22 = vsel %vm1111_vm5, %v1100_v42, %v4266_v40  ;;  %v1102_v38 = vsel %vm1078_vm4, %v5233_v35, %v4271_v54  ;;  %v1101_v33 = vsel %vm1078_vm4, %v5156_v59, %v4270_v6  ;;  %v2463_v59 = vld [vmem:[%s5458_s12 + $0x48] sm:$0xff]  ;;  %v2469_v6 = vld [vmem:[%s5458_s12 + $0x78] sm:$0xff]  ;;  %v2472_v47 = vld [vmem:[%s5458_s12 + $0x90] sm:$0xff] }
 0x146   : > { %v4279_v32 = vpop.permute.xlu0 %4278  ;;  %v5520_v4 = vpack.c.bf16 %v1133_v22, %v1132_v14  ;;  %2530 = vrot.lane.b32.xlu0 %v2460_v44, %s4607_s13  ;;  %2532 = vrot.lane.b32.xlu1 %v2461_v39, %s4607_s13  ;;  %v2473_v42 = vld [vmem:[%s5458_s12 + $0x98] sm:$0xff]  ;;  %v2475_v55 = vld [vmem:[%s5458_s12 + $0xa8] sm:$0xff] }
 0x147   : > { %v4281_v18 = vunpack.i.h.bf16 %v4279_v32  ;;  %v4280_v51 = vunpack.i.l.bf16 %v4279_v32  ;;  %v2477_v44 = vld [vmem:[%s5458_s12 + $0xb8] sm:$0xff]  ;;  %v2478_v39 = vld [vmem:[%s5458_s12 + $0xc0] sm:$0xff]  ;;  %v2479_v14 = vld [vmem:[%s5458_s12 + $0xc8] sm:$0xff] }
 0x148   : > { %v4274_v12 = vpop.permute.xlu1 %4273  ;;  %3845 = vmatmul.mubr.msk.bf16.gmra.mrb[20].mxu1 %vm1286_vm6, %v5520_v4  ;;  %3921 = vmatmul.mubr.msk.bf16.gmra.mrb[4].mxu0 %vm1286_vm6, %v5386_v2  ;;  %v2480_v22 = vld [vmem:[%s5458_s12 + $0xd0] sm:$0xff]  ;;  %v2481_v32 = vld [vmem:[%s5458_s12 + $0xd8] sm:$0xff] }
 0x149   : > { %v1134_v58 = vsel %vm1111_vm5, %v1101_v33, %v4280_v51  ;;  %v1135_v29 = vsel %vm1111_vm5, %v1102_v38, %v4281_v18  ;;  %v4276_v41 = vunpack.i.h.bf16 %v4274_v12  ;;  %v4275_v61 = vunpack.i.l.bf16 %v4274_v12  ;;  %3924 = vmatprep.mubr.msk.bf16.mxu0 %vm1286_vm6, %v5413_v27  ;;  %v2482_v18 = vld [vmem:[%s5458_s12 + $0xe0] sm:$0xff]  ;;  %v2483_v51 = vld [vmem:[%s5458_s12 + $0xe8] sm:$0xff]  ;;  %v2484_v12 = vld [vmem:[%s5458_s12 + $0xf0] sm:$0xff] }
 0x14a   : > { %v4289_v28 = vpop.permute.xlu0 %4288  ;;  %v5533_v35 = vpack.c.bf16 %v1135_v29, %v1134_v58  ;;  %2534 = vrot.lane.b32.xlu0 %v2462_v57, %s4607_s13  ;;  %2536 = vrot.lane.b32.xlu1 %v2463_v59, %s4607_s13 }
 0x14b   : > { %v4291_v20 = vunpack.i.h.bf16 %v4289_v28  ;;  %v4290_v23 = vunpack.i.l.bf16 %v4289_v28  ;;  %v1104_v17 = vsel %vm1078_vm4, %v5260_v5, %v4276_v41  ;;  %v1103_v2 = vsel %vm1078_vm4, %v5192_v34, %v4275_v61 }
 0x14c   : > { %v4284_v0 = vpop.permute.xlu1 %4283  ;;  %3848 = vmatprep.mubr.msk.bf16.mxu1 %vm1286_vm6, %v5533_v35 }
 0x14d   : > { %v4286_v13 = vunpack.i.h.bf16 %v4284_v0  ;;  %v4285_v7 = vunpack.i.l.bf16 %v4284_v0  ;;  %v1106_v5 = vsel %vm1078_vm4, %v5267_v11, %v4291_v20  ;;  %v1105_v34 = vsel %vm1078_vm4, %v5220_v43, %v4290_v23  ;;  %v2467_v43 = vld [vmem:[%s5458_s12 + $0x68] sm:$0xff] }
 0x14e   : > { %v4299_v50 = vpop.permute.xlu0 %4298  ;;  %2538 = vrot.lane.b32.xlu0 %v2464_v45, %s4607_s13  ;;  %2540 = vrot.lane.b32.xlu1 %v2465_v21, %s4607_s13 }
 0x14f   : > { %v1136_v27 = vsel %vm1111_vm5, %v1103_v2, %v4285_v7  ;;  %v1137_v30 = vsel %vm1111_vm5, %v1104_v17, %v4286_v13  ;;  %v4301_v9 = vunpack.i.h.bf16 %v4299_v50  ;;  %v4300_v26 = vunpack.i.l.bf16 %v4299_v50 }
 0x150   : > { %v4294_v36 = vpop.permute.xlu1 %4293  ;;  %v1156_v63 = vpack.c.bf16 %v1137_v30, %v1136_v27  ;;  %3925 = vmatmul.mubr.msk.bf16.gmra.mrb[8].mxu0 %vm1286_vm6, %v5444_v52  ;;  %v2468_v52 = vld [vmem:[%s5458_s12 + $0x70] sm:$0xff] }
 0x151   : > { %v1138_v25 = vsel %vm1111_vm5, %v1105_v34, %v4300_v26  ;;  %v1139_v49 = vsel %vm1111_vm5, %v1106_v5, %v4301_v9  ;;  %v4296_v62 = vunpack.i.h.bf16 %v4294_v36  ;;  %v4295_v46 = vunpack.i.l.bf16 %v4294_v36  ;;  %3928 = vmatprep.mubr.msk.bf16.mxu0 %vm1286_vm6, %v5468_v48 }
 0x152   : > { %3849 = vmatmul.mubr.msk.bf16.gmra.mrb[24].mxu1 %vm1286_vm6, %v1156_v63  ;;  %v1157_v53 = vpack.c.bf16 %v1139_v49, %v1138_v25  ;;  %2542 = vrot.lane.b32.xlu0 %v2466_v56, %s4607_s13 }
 0x153   : > { %v1108_v8 = vsel %vm1078_vm4, %v5289_v16, %v4296_v62  ;;  %v1107_v1 = vsel %vm1078_vm4, %v5249_v19, %v4295_v46  ;;  %2544 = vrot.lane.b32.xlu1 %v2467_v43, %s4607_s13  ;;  %v2470_v19 = vld [vmem:[%s5458_s12 + $0x80] sm:$0xff]  ;;  %v2471_v16 = vld [vmem:[%s5458_s12 + $0x88] sm:$0xff] }
 0x154   : > { %v4304_v11 = vpop.permute.xlu1 %4303  ;;  %3852 = vmatprep.mubr.msk.bf16.mxu1 %vm1286_vm6, %v1157_v53 }
 0x155   : > { %v4306_v3 = vunpack.i.h.bf16 %v4304_v11  ;;  %v4305_v31 = vunpack.i.l.bf16 %v4304_v11 }
 0x156   : > { %2546 = vrot.lane.b32.xlu0 %v2468_v52, %s4607_s13 }
 0x157   : > { %v1140_v48 = vsel %vm1111_vm5, %v1107_v1, %v4305_v31  ;;  %v1141_v54 = vsel %vm1111_vm5, %v1108_v8, %v4306_v3  ;;  %2548 = vrot.lane.b32.xlu1 %v2469_v6, %s4607_s13 }
 0x158   : > { %v1158_v40 = vpack.c.bf16 %v1141_v54, %v1140_v48  ;;  %3929 = vmatmul.mubr.msk.bf16.gmra.mrb[12].mxu0 %vm1286_vm6, %v5487_v24 }
 0x159   : > { %3932 = vmatprep.mubr.msk.bf16.mxu0 %vm1286_vm6, %v5500_v15 }
 0x15a   : > { %3853 = vmatmul.mubr.msk.bf16.gmra.mrb[28].mxu1 %vm1286_vm6, %v1158_v40  ;;  %2550 = vrot.lane.b32.xlu0 %v2470_v19, %s4607_s13 }
 0x15b   : > { %3886 = vmatprep.mubr.msk.bf16.mxu1 %vm1286_vm6, %v5487_v24  ;;  %2552 = vrot.lane.b32.xlu1 %v2471_v16, %s4607_s13  ;;  %v2474_v24 = vld [vmem:[%s5458_s12 + $0xa0] sm:$0xff] }
 0x15e   : > { %2554 = vrot.lane.b32.xlu0 %v2472_v47, %s4607_s13 }
 0x15f   : > { %2556 = vrot.lane.b32.xlu1 %v2473_v42, %s4607_s13 }
 0x160   : > { %3933 = vmatmul.mubr.msk.bf16.gmra.mrb[16].mxu0 %vm1286_vm6, %v5520_v4 }
 0x161   : > { %3936 = vmatprep.mubr.msk.bf16.mxu0 %vm1286_vm6, %v5533_v35 }
 0x162   : > { %3887 = vmatmul.mubr.msk.bf16.vlgmr.msra.gmra.mrb[16].mxu1 %vm1286_vm6, %v5500_v15  ;;  %2558 = vrot.lane.b32.xlu0 %v2474_v24, %s4607_s13  ;;  %v2476_v15 = vld [vmem:[%s5458_s12 + $0xb0] sm:$0xff] }
 0x163   : > { %3890 = vmatprep.mubr.msk.bf16.mxu1 %vm1286_vm6, %v5520_v4  ;;  %2560 = vrot.lane.b32.xlu1 %v2475_v55, %s4607_s13  ;;  %v2485_v4 = vld [vmem:[%s5458_s12 + $0xf8] sm:$0xff] }
 0x166   : > { %2562 = vrot.lane.b32.xlu0 %v2476_v15, %s4607_s13 }
 0x167   : > { %2564 = vrot.lane.b32.xlu1 %v2477_v44, %s4607_s13 }
 0x168   : > { %3937 = vmatmul.mubr.msk.bf16.gmra.mrb[20].mxu0 %vm1286_vm6, %v1156_v63 }
 0x169   : > { %3940 = vmatprep.mubr.msk.bf16.mxu0 %vm1286_vm6, %v1157_v53 }
 0x16a   : > { %3891 = vmatmul.mubr.msk.bf16.gmra.mrb[20].mxu1 %vm1286_vm6, %v5533_v35  ;;  %2566 = vrot.lane.b32.xlu0 %v2478_v39, %s4607_s13 }
 0x16b   : > { %3894 = vmatprep.mubr.msk.bf16.mxu1 %vm1286_vm6, %v1156_v63  ;;  %2568 = vrot.lane.b32.xlu1 %v2479_v14, %s4607_s13 }
 0x16e   : > { %2570 = vrot.lane.b32.xlu0 %v2480_v22, %s4607_s13 }
 0x16f   : > { %2572 = vrot.lane.b32.xlu1 %v2481_v32, %s4607_s13 }
 0x170   : > { %3941 = vmatmul.mubr.msk.bf16.gmra.mrb[24].mxu0 %vm1286_vm6, %v1158_v40 }
 0x172   : > { %3895 = vmatmul.mubr.msk.bf16.gmra.mrb[24].mxu1 %vm1286_vm6, %v1157_v53  ;;  %2574 = vrot.lane.b32.xlu0 %v2482_v18, %s4607_s13 }
 0x173   : > { %3898 = vmatprep.mubr.msk.bf16.mxu1 %vm1286_vm6, %v1158_v40  ;;  %2576 = vrot.lane.b32.xlu1 %v2483_v51, %s4607_s13 }
 0x176   : > { %2578 = vrot.lane.b32.xlu0 %v2484_v12, %s4607_s13 }
 0x177   : > { %2580 = vrot.lane.b32.xlu1 %v2485_v4, %s4607_s13 }
 0x1a6   : > { %v4314_v38 = vpop.permute.xlu1 %4313 }
 0x1a7   : > { %v4316_v33 = vunpack.i.h.bf16 %v4314_v38  ;;  %v4315_v58 = vunpack.i.l.bf16 %v4314_v38  ;;  %v4309_v29 = vpop.permute.xlu0 %4308 }
 0x1a8   : > { %v4311_v41 = vunpack.i.h.bf16 %v4309_v29  ;;  %v4310_v61 = vunpack.i.l.bf16 %v4309_v29 }
 0x1aa   : > { %v1110_v57 = vsel %vm1078_vm4, %v5434_v10, %v4311_v41  ;;  %v1109_v28 = vsel %vm1078_vm4, %v5429_v37, %v4310_v61 }
 0x1ab   : > { %v1142_v35 = vsel %vm1111_vm5, %v1109_v28, %v4315_v58  ;;  %v1143_v59 = vsel %vm1111_vm5, %v1110_v57, %v4316_v33 }
 0x1ac   : > { %v1159_v0 = vpack.c.bf16 %v1143_v59, %v1142_v35 }
 0x1ae   : > { %3899 = vmatmul.mubr.msk.bf16.gmra.mrb[28].mxu1 %vm1286_vm6, %v1159_v0  ;;  %3944 = vmatprep.mubr.msk.bf16.mxu0 %vm1286_vm6, %v1159_v0 }
 0x1af   : > { %3945 = vmatmul.mubr.bf16.gmra.mrb[28].mxu0 %v4606_v60  ;;  %v5649_v60 = vld [vmem:[%s6383_s4] ss:$0 sm:$0xff] }
 0x1e4   : > { %v3826_v20 = vpop.f32.mrb[0].mxu1 }
 0x1e5   : > { %v1372_v23 = vpop.f32.mrb[1].mxu1  ;;  %v1501_v63 = vadd.f32 %v3826_v20, %v5649_v60 }
 0x1e6   : > { %v3827_v13 = vpop.f32.mrb[2].mxu1  ;;  %v1499_v5 = vadd.f32 %v5649_v60, %v1372_v23 }
 0x1e7   : > { %v1375_v7 = vpop.f32.mrb[3].mxu1  ;;  %v1502_v25 = vadd.f32 %v3827_v13, %v5649_v60 }
 0x1e8   : > { %v1500_v46 = vadd.f32 %v5649_v60, %v1375_v7 }
 0x1ee   : > { %v3830_v17 = vpop.f32.mrb[4].mxu1 }
 0x1ef   : > { %v1388_v10 = vpop.f32.mrb[5].mxu1  ;;  %v1505_v31 = vadd.f32 %v3830_v17, %v5649_v60 }
 0x1f0   : > { %v3831_v2 = vpop.f32.mrb[6].mxu1  ;;  %v1503_v8 = vadd.f32 %v5649_v60, %v1388_v10 }
 0x1f1   : > { %v1391_v45 = vpop.f32.mrb[7].mxu1  ;;  %v1506_v52 = vadd.f32 %v3831_v2, %v5649_v60 }
 0x1f2   : > { %v1504_v6 = vadd.f32 %v5649_v60, %v1391_v45 }
 0x1f8   : > { %v3834_v37 = vpop.f32.mrb[8].mxu1 }
 0x1f9   : > { %v1404_v27 = vpop.f32.mrb[9].mxu1  ;;  %v1509_v55 = vadd.f32 %v3834_v37, %v5649_v60  ;;  %v5717_v37 = vpop.permute.xlu0 %2518 }
 0x1fa   : > { %v3835_v30 = vpop.f32.mrb[10].mxu1  ;;  %v1507_v15 = vadd.f32 %v5649_v60, %v1404_v27 }
 0x1fb   : > { %v1407_v50 = vpop.f32.mrb[11].mxu1  ;;  %v1510_v14 = vadd.f32 %v3835_v30, %v5649_v60  ;;  %v5719_v30 = vpop.permute.xlu1 %2520 }
 0x1fc   : > { %v1508_v51 = vadd.f32 %v5649_v60, %v1407_v50 }
 0x205   : > { %v3838_v21 = vpop.f32.mrb[12].mxu1 }
 0x206   : > { %v1420_v9 = vpop.f32.mrb[13].mxu1  ;;  %v1513_v61 = vadd.f32 %v3838_v21, %v5649_v60 }
 0x207   : > { %v3839_v26 = vpop.f32.mrb[14].mxu1  ;;  %v1511_v57 = vadd.f32 %v5649_v60, %v1420_v9 }
 0x208   : > { %v5644_v36 = vpop.f32.mrb[15].mxu1  ;;  %v1514_v59 = vadd.f32 %v3839_v26, %v5649_v60 }
 0x209   : > { %v1512_v13 = vadd.f32 %v5649_v60, %v5644_v36 }
 0x213   : > { %v3918_v34 = vpop.f32.mrb[0].mxu0 }
 0x214   : > { %v5654_v49 = vadd.f32 %v3918_v34, %v1501_v63  ;;  %v2007_v62 = vpop.f32.mrb[1].mxu0 }
 0x215   : > { %v5657_v56 = vadd.f32 %v2007_v62, %v1499_v5  ;;  %v3919_v53 = vpop.f32.mrb[2].mxu0 }
 0x216   : > { %4338 = vtanh.f32 %v5654_v49  ;;  %v5660_v43 = vadd.f32 %v3919_v53, %v1502_v25  ;;  %v2010_v11 = vpop.f32.mrb[3].mxu0 }
 0x217   : > { %v5662_v3 = vadd.f32 %v2010_v11, %v1500_v46  ;;  %4340 = vtanh.f32 %v5657_v56 }
 0x218   : > { %4342 = vtanh.f32 %v5660_v43 }
 0x21b   : > { %v3922_v1 = vpop.f32.mrb[4].mxu0 }
 0x21c   : > { %v5669_v48 = vadd.f32 %v3922_v1, %v1505_v31  ;;  %v2023_v54 = vpop.f32.mrb[5].mxu0 }
 0x21d   : > { %v5672_v40 = vadd.f32 %v2023_v54, %v1503_v8  ;;  %v3923_v19 = vpop.f32.mrb[6].mxu0  ;;  %v5738_v54 = vpop.permute.xlu0 %2522 }
 0x21e   : > { %4344 = vtanh.f32 %v5669_v48  ;;  %v5675_v16 = vadd.f32 %v3923_v19, %v1506_v52  ;;  %v2026_v47 = vpop.f32.mrb[7].mxu0  ;;  %v5740_v19 = vpop.permute.xlu1 %2524 }
 0x21f   : > { %4346 = vtanh.f32 %v5662_v3  ;;  %v5678_v42 = vadd.f32 %v2026_v47, %v1504_v6 }
 0x220   : > { %v4339_v24 = vpop.eup %4338  ;;  %4348 = vtanh.f32 %v5672_v40 }
 0x221   : > { %2682 = vrot.lane.b32.xlu0 %v4339_v24, %s4607_s13  ;;  %4350 = vtanh.f32 %v5675_v16  ;;  %v4341_v39 = vpop.eup %4340 }
 0x222   : > { %v4343_v18 = vpop.eup %4342  ;;  %4352 = vtanh.f32 %v5678_v42 }
 0x223   : > { %v3926_v44 = vpop.f32.mrb[8].mxu0  ;;  %2684 = vrot.lane.b32.xlu1 %v4343_v18, %s4607_s13 }
 0x224   : > { %v5686_v22 = vadd.f32 %v3926_v44, %v1509_v55  ;;  %v2039_v32 = vpop.f32.mrb[9].mxu0 }
 0x225   : > { %v5689_v12 = vadd.f32 %v2039_v32, %v1507_v15  ;;  %v3927_v4 = vpop.f32.mrb[10].mxu0  ;;  %2678 = vrot.lane.b32.xlu0 %v4341_v39, %s4607_s13 }
 0x226   : > { %v5693_v38 = vadd.f32 %v3927_v4, %v1510_v14  ;;  %v2042_v33 = vpop.f32.mrb[11].mxu0  ;;  %4354 = vtanh.f32 %v5686_v22 }
 0x227   : > { %v5695_v58 = vadd.f32 %v2042_v33, %v1508_v51  ;;  %4356 = vtanh.f32 %v5689_v12 }
 0x228   : > { %v4345_v29 = vpop.eup %4344  ;;  %4358 = vtanh.f32 %v5693_v38 }
 0x229   : > { %v4347_v41 = vpop.eup %4346  ;;  %2690 = vrot.lane.b32.xlu0 %v4345_v29, %s4607_s13  ;;  %4360 = vtanh.f32 %v5695_v58 }
 0x22a   : > { %2680 = vrot.lane.b32.xlu1 %v4347_v41, %s4607_s13  ;;  %v4349_v35 = vpop.eup %4348 }
 0x22b   : > { %v3930_v28 = vpop.f32.mrb[12].mxu0  ;;  %v4351_v23 = vpop.eup %4350 }
 0x22c   : > { %v5704_v0 = vadd.f32 %v3930_v28, %v1513_v61  ;;  %v2055_v20 = vpop.f32.mrb[13].mxu0  ;;  %v4353_v27 = vpop.eup %4352 }
 0x22d   : > { %v5708_v7 = vadd.f32 %v2055_v20, %v1511_v57  ;;  %v3931_v17 = vpop.f32.mrb[14].mxu0  ;;  %2686 = vrot.lane.b32.xlu0 %v4349_v35, %s4607_s13  ;;  %v5756_v28 = vpop.permute.xlu0 %2526 }
 0x22e   : > { %2692 = vrot.lane.b32.xlu1 %v4351_v23, %s4607_s13  ;;  %v5712_v10 = vadd.f32 %v3931_v17, %v1514_v59  ;;  %v2058_v2 = vpop.f32.mrb[15].mxu0  ;;  %4362 = vtanh.f32 %v5704_v0  ;;  %v5761_v23 = vpop.permute.xlu1 %2528 }
 0x22f   : > { %v5714_v45 = vadd.f32 %v2058_v2, %v1512_v13  ;;  %4364 = vtanh.f32 %v5708_v7 }
 0x230   : > { %v4355_v34 = vpop.eup %4354  ;;  %4366 = vtanh.f32 %v5712_v10 }
 0x231   : > { %2698 = vrot.lane.b32.xlu0 %v4355_v34, %s4607_s13  ;;  %v4357_v6 = vpop.eup %4356  ;;  %4368 = vtanh.f32 %v5714_v45 }
 0x232   : > { %2688 = vrot.lane.b32.xlu1 %v4353_v27, %s4607_s13  ;;  %v4359_v32 = vpop.eup %4358 }
 0x233   : > { %v3934_v26 = vpop.f32.mrb[16].mxu0  ;;  %v4361_v59 = vpop.eup %4360 }
 0x234   : > { %v2071_v5 = vpop.f32.mrb[17].mxu0 }
 0x235   : > { %v3888_v50 = vpop.f32.mrb[16].mxu1  ;;  %v3935_v53 = vpop.f32.mrb[18].mxu0  ;;  %2694 = vrot.lane.b32.xlu0 %v4357_v6, %s4607_s13 }
 0x236   : > { %v3994_v21 = vadd.f32 %v3888_v50, %v5649_v60  ;;  %v1755_v9 = vpop.f32.mrb[17].mxu1  ;;  %v2074_v8 = vpop.f32.mrb[19].mxu0  ;;  %2700 = vrot.lane.b32.xlu1 %v4359_v32, %s4607_s13 }
 0x237   : > { %v3996_v36 = vadd.f32 %v5649_v60, %v1755_v9  ;;  %v3889_v63 = vpop.f32.mrb[18].mxu1 }
 0x238   : > { %v3998_v25 = vadd.f32 %v3889_v63, %v5649_v60  ;;  %v1758_v62 = vpop.f32.mrb[19].mxu1  ;;  %v5726_v46 = vadd.f32 %v3994_v21, %v3934_v26  ;;  %v4363_v20 = vpop.eup %4362 }
 0x239   : > { %v4000_v11 = vadd.f32 %v5649_v60, %v1758_v62  ;;  %v5730_v31 = vadd.f32 %v3996_v36, %v2071_v5  ;;  %2706 = vrot.lane.b32.xlu0 %v4363_v20, %s4607_s13  ;;  %v4365_v34 = vpop.eup %4364 }
 0x23a   : > { %v5733_v1 = vadd.f32 %v3998_v25, %v3935_v53  ;;  %2696 = vrot.lane.b32.xlu1 %v4361_v59, %s4607_s13  ;;  %4370 = vtanh.f32 %v5726_v46  ;;  %v5771_v25 = vpop.permute.xlu0 %2530 }
 0x23b   : > { %v5736_v52 = vadd.f32 %v4000_v11, %v2074_v8  ;;  %v3938_v15 = vpop.f32.mrb[20].mxu0  ;;  %v4367_v8 = vpop.eup %4366  ;;  %4372 = vtanh.f32 %v5730_v31 }
 0x23c   : > { %v2087_v14 = vpop.f32.mrb[21].mxu0  ;;  %4374 = vtanh.f32 %v5733_v1 }
 0x23d   : > { %v3892_v47 = vpop.f32.mrb[20].mxu1  ;;  %v3939_v33 = vpop.f32.mrb[22].mxu0  ;;  %2702 = vrot.lane.b32.xlu0 %v4365_v34, %s4607_s13  ;;  %4376 = vtanh.f32 %v5736_v52 }
 0x23e   : > { %v4002_v24 = vadd.f32 %v3892_v47, %v5649_v60  ;;  %v1771_v55 = vpop.f32.mrb[21].mxu1  ;;  %v2090_v61 = vpop.f32.mrb[23].mxu0  ;;  %2708 = vrot.lane.b32.xlu1 %v4367_v8, %s4607_s13 }
 0x23f   : > { %v4004_v44 = vadd.f32 %v5649_v60, %v1771_v55  ;;  %v3893_v39 = vpop.f32.mrb[22].mxu1  ;;  %v5784_v55 = vpop.permute.xlu1 %2532 }
 0x240   : > { %v4006_v18 = vadd.f32 %v3893_v39, %v5649_v60  ;;  %v1774_v51 = vpop.f32.mrb[23].mxu1  ;;  %v5748_v4 = vadd.f32 %v4002_v24, %v3938_v15  ;;  %v4369_v24 = vpop.eup %4368 }
 0x241   : > { %v4008_v29 = vadd.f32 %v5649_v60, %v1774_v51  ;;  %v5752_v41 = vadd.f32 %v4004_v44, %v2087_v14  ;;  %v5786_v15 = vpop.permute.xlu0 %2534 }
 0x242   : > { %v5754_v57 = vadd.f32 %v4006_v18, %v3939_v33  ;;  %2704 = vrot.lane.b32.xlu1 %v4369_v24, %s4607_s13  ;;  %4378 = vtanh.f32 %v5748_v4 }
 0x243   : > { %v5758_v35 = vadd.f32 %v4008_v29, %v2090_v61  ;;  %v3942_v27 = vpop.f32.mrb[24].mxu0  ;;  %v5792_v39 = vpop.permute.xlu1 %2536  ;;  %4380 = vtanh.f32 %v5752_v41 }
 0x244   : > { %v2103_v9 = vpop.f32.mrb[25].mxu0  ;;  %v4371_v44 = vpop.eup %4370  ;;  %4382 = vtanh.f32 %v5754_v57 }
 0x245   : > { %v3896_v13 = vpop.f32.mrb[24].mxu1  ;;  %v3943_v5 = vpop.f32.mrb[26].mxu0  ;;  %2714 = vrot.lane.b32.xlu0 %v4371_v44, %s4607_s13  ;;  %4384 = vtanh.f32 %v5758_v35  ;;  %v3704_v44 = vmul.f32 -1.442695, %v5654_v49 }
 0x246   : > { %v4010_v17 = vadd.f32 %v3896_v13, %v5649_v60  ;;  %v1787_v2 = vpop.f32.mrb[25].mxu1  ;;  %v2106_v11 = vpop.f32.mrb[27].mxu0 }
 0x247   : > { %v4012_v50 = vadd.f32 %v5649_v60, %v1787_v2  ;;  %v3897_v21 = vpop.f32.mrb[26].mxu1  ;;  %v4373_v14 = vpop.eup %4372 }
 0x248   : > { %v4014_v26 = vadd.f32 %v3897_v21, %v5649_v60  ;;  %v1790_v36 = vpop.f32.mrb[27].mxu1  ;;  %v5769_v63 = vadd.f32 %v4010_v17, %v3942_v27  ;;  %v5794_v32 = vpop.permute.xlu0 %2538 }
 0x249   : > { %v4016_v62 = vadd.f32 %v5649_v60, %v1790_v36  ;;  %v5774_v53 = vadd.f32 %v4012_v50, %v2103_v9  ;;  %2710 = vrot.lane.b32.xlu0 %v4373_v14, %s4607_s13  ;;  %v4375_v18 = vpop.eup %4374  ;;  %v5800_v51 = vpop.permute.xlu1 %2540  ;;  %v3702_v14 = vmul.f32 -1.442695, %v5657_v56 }
 0x24a   : > { %v5777_v6 = vadd.f32 %v4014_v26, %v3943_v5  ;;  %2716 = vrot.lane.b32.xlu1 %v4375_v18, %s4607_s13  ;;  %v4377_v33 = vpop.eup %4376  ;;  %4386 = vtanh.f32 %v5769_v63 }
 0x24b   : > { %v5781_v47 = vadd.f32 %v4016_v62, %v2106_v11  ;;  %4388 = vtanh.f32 %v5774_v53 }
 0x24c   : > { %v5802_v29 = vpop.permute.xlu0 %2542  ;;  %v4379_v61 = vpop.eup %4378  ;;  %4390 = vtanh.f32 %v5777_v6 }
 0x24d   : > { %2722 = vrot.lane.b32.xlu0 %v4379_v61, %s4607_s13  ;;  %v5808_v59 = vpop.permute.xlu1 %2544  ;;  %v4381_v20 = vpop.eup %4380  ;;  %4392 = vtanh.f32 %v5781_v47  ;;  %v3705_v61 = vmul.f32 -1.442695, %v5660_v43  ;;  %v3709_v43 = vmul.f32 -1.442695, %v5675_v16 }
 0x24e   : > { %2712 = vrot.lane.b32.xlu1 %v4377_v33, %s4607_s13  ;;  %v4383_v17 = vpop.eup %4382  ;;  %4394 = vpow2.f32 %v3704_v44 }
 0x24f   : > { %v4385_v27 = vpop.eup %4384  ;;  %4396 = vpow2.f32 %v3702_v14 }
 0x250   : > { %v5810_v13 = vpop.permute.xlu0 %2546  ;;  %4398 = vpow2.f32 %v3705_v61 }
 0x251   : > { %2718 = vrot.lane.b32.xlu0 %v4381_v20, %s4607_s13  ;;  %v5816_v2 = vpop.permute.xlu1 %2548  ;;  %v3708_v20 = vmul.f32 -1.442695, %v5669_v48 }
 0x252   : > { %2724 = vrot.lane.b32.xlu1 %v4383_v17, %s4607_s13  ;;  %v3703_v17 = vmul.f32 -1.442695, %v5662_v3  ;;  %v3707_v3 = vmul.f32 -1.442695, %v5678_v42 }
 0x253   : > { %4400 = vpow2.f32 %v3708_v20 }
 0x254   : > { %v5818_v50 = vpop.permute.xlu0 %2550  ;;  %v4387_v21 = vpop.eup %4386  ;;  %4402 = vpow2.f32 %v3703_v17 }
 0x255   : > { %2730 = vrot.lane.b32.xlu0 %v4387_v21, %s4607_s13  ;;  %v5823_v9 = vpop.permute.xlu1 %2552  ;;  %v4389_v26 = vpop.eup %4388  ;;  %v3706_v21 = vmul.f32 -1.442695, %v5672_v40 }
 0x256   : > { %2720 = vrot.lane.b32.xlu1 %v4385_v27, %s4607_s13  ;;  %v4391_v5 = vpop.eup %4390 }
 0x257   : > { %v4393_v62 = vpop.eup %4392  ;;  %4404 = vpow2.f32 %v3706_v21 }
 0x258   : > { %v5825_v36 = vpop.permute.xlu0 %2554 }
 0x259   : > { %2726 = vrot.lane.b32.xlu0 %v4389_v26, %s4607_s13  ;;  %v5829_v34 = vpop.permute.xlu1 %2556 }
 0x25a   : > { %2732 = vrot.lane.b32.xlu1 %v4391_v5, %s4607_s13 }
 0x25c   : > { %v5831_v11 = vpop.permute.xlu0 %2558 }
 0x25d   : > { %v5834_v8 = vpop.permute.xlu1 %2560 }
 0x25e   : > { %2728 = vrot.lane.b32.xlu1 %v4393_v62, %s4607_s13 }
 0x260   : > { %v5836_v24 = vpop.permute.xlu0 %2562 }
 0x261   : > { %v5840_v18 = vpop.permute.xlu1 %2564 }
 0x264   : > { %v5842_v33 = vpop.permute.xlu0 %2566 }
 0x265   : > { %6402 = vst [vmem:[#allocation3_spill] sm:$0xff] %v5842_v33  ;;  %v5847_v27 = vpop.permute.xlu1 %2568 }
 0x266   : > { %6403 = vst [vmem:[#allocation4_spill] sm:$0xff] %v5847_v27 }
 0x268   : > { %v5850_v49 = vpop.permute.xlu0 %2570 }
 0x269   : > { %6404 = vst [vmem:[#allocation5_spill] sm:$0xff] %v5850_v49  ;;  %v4395_v49 = vpop.eup %4394 }
 0x26a   : > { %v2328_v21 = vadd.f32 1.0, %v4395_v49 }
 0x26c   : > { %v5866_v42 = vpop.permute.xlu0 %2574 }
 0x26d   : > { %6405 = vst [vmem:[#allocation6_spill] sm:$0xff] %v5866_v42 }
 0x281   : > { %v3900_v56 = vpop.f32.mrb[28].mxu1 }
 0x282   : > { %v4018_v26 = vadd.f32 %v3900_v56, %v5649_v60  ;;  %v1803_v5 = vpop.f32.mrb[29].mxu1  ;;  %v3946_v62 = vpop.f32.mrb[28].mxu0  ;;  %v3712_v56 = vmul.f32 -1.442695, %v5686_v22 }
 0x283   : > { %v4020_v44 = vadd.f32 %v5649_v60, %v1803_v5  ;;  %v3901_v48 = vpop.f32.mrb[30].mxu1  ;;  %v2119_v14 = vpop.f32.mrb[29].mxu0 }
 0x284   : > { %v5856_v61 = vadd.f32 %v4018_v26, %v3946_v62  ;;  %v4022_v40 = vadd.f32 %v3901_v48, %v5649_v60  ;;  %v1806_v27 = vpop.f32.mrb[31].mxu1  ;;  %v3947_v33 = vpop.f32.mrb[30].mxu0 }
 0x285   : > { %v5860_v20 = vadd.f32 %v4020_v44, %v2119_v14  ;;  %v4024_v16 = vadd.f32 %v5649_v60, %v1806_v27  ;;  %v2122_v5 = vpop.f32.mrb[31].mxu0  ;;  %v4397_v26 = vpop.eup %4396 }
 0x286   : > { %4406 = vtanh.f32 %v5856_v61  ;;  %v5864_v17 = vadd.f32 %v4022_v40, %v3947_v33  ;;  %v5868_v62 = vpop.permute.xlu1 %2572  ;;  %v4399_v22 = vpop.eup %4398  ;;  %v2326_v44 = vadd.f32 1.0, %v4397_v26  ;;  %v3710_v33 = vmul.f32 -1.442695, %v5689_v12 }
 0x287   : > { %4408 = vpow2.f32 %v3709_v43  ;;  %6406 = vst [vmem:[#allocation7_spill] sm:$0xff] %v5868_v62  ;;  %v5870_v48 = vadd.f32 %v4024_v16, %v2122_v5  ;;  %v5877_v27 = vpop.permute.xlu0 %2578  ;;  %v4401_v43 = vpop.eup %4400  ;;  %v2329_v14 = vadd.f32 1.0, %v4399_v22 }
 0x288   : > { %4410 = vpow2.f32 %v3707_v3  ;;  %6408 = vst [vmem:[#allocation9_spill] sm:$0xff] %v5877_v27  ;;  %v4403_v40 = vpop.eup %4402  ;;  %v3713_v3 = vmul.f32 -1.442695, %v5693_v38  ;;  %v2332_v16 = vadd.f32 1.0, %v4401_v43 }
 0x289   : > { %4412 = vpow2.f32 %v3712_v56  ;;  %v4405_v49 = vpop.eup %4404  ;;  %v2327_v26 = vadd.f32 1.0, %v4403_v40 }
 0x28a   : > { %4414 = vtanh.f32 %v5860_v20  ;;  %v5874_v60 = vpop.permute.xlu1 %2576 }
 0x28b   : > { %4416 = vtanh.f32 %v5864_v17  ;;  %6407 = vst [vmem:[#allocation8_spill] sm:$0xff] %v5874_v60  ;;  %v2330_v60 = vadd.f32 1.0, %v4405_v49 }
 0x28c   : > { %4418 = vrcp.f32 %v2328_v21 }
 0x28d   : > { %4420 = vrcp.f32 %v2326_v44  ;;  %v3711_v44 = vmul.f32 -1.442695, %v5695_v58 }
 0x28e   : > { %4422 = vtanh.f32 %v5870_v48  ;;  %v5881_v21 = vpop.permute.xlu1 %2580 }
 0x28f   : > { %4424 = vpow2.f32 %v3710_v33  ;;  %6409 = vst [vmem:[#allocation10_spill] sm:$0xff] %v5881_v21  ;;  %v3716_v33 = vmul.f32 -1.442695, %v5704_v0 }
 0x290   : > { %v4407_v56 = vpop.eup %4406  ;;  %4426 = vrcp.f32 %v2329_v14 }
 0x291   : > { %v4409_v5 = vpop.eup %4408  ;;  %2738 = vrot.lane.b32.xlu0 %v4407_v56, %s4607_s13  ;;  %4428 = vpow2.f32 %v3713_v3 }
 0x292   : > { %v4411_v12 = vpop.eup %4410  ;;  %4430 = vrcp.f32 %v2332_v16  ;;  %v2333_v27 = vadd.f32 1.0, %v4409_v5  ;;  %v3714_v16 = vmul.f32 -1.442695, %v5708_v7  ;;  %v3717_v5 = vmul.f32 -1.442695, %v5712_v10 }
 0x293   : > { %v2683_v22 = vpop.permute.xlu0 %2682  ;;  %v4413_v42 = vpop.eup %4412  ;;  %4432 = vrcp.f32 %v2327_v26  ;;  %v2331_v14 = vadd.f32 1.0, %v4411_v12 }
 0x294   : > { %v4415_v38 = vpop.eup %4414  ;;  %4434 = vrcp.f32 %v2330_v60  ;;  %v2336_v49 = vadd.f32 1.0, %v4413_v42 }
 0x295   : > { %v4417_v62 = vpop.eup %4416  ;;  %2734 = vrot.lane.b32.xlu0 %v4415_v38, %s4607_s13  ;;  %4436 = vpow2.f32 %v3711_v44  ;;  %v2685_v3 = vpop.permute.xlu1 %2684  ;;  %v3715_v44 = vmul.f32 -1.442695, %v5714_v45 }
 0x296   : > { %v5887_v43 = vpop.eup %4418  ;;  %2740 = vrot.lane.b32.xlu1 %v4417_v62, %s4607_s13  ;;  %4438 = vrcp.f32 %v2333_v27 }
 0x297   : > { %v2679_v40 = vpop.permute.xlu0 %2678  ;;  %v2776_v58 = vmul.f32 %v5887_v43, %v2683_v22  ;;  %v5891_v56 = vpop.eup %4420  ;;  %4440 = vpow2.f32 %v3716_v33 }
 0x298   : > { %v4423_v0 = vpop.eup %4422  ;;  %4442 = vrcp.f32 %v2331_v14  ;;  %v2774_v26 = vmul.f32 %v5891_v56, %v2679_v40 }
 0x299   : > { %2842 = vrot.lane.b32.xlu0 %v2776_v58, %s4607_s13  ;;  %v4425_v60 = vpop.eup %4424  ;;  %4444 = vrcp.f32 %v2336_v49 }
 0x29a   : > { %2736 = vrot.lane.b32.xlu1 %v4423_v0, %s4607_s13  ;;  %v5897_v62 = vpop.eup %4426  ;;  %4446 = vpow2.f32 %v3714_v16  ;;  %v2334_v22 = vadd.f32 1.0, %v4425_v60  ;;  %v3720_v0 = vmul.f32 -1.442695, %v5726_v46  ;;  %v3718_v46 = vmul.f32 -1.442695, %v5730_v31 }
 0x29b   : > { %v2691_v42 = vpop.permute.xlu0 %2690  ;;  %v2777_v7 = vmul.f32 %v5897_v62, %v2685_v3  ;;  %v4429_v27 = vpop.eup %4428  ;;  %4448 = vpow2.f32 %v3717_v5 }
 0x29c   : > { %v2681_v12 = vpop.permute.xlu1 %2680  ;;  %v5902_v10 = vpop.eup %4430  ;;  %v2337_v49 = vadd.f32 1.0, %v4429_v27  ;;  %4450 = vrcp.f32 %v2334_v22 }
 0x29d   : > { %2838 = vrot.lane.b32.xlu0 %v2774_v26, %s4607_s13  ;;  %v5906_v38 = vpop.eup %4432  ;;  %v2780_v33 = vmul.f32 %v5902_v10, %v2691_v42  ;;  %4452 = vpow2.f32 %v3715_v44 }
 0x29e   : > { %2844 = vrot.lane.b32.xlu1 %v2777_v7, %s4607_s13  ;;  %v5909_v40 = vpop.eup %4434  ;;  %v2775_v58 = vmul.f32 %v5906_v38, %v2681_v12  ;;  %4454 = vrcp.f32 %v2337_v49 }
 0x29f   : > { %v2687_v3 = vpop.permute.xlu0 %2686  ;;  %v4437_v16 = vpop.eup %4436  ;;  %4456 = vpow2.f32 %v3720_v0 }
 0x2a0   : > { %v2693_v14 = vpop.permute.xlu1 %2692  ;;  %v5914_v45 = vpop.eup %4438  ;;  %v2778_v60 = vmul.f32 %v5909_v40, %v2687_v3  ;;  %v2335_v26 = vadd.f32 1.0, %v4437_v16 }
 0x2a1   : > { %2850 = vrot.lane.b32.xlu0 %v2780_v33, %s4607_s13  ;;  %v4441_v5 = vpop.eup %4440  ;;  %v2781_v12 = vmul.f32 %v5914_v45, %v2693_v14 }
 0x2a2   : > { %2840 = vrot.lane.b32.xlu1 %v2775_v58, %s4607_s13  ;;  %v5918_v42 = vpop.eup %4442  ;;  %v2340_v44 = vadd.f32 1.0, %v4441_v5  ;;  %v3721_v58 = vmul.f32 -1.442695, %v5733_v1  ;;  %4458 = vrcp.f32 %v2335_v26  ;;  %v3719_v5 = vmul.f32 -1.442695, %v5736_v52 }
 0x2a3   : > { %v5921_v7 = vpop.eup %4444  ;;  %v2699_v3 = vpop.permute.xlu0 %2698  ;;  %4460 = vpow2.f32 %v3718_v46  ;;  %v3724_v26 = vmul.f32 -1.442695, %v5748_v4  ;;  %v3722_v52 = vmul.f32 -1.442695, %v5752_v41 }
 0x2a4   : > { %v2689_v27 = vpop.permute.xlu1 %2688  ;;  %v4447_v22 = vpop.eup %4446  ;;  %v2784_v14 = vmul.f32 %v5921_v7, %v2699_v3  ;;  %4462 = vrcp.f32 %v2340_v44 }
 0x2a5   : > { %2846 = vrot.lane.b32.xlu0 %v2778_v60, %s4607_s13  ;;  %v4449_v33 = vpop.eup %4448  ;;  %v2779_v49 = vmul.f32 %v5918_v42, %v2689_v27  ;;  %v2338_v16 = vadd.f32 1.0, %v4447_v22  ;;  %4464 = vpow2.f32 %v3721_v58 }
 0x2a6   : > { %2852 = vrot.lane.b32.xlu1 %v2781_v12, %s4607_s13  ;;  %v2341_v31 = vadd.f32 1.0, %v4449_v33  ;;  %v5931_v0 = vpop.eup %4450 }
 0x2a7   : > { %v4453_v1 = vpop.eup %4452  ;;  %v2695_v60 = vpop.permute.xlu0 %2694  ;;  %4466 = vrcp.f32 %v2338_v16 }
 0x2a8   : > { %v2782_v12 = vmul.f32 %v5931_v0, %v2695_v60  ;;  %v5936_v27 = vpop.eup %4454  ;;  %4468 = vrcp.f32 %v2341_v31  ;;  %v2339_v22 = vadd.f32 1.0, %v4453_v1  ;;  %v2701_v44 = vpop.permute.xlu1 %2700 }
 0x2a9   : > { %2858 = vrot.lane.b32.xlu0 %v2784_v14, %s4607_s13  ;;  %v4457_v46 = vpop.eup %4456  ;;  %4470 = vpow2.f32 %v3719_v5  ;;  %v2785_v33 = vmul.f32 %v5936_v27, %v2701_v44 }
 0x2aa   : > { %2848 = vrot.lane.b32.xlu1 %v2779_v49, %s4607_s13  ;;  %4472 = vpow2.f32 %v3724_v26  ;;  %v2344_v3 = vadd.f32 1.0, %v4457_v46  ;;  %v3725_v49 = vmul.f32 -1.442695, %v5754_v57 }
 0x2ab   : > { %4474 = vrcp.f32 %v2339_v22  ;;  %v2707_v5 = vpop.permute.xlu0 %2706 }
 0x2ac   : > { %v5941_v58 = vpop.eup %4458  ;;  %v2697_v14 = vpop.permute.xlu1 %2696  ;;  %4476 = vpow2.f32 %v3722_v52 }
 0x2ad   : > { %2854 = vrot.lane.b32.xlu0 %v2782_v12, %s4607_s13  ;;  %v4461_v4 = vpop.eup %4460  ;;  %v2783_v31 = vmul.f32 %v5941_v58, %v2697_v14  ;;  %4478 = vrcp.f32 %v2344_v3  ;;  %v3723_v12 = vmul.f32 -1.442695, %v5758_v35 }
 0x2ae   : > { %2860 = vrot.lane.b32.xlu1 %v2785_v33, %s4607_s13  ;;  %v5945_v16 = vpop.eup %4462  ;;  %v2342_v41 = vadd.f32 1.0, %v4461_v4  ;;  %4480 = vpow2.f32 %v3725_v49  ;;  %v3728_v33 = vmul.f32 -1.442695, %v5769_v63 }
 0x2af   : > { %v4465_v1 = vpop.eup %4464  ;;  %v2788_v60 = vmul.f32 %v5945_v16, %v2707_v5  ;;  %v2703_v22 = vpop.permute.xlu0 %2702 }
 0x2b0   : > { %v2345_v46 = vadd.f32 1.0, %v4465_v1  ;;  %v2709_v52 = vpop.permute.xlu1 %2708  ;;  %4482 = vrcp.f32 %v2342_v41  ;;  %v3729_v41 = vmul.f32 -1.442695, %v5777_v6 }
 0x2b1   : > { %v5950_v26 = vpop.eup %4466  ;;  %2866 = vrot.lane.b32.xlu0 %v2788_v60, %s4607_s13  ;;  %4484 = vpow2.f32 %v3723_v12 }
 0x2b2   : > { %2856 = vrot.lane.b32.xlu1 %v2783_v31, %s4607_s13  ;;  %v5954_v57 = vpop.eup %4468  ;;  %v2786_v3 = vmul.f32 %v5950_v26, %v2703_v22  ;;  %4486 = vrcp.f32 %v2345_v46  ;;  %v3726_v31 = vmul.f32 -1.442695, %v5774_v53  ;;  %v3727_v53 = vmul.f32 -1.442695, %v5781_v47 }
 0x2b3   : > { %v4471_v44 = vpop.eup %4470  ;;  %v2789_v4 = vmul.f32 %v5954_v57, %v2709_v52  ;;  %4488 = vpow2.f32 %v3728_v33 }
 0x2b4   : > { %v4473_v14 = vpop.eup %4472  ;;  %v2343_v35 = vadd.f32 1.0, %v4471_v44  ;;  %v2705_v63 = vpop.permute.xlu1 %2704 }
 0x2b5   : > { %2862 = vrot.lane.b32.xlu0 %v2786_v3, %s4607_s13  ;;  %v5961_v49 = vpop.eup %4474  ;;  %v2348_v5 = vadd.f32 1.0, %v4473_v14 }
 0x2b6   : > { %2868 = vrot.lane.b32.xlu1 %v2789_v4, %s4607_s13  ;;  %v2787_v1 = vmul.f32 %v5961_v49, %v2705_v63  ;;  %v4477_v60 = vpop.eup %4476  ;;  %4490 = vrcp.f32 %v2343_v35 }
 0x2b7   : > { %v5966_v22 = vpop.eup %4478  ;;  %v2715_v12 = vpop.permute.xlu0 %2714  ;;  %4492 = vpow2.f32 %v3726_v31  ;;  %v2346_v33 = vadd.f32 1.0, %v4477_v60 }
 0x2b8   : > { %v4481_v46 = vpop.eup %4480  ;;  %v2792_v44 = vmul.f32 %v5966_v22, %v2715_v12  ;;  %4494 = vrcp.f32 %v2348_v5 }
 0x2b9   : > { %4496 = vpow2.f32 %v3729_v41  ;;  %v2349_v6 = vadd.f32 1.0, %v4481_v46 }
 0x2ba   : > { %2864 = vrot.lane.b32.xlu1 %v2787_v1, %s4607_s13  ;;  %2874 = vrot.lane.b32.xlu0 %v2792_v44, %s4607_s13  ;;  %v5972_v52 = vpop.eup %4482  ;;  %4498 = vrcp.f32 %v2346_v33 }
 0x2bb   : > { %v2711_v3 = vpop.permute.xlu0 %2710  ;;  %v4485_v4 = vpop.eup %4484  ;;  %4500 = vpow2.f32 %v3727_v53 }
 0x2bc   : > { %v2790_v14 = vmul.f32 %v5972_v52, %v2711_v3  ;;  %v5975_v35 = vpop.eup %4486  ;;  %v2717_v31 = vpop.permute.xlu1 %2716  ;;  %4502 = vrcp.f32 %v2349_v6  ;;  %v2347_v47 = vadd.f32 1.0, %v4485_v4 }
 0x2bd   : > { %v4489_v63 = vpop.eup %4488  ;;  %v2793_v5 = vmul.f32 %v5975_v35, %v2717_v31 }
 0x2be   : > { %2870 = vrot.lane.b32.xlu0 %v2790_v14, %s4607_s13  ;;  %v2352_v60 = vadd.f32 1.0, %v4489_v63  ;;  %4504 = vrcp.f32 %v2347_v47 }
 0x2bf   : > { %2876 = vrot.lane.b32.xlu1 %v2793_v5, %s4607_s13  ;;  %v2723_v33 = vpop.permute.xlu0 %2722 }
 0x2c0   : > { %v5980_v1 = vpop.eup %4490  ;;  %v2713_v41 = vpop.permute.xlu1 %2712  ;;  %4506 = vrcp.f32 %v2352_v60 }
 0x2c1   : > { %v4493_v12 = vpop.eup %4492  ;;  %v2791_v46 = vmul.f32 %v5980_v1, %v2713_v41 }
 0x2c2   : > { %v5983_v44 = vpop.eup %4494  ;;  %v2350_v6 = vadd.f32 1.0, %v4493_v12 }
 0x2c3   : > { %v4497_v53 = vpop.eup %4496  ;;  %v2796_v3 = vmul.f32 %v5983_v44, %v2723_v33  ;;  %2872 = vrot.lane.b32.xlu1 %v2791_v46, %s4607_s13  ;;  %v2719_v31 = vpop.permute.xlu0 %2718 }
 0x2c4   : > { %v5988_v4 = vpop.eup %4498  ;;  %v2353_v14 = vadd.f32 1.0, %v4497_v53  ;;  %4508 = vrcp.f32 %v2350_v6  ;;  %v2725_v47 = vpop.permute.xlu1 %2724 }
 0x2c5   : > { %2882 = vrot.lane.b32.xlu0 %v2796_v3, %s4607_s13  ;;  %v4501_v63 = vpop.eup %4500  ;;  %v2794_v5 = vmul.f32 %v5988_v4, %v2719_v31 }
 0x2c6   : > { %v5991_v41 = vpop.eup %4502  ;;  %4510 = vrcp.f32 %v2353_v14  ;;  %v2351_v60 = vadd.f32 1.0, %v4501_v63 }
 0x2c7   : > { %v2797_v21 = vmul.f32 %v5991_v41, %v2725_v47  ;;  %v2731_v3 = vpop.permute.xlu0 %2730 }
 0x2c8   : > { %v5996_v12 = vpop.eup %4504  ;;  %v2721_v46 = vpop.permute.xlu1 %2720  ;;  %4512 = vrcp.f32 %v2351_v60 }
 0x2c9   : > { %2878 = vrot.lane.b32.xlu0 %v2794_v5, %s4607_s13  ;;  %2884 = vrot.lane.b32.xlu1 %v2797_v21, %s4607_s13  ;;  %v2795_v33 = vmul.f32 %v5996_v12, %v2721_v46 }
 0x2ca   : > { %v5999_v53 = vpop.eup %4506 }
 0x2cb   : > { %v2800_v6 = vmul.f32 %v5999_v53, %v2731_v3  ;;  %v2727_v14 = vpop.permute.xlu0 %2726  ;;  %v3732_v3 = vmul.f32 -1.442695, %v5856_v61 }
 0x2cc   : > { %v2733_v5 = vpop.permute.xlu1 %2732 }
 0x2cd   : > { %2880 = vrot.lane.b32.xlu1 %v2795_v33, %s4607_s13  ;;  %2890 = vrot.lane.b32.xlu0 %v2800_v6, %s4607_s13  ;;  %4514 = vpow2.f32 %v3732_v3  ;;  %v3730_v6 = vmul.f32 -1.442695, %v5860_v20 }
 0x2ce   : > { %v6004_v31 = vpop.eup %4508 }
 0x2cf   : > { %6410 = vst [vmem:[#allocation11_spill] sm:$0xff] %v6004_v31  ;;  %v2798_v21 = vmul.f32 %v6004_v31, %v2727_v14  ;;  %v3733_v14 = vmul.f32 -1.442695, %v5864_v17  ;;  %4516 = vpow2.f32 %v3730_v6 }
 0x2d0   : > { %v6007_v63 = vpop.eup %4510  ;;  %v2729_v46 = vpop.permute.xlu1 %2728 }
 0x2d1   : > { %6411 = vst [vmem:[#allocation12_spill] sm:$0xff] %v6007_v63  ;;  %v2801_v47 = vmul.f32 %v6007_v63, %v2733_v5  ;;  %2886 = vrot.lane.b32.xlu0 %v2798_v21, %s4607_s13  ;;  %4518 = vpow2.f32 %v3733_v14  ;;  %v3731_v21 = vmul.f32 -1.442695, %v5870_v48 }
 0x2d2   : > { %v6012_v60 = vpop.eup %4512 }
 0x2d3   : > { %2892 = vrot.lane.b32.xlu1 %v2801_v47, %s4607_s13  ;;  %6412 = vst [vmem:[#allocation13_spill] sm:$0xff] %v6012_v60  ;;  %v2799_v33 = vmul.f32 %v6012_v60, %v2729_v46  ;;  %4520 = vpow2.f32 %v3731_v21 }
 0x2d7   : > { %2888 = vrot.lane.b32.xlu1 %v2799_v33, %s4607_s13  ;;  %v4515_v5 = vpop.eup %4514 }
 0x2d8   : > { %v2356_v47 = vadd.f32 1.0, %v4515_v5 }
 0x2d9   : > { %v4517_v63 = vpop.eup %4516 }
 0x2da   : > { %4522 = vrcp.f32 %v2356_v47  ;;  %v2354_v46 = vadd.f32 1.0, %v4517_v63 }
 0x2db   : > { %v4519_v31 = vpop.eup %4518 }
 0x2dc   : > { %v2357_v60 = vadd.f32 1.0, %v4519_v31  ;;  %4524 = vrcp.f32 %v2354_v46 }
 0x2dd   : > { %v4521_v61 = vpop.eup %4520 }
 0x2de   : > { %4526 = vrcp.f32 %v2357_v60  ;;  %v2355_v33 = vadd.f32 1.0, %v4521_v61  ;;  %v2616_v60 = vmul.f32 %v5887_v43, %v5738_v54  ;;  %v2617_v54 = vmul.f32 %v5897_v62, %v5740_v19 }
 0x2e0   : > { %4528 = vrcp.f32 %v2355_v33 }
 0x2e4   : > { %v6020_v20 = vpop.eup %4522 }
 0x2e6   : > { %v6024_v48 = vpop.eup %4524 }
 0x2e8   : > { %v6026_v14 = vpop.eup %4526 }
 0x2ea   : > { %v6034_v47 = vpop.eup %4528 }
 0x303   : > { %v2739_v17 = vpop.permute.xlu0 %2738 }
 0x304   : > { %v2804_v3 = vmul.f32 %v6020_v20, %v2739_v17  ;;  %v2614_v17 = vmul.f32 %v5891_v56, %v5717_v37  ;;  %v2615_v37 = vmul.f32 %v5906_v38, %v5719_v30 }
 0x306   : > { %2898 = vrot.lane.b32.xlu0 %v2804_v3, %s4607_s13 }
 0x307   : > { %v2735_v6 = vpop.permute.xlu0 %2734 }
 0x308   : > { %v2741_v21 = vpop.permute.xlu1 %2740  ;;  %v2802_v31 = vmul.f32 %v6024_v48, %v2735_v6 }
 0x309   : > { %v2805_v63 = vmul.f32 %v6026_v14, %v2741_v21 }
 0x30a   : > { %2894 = vrot.lane.b32.xlu0 %v2802_v31, %s4607_s13 }
 0x30b   : > { %2900 = vrot.lane.b32.xlu1 %v2805_v63, %s4607_s13  ;;  %v2843_v5 = vpop.permute.xlu0 %2842  ;;  %v2620_v63 = vmul.f32 %v5902_v10, %v5771_v25  ;;  %v2621_v25 = vmul.f32 %v5914_v45, %v5784_v55 }
 0x30c   : > { %v2737_v46 = vpop.permute.xlu1 %2736  ;;  %v2936_v61 = vadd.f32 %v2843_v5, %v2616_v60 }
 0x30d   : > { %v2803_v33 = vmul.f32 %v6034_v47, %v2737_v46 }
 0x30e   : > { %3355 = vrot.lane.b32.xlu0 %v2936_v61, %s4608_s27  ;;  %4530 = vtanh.f32 %v2936_v61 }
 0x30f   : > { %2896 = vrot.lane.b32.xlu1 %v2803_v33, %s4607_s13  ;;  %v2839_v3 = vpop.permute.xlu0 %2838  ;;  %v2618_v33 = vmul.f32 %v5909_v40, %v5756_v28 }
 0x310   : > { %v2845_v6 = vpop.permute.xlu1 %2844  ;;  %v2934_v21 = vadd.f32 %v2839_v3, %v2614_v17  ;;  %v2619_v3 = vmul.f32 %v5918_v42, %v5761_v23 }
 0x311   : > { %v2937_v31 = vadd.f32 %v2845_v6, %v2617_v54 }
 0x312   : > { %3351 = vrot.lane.b32.xlu0 %v2934_v21, %s4608_s27  ;;  %4532 = vtanh.f32 %v2934_v21 }
 0x313   : > { %3357 = vrot.lane.b32.xlu1 %v2937_v31, %s4608_s27  ;;  %v2851_v60 = vpop.permute.xlu0 %2850  ;;  %4534 = vtanh.f32 %v2937_v31 }
 0x314   : > { %v2841_v5 = vpop.permute.xlu1 %2840  ;;  %v2940_v19 = vadd.f32 %v2851_v60, %v2620_v63 }
 0x315   : > { %v2935_v46 = vadd.f32 %v2841_v5, %v2615_v37  ;;  %v2624_v37 = vmul.f32 %v5921_v7, %v5794_v32 }
 0x316   : > { %3363 = vrot.lane.b32.xlu0 %v2940_v19, %s4608_s27 }
 0x317   : > { %3353 = vrot.lane.b32.xlu1 %v2935_v46, %s4608_s27  ;;  %v2847_v17 = vpop.permute.xlu0 %2846  ;;  %4536 = vtanh.f32 %v2935_v46 }
 0x318   : > { %v2853_v30 = vpop.permute.xlu1 %2852  ;;  %v2938_v61 = vadd.f32 %v2847_v17, %v2618_v33  ;;  %v4531_v6 = vpop.eup %4530  ;;  %4538 = vtanh.f32 %v2940_v19  ;;  %v2622_v33 = vmul.f32 %v5931_v0, %v5786_v15 }
 0x319   : > { %v2941_v54 = vadd.f32 %v2853_v30, %v2621_v25  ;;  %v2625_v25 = vmul.f32 %v5936_v27, %v5800_v51  ;;  %v2623_v30 = vmul.f32 %v5941_v58, %v5792_v39 }
 0x31a   : > { %3359 = vrot.lane.b32.xlu0 %v2938_v61, %s4608_s27  ;;  %4540 = vtanh.f32 %v2938_v61 }
 0x31b   : > { %3365 = vrot.lane.b32.xlu1 %v2941_v54, %s4608_s27  ;;  %v2859_v55 = vpop.permute.xlu0 %2858  ;;  %4542 = vtanh.f32 %v2941_v54 }
 0x31c   : > { %v2849_v28 = vpop.permute.xlu1 %2848  ;;  %v4533_v21 = vpop.eup %4532  ;;  %v2944_v23 = vadd.f32 %v2859_v55, %v2624_v37 }
 0x31d   : > { %v2939_v63 = vadd.f32 %v2849_v28, %v2619_v3  ;;  %v4535_v31 = vpop.eup %4534  ;;  %v2628_v28 = vmul.f32 %v5945_v16, %v5810_v13 }
 0x31e   : > { %3034 = vrot.lane.b32.xlu0 %v4531_v6, %s4607_s13 }
 0x31f   : > { %3361 = vrot.lane.b32.xlu1 %v2939_v63, %s4608_s27  ;;  %v2855_v5 = vpop.permute.xlu0 %2854  ;;  %4544 = vtanh.f32 %v2939_v63 }
 0x320   : > { %v2861_v60 = vpop.permute.xlu1 %2860  ;;  %v2942_v32 = vadd.f32 %v2855_v5, %v2622_v33  ;;  %4546 = vtanh.f32 %v2944_v23 }
 0x321   : > { %v4537_v46 = vpop.eup %4536  ;;  %v2945_v19 = vadd.f32 %v2861_v60, %v2625_v25  ;;  %v2627_v60 = vmul.f32 %v5961_v49, %v5808_v59  ;;  %v2632_v25 = vmul.f32 %v5966_v22, %v5825_v36 }
 0x322   : > { %3030 = vrot.lane.b32.xlu0 %v4533_v21, %s4607_s13  ;;  %v4539_v15 = vpop.eup %4538  ;;  %v2626_v21 = vmul.f32 %v5950_v26, %v5802_v29  ;;  %4548 = vtanh.f32 %v2942_v32 }
 0x323   : > { %3036 = vrot.lane.b32.xlu1 %v4535_v31, %s4607_s13  ;;  %v2867_v51 = vpop.permute.xlu0 %2866  ;;  %v2629_v31 = vmul.f32 %v5954_v57, %v5816_v2  ;;  %4550 = vtanh.f32 %v2945_v19 }
 0x324   : > { %v2857_v17 = vpop.permute.xlu1 %2856  ;;  %v4541_v61 = vpop.eup %4540  ;;  %v2948_v39 = vadd.f32 %v2867_v51, %v2628_v28 }
 0x325   : > { %v2943_v3 = vadd.f32 %v2857_v17, %v2623_v30  ;;  %v4543_v54 = vpop.eup %4542  ;;  %v2630_v30 = vmul.f32 %v5972_v52, %v5818_v50 }
 0x326   : > { %3371 = vrot.lane.b32.xlu0 %v2944_v23, %s4608_s27 }
 0x327   : > { %3032 = vrot.lane.b32.xlu1 %v4537_v46, %s4607_s13  ;;  %v2863_v63 = vpop.permute.xlu0 %2862  ;;  %4552 = vtanh.f32 %v2943_v3 }
 0x328   : > { %v2869_v6 = vpop.permute.xlu1 %2868  ;;  %v2946_v13 = vadd.f32 %v2863_v63, %v2626_v21  ;;  %4554 = vtanh.f32 %v2948_v39 }
 0x329   : > { %v4545_v55 = vpop.eup %4544  ;;  %v2949_v37 = vadd.f32 %v2869_v6, %v2629_v31  ;;  %v2636_v6 = vmul.f32 %v5983_v44, %v5836_v24  ;;  %v2634_v31 = vmul.f32 %v5988_v4, %v5831_v11 }
 0x32a   : > { %3367 = vrot.lane.b32.xlu0 %v2942_v32, %s4608_s27  ;;  %v4547_v29 = vpop.eup %4546  ;;  %4556 = vtanh.f32 %v2946_v13 }
 0x32b   : > { %3373 = vrot.lane.b32.xlu1 %v2945_v19, %s4608_s27  ;;  %4558 = vtanh.f32 %v2949_v37 }
 0x32c   : > { %v2865_v23 = vpop.permute.xlu1 %2864  ;;  %v2875_v2 = vpop.permute.xlu0 %2874 }
 0x32d   : > { %v2947_v5 = vadd.f32 %v2865_v23, %v2627_v60  ;;  %v4549_v46 = vpop.eup %4548  ;;  %v2952_v59 = vadd.f32 %v2875_v2, %v2632_v25  ;;  %v2635_v60 = vmul.f32 %v5996_v12, %v5834_v8 }
 0x32e   : > { %3042 = vrot.lane.b32.xlu0 %v4539_v15, %s4607_s13  ;;  %v4551_v33 = vpop.eup %4550  ;;  %v2633_v15 = vmul.f32 %v5975_v35, %v5829_v34 }
 0x32f   : > { %3369 = vrot.lane.b32.xlu1 %v2943_v3, %s4608_s27  ;;  %4560 = vtanh.f32 %v2947_v5 }
 0x330   : > { %v2871_v19 = vpop.permute.xlu0 %2870  ;;  %4562 = vtanh.f32 %v2952_v59 }
 0x331   : > { %v2877_v32 = vpop.permute.xlu1 %2876  ;;  %v4553_v17 = vpop.eup %4552  ;;  %v2950_v36 = vadd.f32 %v2871_v19, %v2630_v30  ;;  %v6414_v19 = vld [vmem:[#allocation3_spill] sm:$0xff] }
 0x332   : > { %3038 = vrot.lane.b32.xlu0 %v4541_v61, %s4607_s13  ;;  %v2953_v3 = vadd.f32 %v2877_v32, %v2633_v15  ;;  %v2631_v61 = vmul.f32 %v5980_v1, %v5823_v9  ;;  %v4555_v50 = vpop.eup %4554  ;;  %v6416_v15 = vld [vmem:[#allocation7_spill] sm:$0xff] }
 0x333   : > { %3044 = vrot.lane.b32.xlu1 %v4543_v54, %s4607_s13  ;;  %4564 = vtanh.f32 %v2950_v36 }
 0x334   : > { %v4557_v28 = vpop.eup %4556  ;;  %4566 = vtanh.f32 %v2953_v3 }
 0x335   : > { %v2873_v51 = vpop.permute.xlu1 %2872 }
 0x336   : > { %3379 = vrot.lane.b32.xlu0 %v2948_v39, %s4608_s27  ;;  %v2951_v54 = vadd.f32 %v2873_v51, %v2631_v61  ;;  %v4559_v39 = vpop.eup %4558 }
 0x337   : > { %3040 = vrot.lane.b32.xlu1 %v4545_v55, %s4607_s13  ;;  %v2883_v34 = vpop.permute.xlu0 %2882 }
 0x338   : > { %v2956_v9 = vadd.f32 %v2883_v34, %v2636_v6  ;;  %4568 = vtanh.f32 %v2951_v54  ;;  %v6419_v34 = vld [vmem:[#allocation13_spill] sm:$0xff] }
 0x339   : > { %v4561_v21 = vpop.eup %4560 }
 0x33a   : > { %3375 = vrot.lane.b32.xlu0 %v2946_v13, %s4608_s27  ;;  %v2637_v13 = vmul.f32 %v5991_v41, %v5840_v18  ;;  %v4563_v11 = vpop.eup %4562  ;;  %4570 = vtanh.f32 %v2956_v9 }
 0x33b   : > { %3381 = vrot.lane.b32.xlu1 %v2949_v37, %s4608_s27  ;;  %v2885_v63 = vpop.permute.xlu1 %2884  ;;  %v2879_v55 = vpop.permute.xlu0 %2878 }
 0x33c   : > { %v2954_v24 = vadd.f32 %v2879_v55, %v2634_v31  ;;  %v2957_v37 = vadd.f32 %v2885_v63, %v2637_v13  ;;  %v6420_v31 = vld [vmem:[#allocation9_spill] sm:$0xff] }
 0x33d   : > { %v2644_v13 = vmul.f32 %v6020_v20, %v6420_v31 }
 0x33e   : > { %3050 = vrot.lane.b32.xlu0 %v4547_v29, %s4607_s13  ;;  %4572 = vtanh.f32 %v2954_v24 }
 0x33f   : > { %3377 = vrot.lane.b32.xlu1 %v2947_v5, %s4608_s27  ;;  %v2881_v23 = vpop.permute.xlu1 %2880  ;;  %v2891_v18 = vpop.permute.xlu0 %2890  ;;  %4574 = vtanh.f32 %v2957_v37 }
 0x340   : > { %v2955_v29 = vadd.f32 %v2881_v23, %v2635_v60  ;;  %v4565_v5 = vpop.eup %4564 }
 0x341   : > { %v4567_v2 = vpop.eup %4566 }
 0x342   : > { %3046 = vrot.lane.b32.xlu0 %v4549_v46, %s4607_s13  ;;  %v6413_v46 = vld [vmem:[#allocation5_spill] sm:$0xff]  ;;  %v4569_v32 = vpop.eup %4568  ;;  %4576 = vtanh.f32 %v2955_v29 }
 0x343   : > { %3052 = vrot.lane.b32.xlu1 %v4551_v33, %s4607_s13  ;;  %v2640_v33 = vmul.f32 %v5999_v53, %v6413_v46 }
 0x345   : > { %v2960_v8 = vadd.f32 %v2891_v18, %v2640_v33  ;;  %v2893_v25 = vpop.permute.xlu1 %2892  ;;  %v6422_v18 = vld [vmem:[#allocation10_spill] sm:$0xff] }
 0x346   : > { %3387 = vrot.lane.b32.xlu0 %v2952_v59, %s4608_s27  ;;  %v2887_v59 = vpop.permute.xlu0 %2886 }
 0x347   : > { %3048 = vrot.lane.b32.xlu1 %v4553_v17, %s4607_s13  ;;  %v6415_v17 = vld [vmem:[#allocation11_spill] sm:$0xff]  ;;  %4578 = vtanh.f32 %v2960_v8 }
 0x348   : > { %v2638_v30 = vmul.f32 %v6415_v17, %v6414_v19 }
 0x34a   : > { %3383 = vrot.lane.b32.xlu0 %v2950_v36, %s4608_s27  ;;  %v6417_v36 = vld [vmem:[#allocation12_spill] sm:$0xff]  ;;  %v2958_v51 = vadd.f32 %v2887_v59, %v2638_v30 }
 0x34b   : > { %3389 = vrot.lane.b32.xlu1 %v2953_v3, %s4608_s27  ;;  %v2641_v3 = vmul.f32 %v6417_v36, %v6416_v15 }
 0x34c   : > { %4580 = vtanh.f32 %v2958_v51 }
 0x34d   : > { %v2961_v61 = vadd.f32 %v2893_v25, %v2641_v3 }
 0x34e   : > { %3058 = vrot.lane.b32.xlu0 %v4555_v50, %s4607_s13  ;;  %v2889_v50 = vpop.permute.xlu1 %2888 }
 0x34f   : > { %3385 = vrot.lane.b32.xlu1 %v2951_v54, %s4608_s27  ;;  %v6418_v54 = vld [vmem:[#allocation4_spill] sm:$0xff]  ;;  %4582 = vtanh.f32 %v2961_v61 }
 0x352   : > { %3054 = vrot.lane.b32.xlu0 %v4557_v28, %s4607_s13  ;;  %v2639_v28 = vmul.f32 %v6419_v34, %v6418_v54 }
 0x353   : > { %3060 = vrot.lane.b32.xlu1 %v4559_v39, %s4607_s13  ;;  %v4571_v39 = vpop.eup %4570 }
 0x354   : > { %v2959_v6 = vadd.f32 %v2889_v50, %v2639_v28 }
 0x356   : > { %3395 = vrot.lane.b32.xlu0 %v2956_v9, %s4608_s27  ;;  %v4573_v9 = vpop.eup %4572 }
 0x357   : > { %3056 = vrot.lane.b32.xlu1 %v4561_v21, %s4607_s13  ;;  %v4575_v63 = vpop.eup %4574 }
 0x358   : > { %v4577_v55 = vpop.eup %4576 }
 0x359   : > { %v4579_v59 = vpop.eup %4578 }
 0x35a   : > { %3391 = vrot.lane.b32.xlu0 %v2954_v24, %s4608_s27  ;;  %v6421_v24 = vld [vmem:[#allocation6_spill] sm:$0xff]  ;;  %v4581_v15 = vpop.eup %4580 }
 0x35b   : > { %3397 = vrot.lane.b32.xlu1 %v2957_v37, %s4608_s27  ;;  %v2642_v37 = vmul.f32 %v6024_v48, %v6421_v24  ;;  %v4583_v3 = vpop.eup %4582 }
 0x35e   : > { %3066 = vrot.lane.b32.xlu0 %v4563_v11, %s4607_s13 }
 0x35f   : > { %3393 = vrot.lane.b32.xlu1 %v2955_v29, %s4608_s27 }
 0x362   : > { %3062 = vrot.lane.b32.xlu0 %v4565_v5, %s4607_s13  ;;  %v2645_v5 = vmul.f32 %v6026_v14, %v6422_v18 }
 0x363   : > { %3068 = vrot.lane.b32.xlu1 %v4567_v2, %s4607_s13  ;;  %v6423_v2 = vld [vmem:[#allocation8_spill] sm:$0xff] }
 0x364   : > { %v2643_v46 = vmul.f32 %v6034_v47, %v6423_v2 }
 0x366   : > { %3403 = vrot.lane.b32.xlu0 %v2960_v8, %s4608_s27 }
 0x367   : > { %3064 = vrot.lane.b32.xlu1 %v4569_v32, %s4607_s13 }
 0x36a   : > { %3399 = vrot.lane.b32.xlu0 %v2958_v51, %s4608_s27 }
 0x36b   : > { %3405 = vrot.lane.b32.xlu1 %v2961_v61, %s4608_s27 }
 0x36e   : > { %3074 = vrot.lane.b32.xlu0 %v4571_v39, %s4607_s13 }
 0x36f   : > { %3401 = vrot.lane.b32.xlu1 %v2959_v6, %s4608_s27 }
 0x372   : > { %3070 = vrot.lane.b32.xlu0 %v4573_v9, %s4607_s13 }
 0x373   : > { %3076 = vrot.lane.b32.xlu1 %v4575_v63, %s4607_s13 }
 0x377   : > { %3072 = vrot.lane.b32.xlu1 %v4577_v55, %s4607_s13 }
 0x378   : > { %v2899_v21 = vpop.permute.xlu0 %2898 }
 0x379   : > { %v6148_v23 = vadd.f32 %v2899_v21, %v2644_v13 }
 0x37b   : > { %4584 = vtanh.f32 %v6148_v23 }
 0x37c   : > { %v2895_v60 = vpop.permute.xlu0 %2894  ;;  %4586 = vtanh.f32 %v2959_v6 }
 0x37d   : > { %v2901_v11 = vpop.permute.xlu1 %2900  ;;  %v2962_v29 = vadd.f32 %v2895_v60, %v2642_v37 }
 0x37e   : > { %v6162_v8 = vadd.f32 %v2901_v11, %v2645_v5 }
 0x37f   : > { %3407 = vrot.lane.b32.xlu0 %v2962_v29, %s4608_s27  ;;  %4588 = vtanh.f32 %v2962_v29 }
 0x380   : > { %v3356_v33 = vpop.permute.xlu0 %3355  ;;  %4590 = vtanh.f32 %v6162_v8 }
 0x381   : > { %v2897_v25 = vpop.permute.xlu1 %2896  ;;  %3449 = vst.msk [vmem:[%s6154_s18 + $0x10] sm:$0xff] %vm3286_vm7, %v3356_v33 }
 0x382   : > { %v2963_v32 = vadd.f32 %v2897_v25, %v2643_v46 }
 0x383   : > { %3082 = vrot.lane.b32.xlu0 %v4579_v59, %s4607_s13 }
 0x384   : > { %3409 = vrot.lane.b32.xlu1 %v2963_v32, %s4608_s27  ;;  %v3352_v19 = vpop.permute.xlu0 %3351  ;;  %4592 = vtanh.f32 %v2963_v32 }
 0x385   : > { %v3358_v30 = vpop.permute.xlu1 %3357  ;;  %3447 = vst.msk [vmem:[%s6154_s18] sm:$0xff] %vm3286_vm7, %v3352_v19  ;;  %v4585_v50 = vpop.eup %4584 }
 0x386   : > { %3450 = vst.msk [vmem:[%s6154_s18 + $0x18] sm:$0xff] %vm3286_vm7, %v3358_v30  ;;  %v4587_v54 = vpop.eup %4586 }
 0x387   : > { %3078 = vrot.lane.b32.xlu0 %v4581_v15, %s4607_s13 }
 0x388   : > { %3084 = vrot.lane.b32.xlu1 %v4583_v3, %s4607_s13  ;;  %v3364_v51 = vpop.permute.xlu0 %3363 }
 0x389   : > { %v3354_v61 = vpop.permute.xlu1 %3353  ;;  %3453 = vst.msk [vmem:[%s6154_s18 + $0x30] sm:$0xff] %vm3286_vm7, %v3364_v51  ;;  %v4589_v6 = vpop.eup %4588 }
 0x38a   : > { %3448 = vst.msk [vmem:[%s6154_s18 + $0x8] sm:$0xff] %vm3286_vm7, %v3354_v61  ;;  %v4591_v9 = vpop.eup %4590 }
 0x38b   : > { %3090 = vrot.lane.b32.xlu0 %v4585_v50, %s4607_s13 }
 0x38c   : > { %3080 = vrot.lane.b32.xlu1 %v4587_v54, %s4607_s13  ;;  %v3360_v28 = vpop.permute.xlu0 %3359 }
 0x38d   : > { %v3366_v39 = vpop.permute.xlu1 %3365  ;;  %3451 = vst.msk [vmem:[%s6154_s18 + $0x20] sm:$0xff] %vm3286_vm7, %v3360_v28 }
 0x38e   : > { %3454 = vst.msk [vmem:[%s6154_s18 + $0x38] sm:$0xff] %vm3286_vm7, %v3366_v39  ;;  %v4593_v31 = vpop.eup %4592 }
 0x38f   : > { %3086 = vrot.lane.b32.xlu0 %v4589_v6, %s4607_s13 }
 0x390   : > { %3092 = vrot.lane.b32.xlu1 %v4591_v9, %s4607_s13  ;;  %v3035_v63 = vpop.permute.xlu0 %3034 }
 0x391   : > { %v3362_v55 = vpop.permute.xlu1 %3361  ;;  %v3128_v21 = vmul.f32 %v5887_v43, %v3035_v63 }
 0x392   : > { %3452 = vst.msk [vmem:[%s6154_s18 + $0x28] sm:$0xff] %vm3286_vm7, %v3362_v55 }
 0x393   : > { %3194 = vrot.lane.b32.xlu0 %v3128_v21, %s4609_s19 }
 0x394   : > { %3088 = vrot.lane.b32.xlu1 %v4593_v31, %s4607_s13  ;;  %v3031_v13 = vpop.permute.xlu0 %3030 }
 0x395   : > { %v3037_v24 = vpop.permute.xlu1 %3036  ;;  %v3126_v37 = vmul.f32 %v5891_v56, %v3031_v13 }
 0x396   : > { %v3129_v60 = vmul.f32 %v5897_v62, %v3037_v24 }
 0x397   : > { %3190 = vrot.lane.b32.xlu0 %v3126_v37, %s4609_s19 }
 0x398   : > { %3196 = vrot.lane.b32.xlu1 %v3129_v60, %s4609_s19  ;;  %v3372_v43 = vpop.permute.xlu0 %3371 }
 0x399   : > { %v3033_v11 = vpop.permute.xlu1 %3032  ;;  %3457 = vst.msk [vmem:[%s6154_s18 + $0x50] sm:$0xff] %vm3286_vm7, %v3372_v43 }
 0x39a   : > { %v3127_v29 = vmul.f32 %v5906_v38, %v3033_v11 }
 0x39c   : > { %3192 = vrot.lane.b32.xlu1 %v3127_v29, %s4609_s19  ;;  %v3368_v18 = vpop.permute.xlu0 %3367 }
 0x39d   : > { %v3374_v5 = vpop.permute.xlu1 %3373  ;;  %3455 = vst.msk [vmem:[%s6154_s18 + $0x40] sm:$0xff] %vm3286_vm7, %v3368_v18 }
 0x39e   : > { %3458 = vst.msk [vmem:[%s6154_s18 + $0x58] sm:$0xff] %vm3286_vm7, %v3374_v5 }
 0x3a0   : > { %v3043_v56 = vpop.permute.xlu0 %3042 }
 0x3a1   : > { %v3370_v62 = vpop.permute.xlu1 %3369  ;;  %v3132_v2 = vmul.f32 %v5902_v10, %v3043_v56 }
 0x3a2   : > { %3456 = vst.msk [vmem:[%s6154_s18 + $0x48] sm:$0xff] %vm3286_vm7, %v3370_v62 }
 0x3a3   : > { %3202 = vrot.lane.b32.xlu0 %v3132_v2, %s4609_s19 }
 0x3a4   : > { %v3039_v38 = vpop.permute.xlu0 %3038 }
 0x3a5   : > { %v3045_v46 = vpop.permute.xlu1 %3044  ;;  %v3130_v33 = vmul.f32 %v5909_v40, %v3039_v38 }
 0x3a6   : > { %v3133_v25 = vmul.f32 %v5914_v45, %v3045_v46 }
 0x3a7   : > { %3198 = vrot.lane.b32.xlu0 %v3130_v33, %s4609_s19 }
 0x3a8   : > { %3204 = vrot.lane.b32.xlu1 %v3133_v25, %s4609_s19  ;;  %v3380_v59 = vpop.permute.xlu0 %3379 }
 0x3a9   : > { %v3041_v32 = vpop.permute.xlu1 %3040  ;;  %3461 = vst.msk [vmem:[%s6154_s18 + $0x70] sm:$0xff] %vm3286_vm7, %v3380_v59 }
 0x3aa   : > { %v3131_v10 = vmul.f32 %v5918_v42, %v3041_v32 }
 0x3ac   : > { %3200 = vrot.lane.b32.xlu1 %v3131_v10, %s4609_s19  ;;  %v3376_v19 = vpop.permute.xlu0 %3375 }
 0x3ad   : > { %v3382_v30 = vpop.permute.xlu1 %3381  ;;  %3459 = vst.msk [vmem:[%s6154_s18 + $0x60] sm:$0xff] %vm3286_vm7, %v3376_v19 }
 0x3ae   : > { %3462 = vst.msk [vmem:[%s6154_s18 + $0x78] sm:$0xff] %vm3286_vm7, %v3382_v30 }
 0x3b0   : > { %v3051_v40 = vpop.permute.xlu0 %3050 }
 0x3b1   : > { %v3378_v45 = vpop.permute.xlu1 %3377  ;;  %v3136_v15 = vmul.f32 %v5921_v7, %v3051_v40 }
 0x3b2   : > { %3460 = vst.msk [vmem:[%s6154_s18 + $0x68] sm:$0xff] %vm3286_vm7, %v3378_v45 }
 0x3b3   : > { %3210 = vrot.lane.b32.xlu0 %v3136_v15, %s4609_s19 }
 0x3b4   : > { %v3047_v42 = vpop.permute.xlu0 %3046 }
 0x3b5   : > { %v3053_v3 = vpop.permute.xlu1 %3052  ;;  %v3134_v51 = vmul.f32 %v5931_v0, %v3047_v42 }
 0x3b6   : > { %v3137_v61 = vmul.f32 %v5936_v27, %v3053_v3 }
 0x3b7   : > { %3206 = vrot.lane.b32.xlu0 %v3134_v51, %s4609_s19 }
 0x3b8   : > { %3212 = vrot.lane.b32.xlu1 %v3137_v61, %s4609_s19  ;;  %v3388_v50 = vpop.permute.xlu0 %3387 }
 0x3b9   : > { %v3049_v54 = vpop.permute.xlu1 %3048  ;;  %3465 = vst.msk [vmem:[%s6154_s18 + $0x90] sm:$0xff] %vm3286_vm7, %v3388_v50 }
 0x3ba   : > { %v3135_v7 = vmul.f32 %v5941_v58, %v3049_v54 }
 0x3bc   : > { %3208 = vrot.lane.b32.xlu1 %v3135_v7, %s4609_s19  ;;  %v3384_v28 = vpop.permute.xlu0 %3383 }
 0x3bd   : > { %v3390_v39 = vpop.permute.xlu1 %3389  ;;  %3463 = vst.msk [vmem:[%s6154_s18 + $0x80] sm:$0xff] %vm3286_vm7, %v3384_v28 }
 0x3be   : > { %3466 = vst.msk [vmem:[%s6154_s18 + $0x98] sm:$0xff] %vm3286_vm7, %v3390_v39 }
 0x3c0   : > { %v3059_v0 = vpop.permute.xlu0 %3058 }
 0x3c1   : > { %v3386_v27 = vpop.permute.xlu1 %3385  ;;  %v3140_v6 = vmul.f32 %v5945_v16, %v3059_v0 }
 0x3c2   : > { %3464 = vst.msk [vmem:[%s6154_s18 + $0x88] sm:$0xff] %vm3286_vm7, %v3386_v27 }
 0x3c3   : > { %3218 = vrot.lane.b32.xlu0 %v3140_v6, %s4609_s19 }
 0x3c4   : > { %v3055_v58 = vpop.permute.xlu0 %3054 }
 0x3c5   : > { %v3061_v9 = vpop.permute.xlu1 %3060  ;;  %v3138_v63 = vmul.f32 %v5950_v26, %v3055_v58 }
 0x3c6   : > { %v3141_v55 = vmul.f32 %v5954_v57, %v3061_v9 }
 0x3c7   : > { %3214 = vrot.lane.b32.xlu0 %v3138_v63, %s4609_s19 }
 0x3c8   : > { %3220 = vrot.lane.b32.xlu1 %v3141_v55, %s4609_s19  ;;  %v3396_v21 = vpop.permute.xlu0 %3395 }
 0x3c9   : > { %v3057_v31 = vpop.permute.xlu1 %3056  ;;  %3469 = vst.msk [vmem:[%s6154_s18 + $0xb0] sm:$0xff] %vm3286_vm7, %v3396_v21 }
 0x3ca   : > { %v3139_v16 = vmul.f32 %v5961_v49, %v3057_v31 }
 0x3cc   : > { %3216 = vrot.lane.b32.xlu1 %v3139_v16, %s4609_s19  ;;  %v3392_v13 = vpop.permute.xlu0 %3391 }
 0x3cd   : > { %v3398_v24 = vpop.permute.xlu1 %3397  ;;  %3467 = vst.msk [vmem:[%s6154_s18 + $0xa0] sm:$0xff] %vm3286_vm7, %v3392_v13 }
 0x3ce   : > { %3470 = vst.msk [vmem:[%s6154_s18 + $0xb8] sm:$0xff] %vm3286_vm7, %v3398_v24 }
 0x3d0   : > { %v3067_v26 = vpop.permute.xlu0 %3066 }
 0x3d1   : > { %v3394_v57 = vpop.permute.xlu1 %3393  ;;  %v3144_v37 = vmul.f32 %v5966_v22, %v3067_v26 }
 0x3d2   : > { %3468 = vst.msk [vmem:[%s6154_s18 + $0xa8] sm:$0xff] %vm3286_vm7, %v3394_v57 }
 0x3d3   : > { %3226 = vrot.lane.b32.xlu0 %v3144_v37, %s4609_s19 }
 0x3d4   : > { %v3063_v49 = vpop.permute.xlu0 %3062 }
 0x3d5   : > { %v3069_v60 = vpop.permute.xlu1 %3068  ;;  %v3142_v43 = vmul.f32 %v5972_v52, %v3063_v49 }
 0x3d6   : > { %v3145_v11 = vmul.f32 %v5975_v35, %v3069_v60 }
 0x3d7   : > { %3222 = vrot.lane.b32.xlu0 %v3142_v43, %s4609_s19 }
 0x3d8   : > { %3228 = vrot.lane.b32.xlu1 %v3145_v11, %s4609_s19  ;;  %v3404_v29 = vpop.permute.xlu0 %3403 }
 0x3d9   : > { %v3065_v18 = vpop.permute.xlu1 %3064  ;;  %3473 = vst.msk [vmem:[%s6154_s18 + $0xd0] sm:$0xff] %vm3286_vm7, %v3404_v29 }
 0x3da   : > { %v3143_v22 = vmul.f32 %v5980_v1, %v3065_v18 }
 0x3dc   : > { %3224 = vrot.lane.b32.xlu1 %v3143_v22, %s4609_s19  ;;  %v3400_v5 = vpop.permute.xlu0 %3399 }
 0x3dd   : > { %v3406_v56 = vpop.permute.xlu1 %3405  ;;  %3471 = vst.msk [vmem:[%s6154_s18 + $0xc0] sm:$0xff] %vm3286_vm7, %v3400_v5 }
 0x3de   : > { %3474 = vst.msk [vmem:[%s6154_s18 + $0xd8] sm:$0xff] %vm3286_vm7, %v3406_v56 }
 0x3e0   : > { %v3075_v52 = vpop.permute.xlu0 %3074 }
 0x3e1   : > { %v3402_v35 = vpop.permute.xlu1 %3401  ;;  %v3148_v62 = vmul.f32 %v5983_v44, %v3075_v52 }
 0x3e2   : > { %3472 = vst.msk [vmem:[%s6154_s18 + $0xc8] sm:$0xff] %vm3286_vm7, %v3402_v35 }
 0x3e3   : > { %3234 = vrot.lane.b32.xlu0 %v3148_v62, %s4609_s19 }
 0x3e4   : > { %v3071_v2 = vpop.permute.xlu0 %3070 }
 0x3e5   : > { %v3077_v1 = vpop.permute.xlu1 %3076  ;;  %v3146_v38 = vmul.f32 %v5988_v4, %v3071_v2 }
 0x3e6   : > { %v3149_v46 = vmul.f32 %v5991_v41, %v3077_v1 }
 0x3e7   : > { %3230 = vrot.lane.b32.xlu0 %v3146_v38, %s4609_s19 }
 0x3e8   : > { %3236 = vrot.lane.b32.xlu1 %v3149_v46, %s4609_s19 }
 0x3e9   : > { %v3073_v33 = vpop.permute.xlu1 %3072 }
 0x3ea   : > { %v3147_v25 = vmul.f32 %v5996_v12, %v3073_v33 }
 0x3ec   : > { %3232 = vrot.lane.b32.xlu1 %v3147_v25, %s4609_s19 }
 0x3f1   : > { %v3408_v44 = vpop.permute.xlu0 %3407 }
 0x3f2   : > { %3475 = vst.msk [vmem:[%s6154_s18 + $0xe0] sm:$0xff] %vm3286_vm7, %v3408_v44 }
 0x3f5   : > { %v3083_v59 = vpop.permute.xlu0 %3082 }
 0x3f6   : > { %v3410_v32 = vpop.permute.xlu1 %3409  ;;  %v3152_v10 = vmul.f32 %v5999_v53, %v3083_v59 }
 0x3f7   : > { %3476 = vst.msk [vmem:[%s6154_s18 + $0xe8] sm:$0xff] %vm3286_vm7, %v3410_v32 }
 0x3f8   : > { %3242 = vrot.lane.b32.xlu0 %v3152_v10, %s4609_s19 }
 0x3f9   : > { %v3079_v4 = vpop.permute.xlu0 %3078 }
 0x3fa   : > { %v3085_v41 = vpop.permute.xlu1 %3084  ;;  %v3150_v19 = vmul.f32 %v6415_v17, %v3079_v4 }
 0x3fb   : > { %v3153_v12 = vmul.f32 %v6417_v36, %v3085_v41 }
 0x3fc   : > { %3238 = vrot.lane.b32.xlu0 %v3150_v19, %s4609_s19 }
 0x3fd   : > { %3244 = vrot.lane.b32.xlu1 %v3153_v12, %s4609_s19  ;;  %v3091_v30 = vpop.permute.xlu0 %3090 }
 0x3fe   : > { %v3081_v40 = vpop.permute.xlu1 %3080  ;;  %v3156_v45 = vmul.f32 %v6020_v20, %v3091_v30 }
 0x3ff   : > { %v3151_v53 = vmul.f32 %v6419_v34, %v3081_v40 }
 0x400   : > { %3250 = vrot.lane.b32.xlu0 %v3156_v45, %s4609_s19 }
 0x401   : > { %3240 = vrot.lane.b32.xlu1 %v3151_v53, %s4609_s19  ;;  %v3087_v15 = vpop.permute.xlu0 %3086 }
 0x402   : > { %v3093_v42 = vpop.permute.xlu1 %3092  ;;  %v3154_v17 = vmul.f32 %v6024_v48, %v3087_v15 }
 0x403   : > { %v3157_v36 = vmul.f32 %v6026_v14, %v3093_v42 }
 0x404   : > { %3246 = vrot.lane.b32.xlu0 %v3154_v17, %s4609_s19 }
 0x405   : > { %3252 = vrot.lane.b32.xlu1 %v3157_v36, %s4609_s19  ;;  %v3195_v20 = vpop.permute.xlu0 %3194 }
 0x406   : > { %v3089_v34 = vpop.permute.xlu1 %3088  ;;  %3289 = vst.msk [vmem:[%s6298_s24 + $0x10] sm:$0xff] %vm3286_vm7, %v3195_v20 }
 0x407   : > { %v3155_v48 = vmul.f32 %v6034_v47, %v3089_v34 }
 0x408   : > { %3411 = vrot.lane.b32.xlu0 %v6148_v23, %s4608_s27 }
 0x409   : > { %3248 = vrot.lane.b32.xlu1 %v3155_v48, %s4609_s19  ;;  %v3191_v14 = vpop.permute.xlu0 %3190 }
 0x40a   : > { %v3197_v3 = vpop.permute.xlu1 %3196  ;;  %3287 = vst.msk [vmem:[%s6298_s24] sm:$0xff] %vm3286_vm7, %v3191_v14 }
 0x40b   : > { %3290 = vst.msk [vmem:[%s6298_s24 + $0x18] sm:$0xff] %vm3286_vm7, %v3197_v3 }
 0x40d   : > { %3413 = vrot.lane.b32.xlu1 %v6162_v8, %s4608_s27 }
 0x40e   : > { %v3193_v51 = vpop.permute.xlu1 %3192 }
 0x40f   : > { %3288 = vst.msk [vmem:[%s6298_s24 + $0x8] sm:$0xff] %vm3286_vm7, %v3193_v51 }
 0x415   : > { %v3203_v47 = vpop.permute.xlu0 %3202 }
 0x416   : > { %3293 = vst.msk [vmem:[%s6298_s24 + $0x30] sm:$0xff] %vm3286_vm7, %v3203_v47 }
 0x419   : > { %v3199_v23 = vpop.permute.xlu0 %3198 }
 0x41a   : > { %v3205_v61 = vpop.permute.xlu1 %3204  ;;  %3291 = vst.msk [vmem:[%s6298_s24 + $0x20] sm:$0xff] %vm3286_vm7, %v3199_v23 }
 0x41b   : > { %3294 = vst.msk [vmem:[%s6298_s24 + $0x38] sm:$0xff] %vm3286_vm7, %v3205_v61 }
 0x41e   : > { %v3201_v50 = vpop.permute.xlu1 %3200 }
 0x41f   : > { %3292 = vst.msk [vmem:[%s6298_s24 + $0x28] sm:$0xff] %vm3286_vm7, %v3201_v50 }
 0x425   : > { %v3211_v8 = vpop.permute.xlu0 %3210 }
 0x426   : > { %3297 = vst.msk [vmem:[%s6298_s24 + $0x50] sm:$0xff] %vm3286_vm7, %v3211_v8 }
 0x429   : > { %v3207_v54 = vpop.permute.xlu0 %3206 }
 0x42a   : > { %v3213_v7 = vpop.permute.xlu1 %3212  ;;  %3295 = vst.msk [vmem:[%s6298_s24 + $0x40] sm:$0xff] %vm3286_vm7, %v3207_v54 }
 0x42b   : > { %3298 = vst.msk [vmem:[%s6298_s24 + $0x58] sm:$0xff] %vm3286_vm7, %v3213_v7 }
 0x42e   : > { %v3209_v28 = vpop.permute.xlu1 %3208 }
 0x42f   : > { %3296 = vst.msk [vmem:[%s6298_s24 + $0x48] sm:$0xff] %vm3286_vm7, %v3209_v28 }
 0x435   : > { %v3219_v39 = vpop.permute.xlu0 %3218 }
 0x436   : > { %3301 = vst.msk [vmem:[%s6298_s24 + $0x70] sm:$0xff] %vm3286_vm7, %v3219_v39 }
 0x439   : > { %v3215_v0 = vpop.permute.xlu0 %3214 }
 0x43a   : > { %v3221_v27 = vpop.permute.xlu1 %3220  ;;  %3299 = vst.msk [vmem:[%s6298_s24 + $0x60] sm:$0xff] %vm3286_vm7, %v3215_v0 }
 0x43b   : > { %3302 = vst.msk [vmem:[%s6298_s24 + $0x78] sm:$0xff] %vm3286_vm7, %v3221_v27 }
 0x43e   : > { %v3217_v6 = vpop.permute.xlu1 %3216 }
 0x43f   : > { %3300 = vst.msk [vmem:[%s6298_s24 + $0x68] sm:$0xff] %vm3286_vm7, %v3217_v6 }
 0x445   : > { %v3227_v58 = vpop.permute.xlu0 %3226 }
 0x446   : > { %3305 = vst.msk [vmem:[%s6298_s24 + $0x90] sm:$0xff] %vm3286_vm7, %v3227_v58 }
 0x449   : > { %v3223_v9 = vpop.permute.xlu0 %3222 }
 0x44a   : > { %v3229_v63 = vpop.permute.xlu1 %3228  ;;  %3303 = vst.msk [vmem:[%s6298_s24 + $0x80] sm:$0xff] %vm3286_vm7, %v3223_v9 }
 0x44b   : > { %3306 = vst.msk [vmem:[%s6298_s24 + $0x98] sm:$0xff] %vm3286_vm7, %v3229_v63 }
 0x44e   : > { %v3225_v55 = vpop.permute.xlu1 %3224 }
 0x44f   : > { %3304 = vst.msk [vmem:[%s6298_s24 + $0x88] sm:$0xff] %vm3286_vm7, %v3225_v55 }
 0x455   : > { %v3235_v21 = vpop.permute.xlu0 %3234 }
 0x456   : > { %3309 = vst.msk [vmem:[%s6298_s24 + $0xb0] sm:$0xff] %vm3286_vm7, %v3235_v21 }
 0x459   : > { %v3231_v31 = vpop.permute.xlu0 %3230 }
 0x45a   : > { %v3237_v16 = vpop.permute.xlu1 %3236  ;;  %3307 = vst.msk [vmem:[%s6298_s24 + $0xa0] sm:$0xff] %vm3286_vm7, %v3231_v31 }
 0x45b   : > { %3310 = vst.msk [vmem:[%s6298_s24 + $0xb8] sm:$0xff] %vm3286_vm7, %v3237_v16 }
 0x45e   : > { %v3233_v13 = vpop.permute.xlu1 %3232 }
 0x45f   : > { %3308 = vst.msk [vmem:[%s6298_s24 + $0xa8] sm:$0xff] %vm3286_vm7, %v3233_v13 }
 0x46a   : > { %v3243_v24 = vpop.permute.xlu0 %3242 }
 0x46b   : > { %3313 = vst.msk [vmem:[%s6298_s24 + $0xd0] sm:$0xff] %vm3286_vm7, %v3243_v24 }
 0x46e   : > { %v3239_v26 = vpop.permute.xlu0 %3238 }
 0x46f   : > { %v3245_v57 = vpop.permute.xlu1 %3244  ;;  %3311 = vst.msk [vmem:[%s6298_s24 + $0xc0] sm:$0xff] %vm3286_vm7, %v3239_v26 }
 0x470   : > { %3314 = vst.msk [vmem:[%s6298_s24 + $0xd8] sm:$0xff] %vm3286_vm7, %v3245_v57 }
 0x472   : > { %v3251_v37 = vpop.permute.xlu0 %3250 }
 0x473   : > { %v3241_v49 = vpop.permute.xlu1 %3240  ;;  %3317 = vst.msk [vmem:[%s6298_s24 + $0xf0] sm:$0xff] %vm3286_vm7, %v3251_v37 }
 0x474   : > { %3312 = vst.msk [vmem:[%s6298_s24 + $0xc8] sm:$0xff] %vm3286_vm7, %v3241_v49 }
 0x476   : > { %v3247_v60 = vpop.permute.xlu0 %3246 }
 0x477   : > { %v3253_v43 = vpop.permute.xlu1 %3252  ;;  %3315 = vst.msk [vmem:[%s6298_s24 + $0xe0] sm:$0xff] %vm3286_vm7, %v3247_v60 }
 0x478   : > { %3318 = vst.msk [vmem:[%s6298_s24 + $0xf8] sm:$0xff] %vm3286_vm7, %v3253_v43 }
 0x47a   : > { %v3412_v11 = vpop.permute.xlu0 %3411 }
 0x47b   : > { %v3249_v29 = vpop.permute.xlu1 %3248  ;;  %3477 = vst.msk [vmem:[%s6154_s18 + $0xf0] sm:$0xff] %vm3286_vm7, %v3412_v11 }
 0x47c   : > { %3316 = vst.msk [vmem:[%s6298_s24 + $0xe8] sm:$0xff] %vm3286_vm7, %v3249_v29 }
 0x47f   : > { %v3414_v18 = vpop.permute.xlu1 %3413 }
 0x480   : > { %3478 = vst.msk [vmem:[%s6154_s18 + $0xf8] sm:$0xff] %vm3286_vm7, %v3414_v18 }
 0x481 PF: > { %s17_s21 = sadd.s32 1, %s4601_s21  }
 0x482   : > { %p14_p4 = scmp.ge.s32.totalorder %s17_s21, 4  }
 0x484   :  { %16 = sbr.rel (!%p14_p4) target bundleno = 1 (0x1), region = 90 }

// kernel: _forward_impl.3
= control target key start
LH: loop header
LB: loop body
LE: loop exit
PB: predicated region body
PF: predicated region fallthrough
CT: control target
= control target key end

     0   :  { %12 = vsyncpa [#allocation4], 0  ;;  %s6487_s0 = inlined_call_operand.vmem [shape: f32[2,16,16,32], index: 0, kind: input, shape index: {}]   ;;  %s6488_s1 = inlined_call_operand.vmem [shape: f32[2,16,16,32], index: 1, kind: input, shape index: {}]   ;;  %s6489_s2 = inlined_call_operand.vmem [shape: f32[2,256,32], index: 2, kind: input, shape index: {}, may-alias: {2,6}]   ;;  %s6490_s3 = inlined_call_operand.vmem [shape: bf16[3,192,128], index: 3, kind: input, shape index: {}]   ;;  %s6491_s4 = inlined_call_operand.vmem [shape: f32[1,128], index: 4, kind: input, shape index: {}]   ;;  %s6492_s5 = inlined_call_operand.hbm [shape: f32[2,256,32], index: 5, kind: output, shape index: {0}]   ;;  %s6493_s6 = inlined_call_operand.vmem [shape: f32[2,256,32], index: 6, kind: output, shape index: {1}, may-alias: {2,6}]  }
   0x1   :  { %14 = vsyncpa [#allocation4 + $0x1], 0  ;;  %s4582_s21 = smov 0   ;;  %s4584_s22 = smov 0  }
   0x2   :  { %s4586_s23 = smov 0   ;;  %s4588_s24 = smov 0  }
   0x3 LB: > { %s4603_s25 = sadd.s32 4294967295, %s4538_s24   ;;  %s3641_s26 = sadd.s32 4294967294, %s4538_s24   ;;  %s4538_s24 = sphi %s4588_s24, %s6523_s24   ;;  %s4534_s23 = sphi %s4586_s23, %s6522_s23   ;;  %s4530_s22 = sphi %s4584_s22, %s6521_s22   ;;  %s4526_s21 = sphi %s4582_s21, %s6520_s21  }
   0x4   : > { %s4607_s27 = sadd.s32 1, %s4538_s24   ;;  %s147_s28 = sadd.s32 1, %s4534_s23 }
   0x5   : > { %s144_s29 = ssub.s32 %s4538_s24, %s4607_s27  ;;  %p157_p0 = scmp.ne.s32.totalorder %s4534_s23, %s4530_s22 }
   0x6   : > { %p145_p1 = scmp.eq.s32.totalorder %s144_s29, 0  ;;  %p158_p2 = scmp.eq.s32.totalorder %s4603_s25, 1 }
   0x7   : > { %p163_p3 = scmp.ne.s32.totalorder %s4530_s22, %s4526_s21  ;;  %p164_p4 = scmp.eq.s32.totalorder %s3641_s26, 1 }
   0x8   : > { %s4618_s30 = scalar_select %p145_p1, %s4534_s23, %s147_s28  }
   0x9   : > { %p4620_p5 = por %p158_p2, %p157_p0  ;;  %p4624_p6 = por %p164_p4, %p163_p3 }
   0xa   : > { %p3644_p7 = scmp.ge.s32.totalorder %s4538_s24, 1  ;;  %p238_p8 = scmp.lt.s32.totalorder %s4538_s24, 3 }
   0xc   : > { %p239_p9 = pnand %p3644_p7, %p238_p8 }
   0xe   : > { %242 = sbr.rel (%p239_p9) target bundleno = 1189 (0x4a5), region = 40 }
  0x15   : > { %p283_p10 = scmp.lt.s32.totalorder %s4603_s25, 1  ;;  %v4184_v0 = vld [vmem:[%s6490_s3] sm:$0xff]   ;;  %v6494_v1 = vmov 0   ;;  %v4185_v2 = vld [vmem:[%s6490_s3 + $0x8] sm:$0xff]   ;;  %v4186_v3 = vld [vmem:[%s6490_s3 + $0x10] sm:$0xff]   ;;  %s4541_s20 = smov 32  }
  0x16   : > { %1292 = vmatprep.subr.bf16.mxu1 %v6494_v1  ;;  %1324 = vmatprep.mubr.bf16.mxu1 %v6494_v1  ;;  %v4187_v18 = vld [vmem:[%s6490_s3 + $0x18] sm:$0xff]   ;;  %v4188_v25 = vld [vmem:[%s6490_s3 + $0x20] sm:$0xff]   ;;  %v4189_v32 = vld [vmem:[%s6490_s3 + $0x28] sm:$0xff]   ;;  %vm496_vm0 = vcmask 261120   ;;  %vm561_vm1 = vcmask 1040384   ;;  %vm899_vm2 = vcmask 1045504  }
  0x17   : > { %s284_s11 = scalar_select %p283_p10, %s4603_s25, 1  ;;  %1293 = vmatpush1.bf16.msra.mxu1 %v4184_v0  ;;  %1649 = vmatprep.subr.bf16.mxu0 %v6494_v1  ;;  %v4190_v36 = vld [vmem:[%s6490_s3 + $0x30] sm:$0xff]   ;;  %v4191_v40 = vld [vmem:[%s6490_s3 + $0x38] sm:$0xff]   ;;  %v4192_v44 = vld [vmem:[%s6490_s3 + $0x40] sm:$0xff]   ;;  %vm1012_vm3 = vcmask 523264   ;;  %vm722_vm4 = vcmask 1046528  }
  0x18   : > { %1294 = vmatprep.subr.bf16.mxu1 %v6494_v1  ;;  %v4193_v47 = vld [vmem:[%s6490_s3 + $0x48] sm:$0xff]   ;;  %v4194_v51 = vld [vmem:[%s6490_s3 + $0x50] sm:$0xff]   ;;  %v4195_v56 = vld [vmem:[%s6490_s3 + $0x58] sm:$0xff]   ;;  %s4543_s9 = smov 96   ;;  %s4544_s28 = smov [#allocation3]  }
  0x19   : > { %s4642_s14 = sshll.u32 %s284_s11, 8  ;;  %v4196_v58 = vld [vmem:[%s6490_s3 + $0x60] sm:$0xff]   ;;  %v4197_v59 = vld [vmem:[%s6490_s3 + $0x68] sm:$0xff]   ;;  %v4198_v60 = vld [vmem:[%s6490_s3 + $0x70] sm:$0xff]   ;;  %s4480_s29 = sshll.u32 %s4544_s28, 4  ;;  %s4481_s29 = int_to_ptr.vmem [resolvable:$false] %s4480_s29 }
  0x1a   : > { %s4648_s17 = scalar_lea.vmem %s6488_s1, %s4642_s14  ;;  %1650 = vmatpush1.bf16.msra.mxu0 %v4196_v58  ;;  %v4199_v61 = vld [vmem:[%s6490_s3 + $0x78] sm:$0xff]   ;;  %v4200_v62 = vld [vmem:[%s6490_s3 + $0x80] sm:$0xff]   ;;  %v4201_v63 = vld [vmem:[%s6490_s3 + $0x88] sm:$0xff]   ;;  %s4796_s12 = scalar_lea.vmem %s6487_s0, %s4642_s14 }
  0x1b   : > { %v340_v4 = vld [vmem:[%s4648_s17 + $0x20] sm:$0xff]  ;;  %v341_v5 = vld [vmem:[%s4648_s17 + $0x28] sm:$0xff]  ;;  %1295 = vmatpush1.bf16.msra.mxu1 %v4185_v2  ;;  %v342_v9 = vld [vmem:[%s4648_s17 + $0x30] sm:$0xff]  ;;  %1651 = vmatprep.subr.bf16.mxu0 %v6494_v1  ;;  %s5418_s26 = scalar_lea.vmem %s6489_s2, %s4642_s14  ;;  %s6214_s13 = scalar_lea.vmem %s6493_s6, %s4642_s14 }
  0x1c   : > { %v336_v6 = vld [vmem:[%s4648_s17] sm:$0xff]  ;;  %v4034_v7 = vpack.i.bf16 %v341_v5, %v340_v4  ;;  %v337_v8 = vld [vmem:[%s4648_s17 + $0x8] sm:$0xff]  ;;  %v343_v10 = vld [vmem:[%s4648_s17 + $0x38] sm:$0xff]  ;;  %1296 = vmatprep.subr.bf16.mxu1 %v6494_v1  ;;  %s273_s14 = sand.u32 1, %s4530_s22  }
  0x1d   : > { %v4024_v11 = vpack.i.bf16 %v337_v8, %v336_v6  ;;  %v338_v12 = vld [vmem:[%s4648_s17 + $0x10] sm:$0xff]  ;;  %v339_v13 = vld [vmem:[%s4648_s17 + $0x18] sm:$0xff]  ;;  %v4039_v14 = vpack.i.bf16 %v343_v10, %v342_v9  ;;  %v344_v19 = vld [vmem:[%s4648_s17 + $0x40] sm:$0xff] }
  0x1e   : > { %4035 = vrot.lane.b32.xlu1 %v4034_v7, %s4541_s20  ;;  %v4029_v15 = vpack.i.bf16 %v339_v13, %v338_v12  ;;  %v346_v16 = vld [vmem:[%s4648_s17 + $0x50] sm:$0xff]  ;;  %v347_v17 = vld [vmem:[%s4648_s17 + $0x58] sm:$0xff]  ;;  %v345_v20 = vld [vmem:[%s4648_s17 + $0x48] sm:$0xff]  ;;  %1652 = vmatpush1.bf16.msra.mxu0 %v4197_v59 }
  0x1f   : > { %4025 = vrot.lane.b32.xlu0 %v4024_v11, %s4541_s20  ;;  %1297 = vmatpush1.bf16.msra.mxu1 %v4186_v3  ;;  %v4049_v21 = vpack.i.bf16 %v347_v17, %v346_v16  ;;  %v350_v22 = vld [vmem:[%s4648_s17 + $0x70] sm:$0xff]  ;;  %v351_v23 = vld [vmem:[%s4648_s17 + $0x78] sm:$0xff]  ;;  %v4044_v24 = vpack.i.bf16 %v345_v20, %v344_v19  ;;  %v348_v26 = vld [vmem:[%s4648_s17 + $0x60] sm:$0xff] }
  0x20   : > { %1298 = vmatprep.subr.bf16.mxu1 %v6494_v1  ;;  %v349_v27 = vld [vmem:[%s4648_s17 + $0x68] sm:$0xff]  ;;  %v352_v28 = vld [vmem:[%s4648_s17 + $0x80] sm:$0xff]  ;;  %v4059_v29 = vpack.i.bf16 %v351_v23, %v350_v22  ;;  %v354_v34 = vld [vmem:[%s4648_s17 + $0x90] sm:$0xff]  ;;  %1653 = vmatprep.subr.bf16.mxu0 %v6494_v1 }
  0x21   : > { %v353_v30 = vld [vmem:[%s4648_s17 + $0x88] sm:$0xff]  ;;  %v4054_v31 = vpack.i.bf16 %v349_v27, %v348_v26  ;;  %v355_v35 = vld [vmem:[%s4648_s17 + $0x98] sm:$0xff]  ;;  %v356_v38 = vld [vmem:[%s4648_s17 + $0xa0] sm:$0xff] }
  0x22   : > { %4040 = vrot.lane.b32.xlu1 %v4039_v14, %s4541_s20  ;;  %v4069_v33 = vpack.i.bf16 %v353_v30, %v352_v28  ;;  %v4079_v37 = vpack.i.bf16 %v355_v35, %v354_v34  ;;  %v357_v39 = vld [vmem:[%s4648_s17 + $0xa8] sm:$0xff]  ;;  %v358_v41 = vld [vmem:[%s4648_s17 + $0xb0] sm:$0xff]  ;;  %v359_v43 = vld [vmem:[%s4648_s17 + $0xb8] sm:$0xff]  ;;  %1654 = vmatpush1.bf16.msra.mxu0 %v4198_v60 }
  0x23   : > { %4030 = vrot.lane.b32.xlu0 %v4029_v15, %s4541_s20  ;;  %1299 = vmatpush1.bf16.msra.mxu1 %v4187_v18  ;;  %v4089_v42 = vpack.i.bf16 %v357_v39, %v356_v38  ;;  %v360_v45 = vld [vmem:[%s4648_s17 + $0xc0] sm:$0xff]  ;;  %v361_v46 = vld [vmem:[%s4648_s17 + $0xc8] sm:$0xff]  ;;  %v4099_v48 = vpack.i.bf16 %v359_v43, %v358_v41  ;;  %v362_v49 = vld [vmem:[%s4648_s17 + $0xd0] sm:$0xff] }
  0x24   : > { %1300 = vmatprep.subr.bf16.mxu1 %v6494_v1  ;;  %v363_v50 = vld [vmem:[%s4648_s17 + $0xd8] sm:$0xff]  ;;  %v4109_v52 = vpack.i.bf16 %v361_v46, %v360_v45  ;;  %v364_v53 = vld [vmem:[%s4648_s17 + $0xe0] sm:$0xff]  ;;  %v365_v55 = vld [vmem:[%s4648_s17 + $0xe8] sm:$0xff]  ;;  %1655 = vmatprep.subr.bf16.mxu0 %v6494_v1 }
  0x25   : > { %v4119_v54 = vpack.i.bf16 %v363_v50, %v362_v49  ;;  %v4129_v57 = vpack.i.bf16 %v365_v55, %v364_v53  ;;  %v4202_v0 = vld [vmem:[%s6490_s3 + $0x90] sm:$0xff]   ;;  %v4203_v2 = vld [vmem:[%s6490_s3 + $0x98] sm:$0xff]   ;;  %v4204_v3 = vld [vmem:[%s6490_s3 + $0xa0] sm:$0xff]  }
  0x26   : > { %4050 = vrot.lane.b32.xlu1 %v4049_v21, %s4541_s20  ;;  %1656 = vmatpush1.bf16.msra.mxu0 %v4199_v61  ;;  %v4205_v4 = vld [vmem:[%s6490_s3 + $0xa8] sm:$0xff]   ;;  %v4206_v5 = vld [vmem:[%s6490_s3 + $0xb0] sm:$0xff]   ;;  %v304_v8 = vld [vmem:[%s4796_s12] sm:$0xff] }
  0x27   : > { %4045 = vrot.lane.b32.xlu0 %v4044_v24, %s4541_s20  ;;  %1301 = vmatpush1.bf16.msra.mxu1 %v4188_v25  ;;  %v305_v9 = vld [vmem:[%s4796_s12 + $0x8] sm:$0xff]  ;;  %v308_v23 = vld [vmem:[%s4796_s12 + $0x20] sm:$0xff]  ;;  %v306_v27 = vld [vmem:[%s4796_s12 + $0x10] sm:$0xff] }
  0x28   : > { %1302 = vmatprep.subr.bf16.mxu1 %v6494_v1  ;;  %1657 = vmatprep.subr.bf16.mxu0 %v6494_v1  ;;  %v307_v28 = vld [vmem:[%s4796_s12 + $0x18] sm:$0xff]  ;;  %v309_v30 = vld [vmem:[%s4796_s12 + $0x28] sm:$0xff] }
  0x29   : > { %v311_v39 = vld [vmem:[%s4796_s12 + $0x38] sm:$0xff] }
  0x2a   : > { %4060 = vrot.lane.b32.xlu1 %v4059_v29, %s4541_s20  ;;  %1658 = vmatpush1.bf16.msra.mxu0 %v4200_v62  ;;  %v4207_v29 = vld [vmem:[%s6490_s3 + $0xb8] sm:$0xff]  }
  0x2b   : > { %4055 = vrot.lane.b32.xlu0 %v4054_v31, %s4541_s20  ;;  %1303 = vmatpush1.bf16.msra.mxu1 %v4189_v32  ;;  %v4850_v55 = vld [vmem:[%s4648_s17 + $0xf8] sm:$0xff] }
  0x2c   : > { %1304 = vmatprep.subr.bf16.mxu1 %v6494_v1  ;;  %1659 = vmatprep.subr.bf16.mxu0 %v6494_v1 }
  0x2e   : > { %4070 = vrot.lane.b32.xlu1 %v4069_v33, %s4541_s20  ;;  %1660 = vmatpush1.bf16.msra.mxu0 %v4201_v63 }
  0x2f   : > { %1305 = vmatpush1.bf16.msra.mxu1 %v4190_v36  ;;  %1661 = vmatprep.subr.bf16.mxu0 %v6494_v1 }
  0x30   : > { %1306 = vmatprep.subr.bf16.mxu1 %v6494_v1 }
  0x32   : > { %4080 = vrot.lane.b32.xlu1 %v4079_v37, %s4541_s20  ;;  %1662 = vmatpush1.bf16.msra.mxu0 %v4202_v0  ;;  %v310_v37 = vld [vmem:[%s4796_s12 + $0x30] sm:$0xff] }
  0x33   : > { %1307 = vmatpush1.bf16.msra.mxu1 %v4191_v40  ;;  %1663 = vmatprep.subr.bf16.mxu0 %v6494_v1 }
  0x34   : > { %1308 = vmatprep.subr.bf16.mxu1 %v6494_v1 }
  0x36   : > { %4090 = vrot.lane.b32.xlu1 %v4089_v42, %s4541_s20  ;;  %1664 = vmatpush1.bf16.msra.mxu0 %v4203_v2 }
  0x37   : > { %1309 = vmatpush1.bf16.msra.mxu1 %v4192_v44  ;;  %1665 = vmatprep.subr.bf16.mxu0 %v6494_v1  ;;  %v314_v44 = vld [vmem:[%s4796_s12 + $0x50] sm:$0xff] }
  0x38   : > { %1310 = vmatprep.subr.bf16.mxu1 %v6494_v1 }
  0x3a   : > { %4100 = vrot.lane.b32.xlu1 %v4099_v48, %s4541_s20  ;;  %1666 = vmatpush1.bf16.msra.mxu0 %v4204_v3 }
  0x3b   : > { %1311 = vmatpush1.bf16.msra.mxu1 %v4193_v47  ;;  %1667 = vmatprep.subr.bf16.mxu0 %v6494_v1 }
  0x3c   : > { %1312 = vmatprep.subr.bf16.mxu1 %v6494_v1 }
  0x3e   : > { %4110 = vrot.lane.b32.xlu1 %v4109_v52, %s4541_s20  ;;  %1668 = vmatpush1.bf16.msra.mxu0 %v4205_v4 }
  0x3f   : > { %1313 = vmatpush1.bf16.msra.mxu1 %v4194_v51  ;;  %1669 = vmatprep.subr.bf16.mxu0 %v6494_v1 }
  0x40   : > { %1314 = vmatprep.subr.bf16.mxu1 %v6494_v1 }
  0x42   : > { %4120 = vrot.lane.b32.xlu1 %v4119_v54, %s4541_s20  ;;  %1670 = vmatpush1.bf16.msra.mxu0 %v4206_v5  ;;  %v4847_v54 = vld [vmem:[%s4648_s17 + $0xf0] sm:$0xff]  ;;  %s4542_s17 = smov 64  }
  0x43   : > { %1315 = vmatpush1.bf16.msra.mxu1 %v4195_v56  ;;  %1671 = vmatprep.subr.bf16.mxu0 %v6494_v1 }
  0x44   : > { %3827 = vmatprep.subr.bf16.mxu1 %v6494_v1 }
  0x46   : > { %4130 = vrot.lane.b32.xlu1 %v4129_v57, %s4541_s20  ;;  %1325 = vmatmul.mubr.bf16.vlgmr.msra.gmra.mrb[0].mxu1 %v6494_v1 }
  0x47   : > { %3839 = vmatpush1.bf16.msra.mxu1 %v4196_v58  ;;  %1672 = vmatpush1.bf16.msra.mxu0 %v4207_v29 }
  0x48   : > { %3828 = vmatprep.subr.bf16.mxu1 %v6494_v1  ;;  %2003 = vmatprep.subr.bf16.mxu0 %v6494_v1 }
  0x4b   : > { %3840 = vmatpush1.bf16.msra.mxu1 %v4197_v59 }
  0x4c   : > { %3829 = vmatprep.subr.bf16.mxu1 %v6494_v1 }
  0x4f   : > { %3841 = vmatpush1.bf16.msra.mxu1 %v4198_v60  ;;  %v315_v60 = vld [vmem:[%s4796_s12 + $0x58] sm:$0xff] }
  0x50   : > { %3830 = vmatprep.subr.bf16.mxu1 %v6494_v1 }
  0x53   : > { %3842 = vmatpush1.bf16.msra.mxu1 %v4199_v61 }
  0x54   : > { %3831 = vmatprep.subr.bf16.mxu1 %v6494_v1 }
  0x57   : > { %3843 = vmatpush1.bf16.msra.mxu1 %v4200_v62 }
  0x58   : > { %3832 = vmatprep.subr.bf16.mxu1 %v6494_v1 }
  0x5b   : > { %3844 = vmatpush1.bf16.msra.mxu1 %v4201_v63 }
  0x5c   : > { %3833 = vmatprep.subr.bf16.mxu1 %v6494_v1 }
  0x5f   : > { %3845 = vmatpush1.bf16.msra.mxu1 %v4202_v0 }
  0x60   : > { %3834 = vmatprep.subr.bf16.mxu1 %v6494_v1 }
  0x63   : > { %3846 = vmatpush1.bf16.msra.mxu1 %v4203_v2 }
  0x64   : > { %3835 = vmatprep.subr.bf16.mxu1 %v6494_v1 }
  0x67   : > { %3847 = vmatpush1.bf16.msra.mxu1 %v4204_v3 }
  0x68   : > { %3836 = vmatprep.subr.bf16.mxu1 %v6494_v1 }
  0x6b   : > { %3848 = vmatpush1.bf16.msra.mxu1 %v4205_v4 }
  0x6c   : > { %3837 = vmatprep.subr.bf16.mxu1 %v6494_v1 }
  0x6f   : > { %3849 = vmatpush1.bf16.msra.mxu1 %v4206_v5  ;;  %v318_v5 = vld [vmem:[%s4796_s12 + $0x70] sm:$0xff] }
  0x70   : > { %3838 = vmatprep.subr.bf16.mxu1 %v6494_v1 }
  0x73   : > { %3850 = vmatpush1.bf16.msra.mxu1 %v4207_v29 }
  0x90   : > { %v4036_v6 = vpop.permute.xlu1 %4035 }
  0x91   : > { %v4026_v7 = vpop.permute.xlu0 %4025  ;;  %v4037_v18 = vunpack.i.l.bf16 %v4036_v6  ;;  %v4038_v26 = vunpack.i.h.bf16 %v4036_v6  ;;  %v319_v6 = vld [vmem:[%s4796_s12 + $0x78] sm:$0xff] }
  0x92   : > { %v4028_v10 = vunpack.i.h.bf16 %v4026_v7  ;;  %v4027_v11 = vunpack.i.l.bf16 %v4026_v7  ;;  %v328_v7 = vld [vmem:[%s4796_s12 + $0xc0] sm:$0xff] }
  0x93   : > { %v4824_v35 = vsel %vm496_vm0, %v308_v23, %v4037_v18  ;;  %v4833_v43 = vsel %vm496_vm0, %v309_v30, %v4038_v26 }
  0x94   : > { %v497_v12 = vsel %vm496_vm0, %v304_v8, %v4027_v11  ;;  %v498_v13 = vsel %vm496_vm0, %v305_v9, %v4028_v10  ;;  %v4041_v14 = vpop.permute.xlu1 %4040  ;;  %v568_v45 = vrot.slane %v4824_v35, 7  ;;  %v569_v56 = vrot.slane %v4833_v43, 7  ;;  %v313_v43 = vld [vmem:[%s4796_s12 + $0x48] sm:$0xff] }
  0x95   : > { %v562_v15 = vrot.slane %v497_v12, 7  ;;  %v563_v16 = vrot.slane %v498_v13, 7  ;;  %v4031_v17 = vpop.permute.xlu0 %4030  ;;  %v4042_v33 = vunpack.i.l.bf16 %v4041_v14  ;;  %v4043_v36 = vunpack.i.h.bf16 %v4041_v14 }
  0x96   : > { %v4033_v24 = vunpack.i.h.bf16 %v4031_v17  ;;  %v4032_v25 = vunpack.i.l.bf16 %v4031_v17  ;;  %v4863_v2 = vsel %vm561_vm1, 0.0, %v568_v45  ;;  %v4888_v18 = vsel %vm561_vm1, %v569_v56, 0.0 }
  0x97   : > { %v4803_v19 = vsel %vm561_vm1, %v562_v15, %v563_v16  ;;  %v4806_v20 = vsel %vm561_vm1, 0.0, %v562_v15  ;;  %v4809_v21 = vsel %vm561_vm1, %v563_v16, 0.0  ;;  %v4838_v46 = vsel %vm496_vm0, %v310_v37, %v4042_v33  ;;  %v312_v33 = vld [vmem:[%s4796_s12 + $0x40] sm:$0xff] }
  0x98   : > { %v4811_v22 = vpop.permute.xlu1 %4050  ;;  %v900_v31 = vrot.slane %v4806_v20, 2  ;;  %v903_v32 = vrot.slane %v4809_v21, 2  ;;  %v901_v34 = vrot.slane %v4803_v19, 2  ;;  %v499_v40 = vsel %vm496_vm0, %v306_v27, %v4032_v25  ;;  %v321_v25 = vld [vmem:[%s4796_s12 + $0x88] sm:$0xff] }
  0x99   : > { %v500_v41 = vsel %vm496_vm0, %v307_v28, %v4033_v24  ;;  %v4052_v42 = vunpack.i.l.bf16 %v4811_v22  ;;  %v4843_v49 = vsel %vm496_vm0, %v311_v39, %v4043_v36  ;;  %v565_v50 = vrot.slane %v499_v40, 7  ;;  %v4046_v12 = vpop.permute.xlu0 %4045  ;;  %v320_v24 = vld [vmem:[%s4796_s12 + $0x80] sm:$0xff] }
  0x9a   : > { %v902_v47 = vsel %vm899_vm2, %v900_v31, %v901_v34  ;;  %v904_v48 = vsel %vm899_vm2, %v901_v34, %v903_v32  ;;  %v566_v51 = vrot.slane %v500_v41, 7  ;;  %v723_v52 = vrot.slane %v4806_v20, 1 }
  0x9b   : > { %v4053_v57 = vunpack.i.h.bf16 %v4811_v22  ;;  %v4855_v58 = vsel %vm496_vm0, %v314_v44, %v4052_v42  ;;  %v1046_v59 = vpack.c.bf16 %v904_v48, %v902_v47  ;;  %v724_v63 = vrot.slane %v4803_v19, 1 }
  0x9c   : > { %v4061_v38 = vpop.permute.xlu1 %4060  ;;  %v726_v0 = vrot.slane %v4809_v21, 1  ;;  %v571_v3 = vrot.slane %v4838_v46, 7  ;;  %v572_v4 = vrot.slane %v4843_v49, 7  ;;  %v4874_v8 = vsel %vm561_vm1, 0.0, %v565_v50 }
  0x9d   : > { %v4063_v61 = vunpack.i.h.bf16 %v4061_v38  ;;  %v4062_v62 = vunpack.i.l.bf16 %v4061_v38  ;;  %3667 = vmatprep.mubr.msk.bf16.mxu1 %vm1012_vm3, %v1046_v59  ;;  %3718 = vmatprep.mubr.msk.bf16.mxu0 %vm1012_vm3, %v1046_v59  ;;  %v4877_v9 = vsel %vm561_vm1, %v566_v51, 0.0  ;;  %v725_v10 = vsel %vm722_vm4, %v723_v52, %v724_v63 }
  0x9e   : > { %v727_v11 = vsel %vm722_vm4, %v724_v63, %v726_v0  ;;  %v4884_v14 = vsel %vm496_vm0, %v315_v60, %v4053_v57  ;;  %v577_v15 = vrot.slane %v4855_v58, 7  ;;  %v4047_v26 = vunpack.i.l.bf16 %v4046_v12  ;;  %v325_v0 = vld [vmem:[%s4796_s12 + $0xa8] sm:$0xff] }
  0x9f   : > { %v4064_v16 = vpack.i.bf16 %v727_v11, %v725_v10  ;;  %v4891_v21 = vsel %vm496_vm0, %v318_v5, %v4062_v62  ;;  %v4894_v22 = vsel %vm496_vm0, %v319_v6, %v4063_v61  ;;  %v4900_v27 = vsel %vm561_vm1, %v565_v50, %v566_v51  ;;  %v323_v6 = vld [vmem:[%s4796_s12 + $0x98] sm:$0xff] }
  0xa0   : > { %v4071_v53 = vpop.permute.xlu1 %4070  ;;  %v728_v28 = vrot.slane %v4874_v8, 1  ;;  %v731_v29 = vrot.slane %v4877_v9, 1  ;;  %v4907_v30 = vsel %vm561_vm1, 0.0, %v571_v3  ;;  %v4912_v31 = vsel %vm561_vm1, %v572_v4, 0.0 }
  0xa1   : > { %v4072_v17 = vunpack.i.l.bf16 %v4071_v53  ;;  %v4073_v23 = vunpack.i.h.bf16 %v4071_v53  ;;  %4065 = vrot.lane.b32.xlu0 %v4064_v16, %s4542_s17  ;;  %v578_v32 = vrot.slane %v4884_v14, 7  ;;  %v729_v34 = vrot.slane %v4900_v27, 1  ;;  %v4056_v53 = vpop.permute.xlu0 %4055 }
  0xa2   : > { %v4920_v36 = vsel %vm561_vm1, 0.0, %v577_v15  ;;  %v583_v37 = vrot.slane %v4891_v21, 7  ;;  %v4048_v39 = vunpack.i.h.bf16 %v4046_v12  ;;  %v584_v41 = vrot.slane %v4894_v22, 7 }
  0xa3   : > { %v4924_v38 = vsel %vm496_vm0, %v320_v24, %v4072_v17  ;;  %v514_v42 = vsel %vm496_vm0, %v321_v25, %v4073_v23  ;;  %v730_v44 = vsel %vm722_vm4, %v728_v28, %v729_v34  ;;  %v732_v47 = vsel %vm722_vm4, %v729_v34, %v731_v29  ;;  %v322_v24 = vld [vmem:[%s4796_s12 + $0x90] sm:$0xff]  ;;  %v316_v25 = vld [vmem:[%s4796_s12 + $0x60] sm:$0xff] }
  0xa4   : > { %v4881_v13 = vpop.permute.xlu1 %4080  ;;  %v4932_v48 = vsel %vm496_vm0, %v312_v33, %v4047_v26  ;;  %v4074_v50 = vpack.i.bf16 %v732_v47, %v730_v44  ;;  %v4937_v51 = vsel %vm561_vm1, %v568_v45, %v569_v56  ;;  %v733_v52 = vrot.slane %v4863_v2, 1  ;;  %v324_v56 = vld [vmem:[%s4796_s12 + $0xa0] sm:$0xff]  ;;  %v317_v26 = vld [vmem:[%s4796_s12 + $0x68] sm:$0xff] }
  0xa5   : > { %v586_v57 = vrot.slane %v4924_v38, 7  ;;  %v734_v59 = vrot.slane %v4937_v51, 1  ;;  %v736_v60 = vrot.slane %v4888_v18, 1  ;;  %v587_v62 = vrot.slane %v514_v42, 7 }
  0xa6   : > { %v506_v63 = vsel %vm496_vm0, %v313_v43, %v4048_v39  ;;  %4075 = vrot.lane.b32.xlu0 %v4074_v50, %s4542_s17  ;;  %v4083_v35 = vunpack.i.h.bf16 %v4881_v13  ;;  %v4082_v5 = vunpack.i.l.bf16 %v4881_v13  ;;  %v4058_v12 = vunpack.i.h.bf16 %v4056_v53 }
  0xa7   : > { %v735_v10 = vsel %vm722_vm4, %v733_v52, %v734_v59  ;;  %v737_v11 = vsel %vm722_vm4, %v734_v59, %v736_v60  ;;  %v4955_v16 = vsel %vm561_vm1, %v578_v32, 0.0  ;;  %v4960_v17 = vsel %vm561_vm1, 0.0, %v583_v37 }
  0xa8   : > { %v4091_v40 = vpop.permute.xlu1 %4090  ;;  %v574_v23 = vrot.slane %v4932_v48, 7  ;;  %v4084_v13 = vpack.i.bf16 %v737_v11, %v735_v10  ;;  %v575_v28 = vrot.slane %v506_v63, 7  ;;  %v4057_v34 = vunpack.i.l.bf16 %v4056_v53 }
  0xa9   : > { %v4093_v61 = vunpack.i.h.bf16 %v4091_v40  ;;  %v4092_v45 = vunpack.i.l.bf16 %v4091_v40  ;;  %v4975_v38 = vsel %vm561_vm1, %v584_v41, 0.0  ;;  %v4978_v39 = vsel %vm561_vm1, 0.0, %v586_v57 }
  0xaa   : > { %v4981_v40 = vsel %vm496_vm0, %v323_v6, %v4083_v35  ;;  %4085 = vrot.lane.b32.xlu0 %v4084_v13, %s4542_s17  ;;  %v4989_v42 = vsel %vm561_vm1, %v571_v3, %v572_v4  ;;  %v4992_v43 = vsel %vm561_vm1, %v587_v62, 0.0  ;;  %v4995_v44 = vsel %vm496_vm0, %v322_v24, %v4082_v5  ;;  %v326_v24 = vld [vmem:[%s4796_s12 + $0xb0] sm:$0xff]  ;;  %v327_v13 = vld [vmem:[%s4796_s12 + $0xb8] sm:$0xff] }
  0xab   : > { %v4967_v29 = vsel %vm496_vm0, %v324_v56, %v4092_v45  ;;  %v4970_v33 = vsel %vm496_vm0, %v325_v0, %v4093_v61  ;;  %v4998_v47 = vsel %vm496_vm0, %v316_v25, %v4057_v34  ;;  %v5001_v48 = vsel %vm496_vm0, %v317_v26, %v4058_v12 }
  0xac   : > { %v4101_v50 = vpop.permute.xlu1 %4100  ;;  %v592_v49 = vrot.slane %v4967_v29, 7  ;;  %v593_v46 = vrot.slane %v4970_v33, 7  ;;  %v738_v3 = vrot.slane %v4907_v30, 1  ;;  %v739_v4 = vrot.slane %v4989_v42, 1 }
  0xad   : > { %v5008_v52 = vsel %vm561_vm1, 0.0, %v574_v23  ;;  %v5011_v53 = vsel %vm561_vm1, %v575_v28, 0.0  ;;  %v741_v60 = vrot.slane %v4912_v31, 1  ;;  %v580_v61 = vrot.slane %v4998_v47, 7 }
  0xae   : > { %v581_v63 = vrot.slane %v5001_v48, 7  ;;  %v740_v35 = vsel %vm722_vm4, %v738_v3, %v739_v4  ;;  %v5019_v45 = vsel %vm561_vm1, %v586_v57, %v587_v62  ;;  %v4103_v5 = vunpack.i.h.bf16 %v4101_v50 }
  0xaf   : > { %v742_v0 = vsel %vm722_vm4, %v739_v4, %v741_v60  ;;  %v4102_v6 = vunpack.i.l.bf16 %v4101_v50  ;;  %v5024_v10 = vsel %vm561_vm1, 0.0, %v592_v49  ;;  %v5027_v11 = vsel %vm561_vm1, %v593_v46, 0.0  ;;  %v329_v60 = vld [vmem:[%s4796_s12 + $0xc8] sm:$0xff] }
  0xb0   : > { %v4094_v12 = vpack.i.bf16 %v742_v0, %v740_v35  ;;  %v763_v25 = vrot.slane %v4978_v39, 1  ;;  %v764_v57 = vrot.slane %v5019_v45, 1  ;;  %v766_v62 = vrot.slane %v4992_v43, 1  ;;  %v4111_v33 = vpop.permute.xlu1 %4110 }
  0xb1   : > { %v5035_v26 = vsel %vm561_vm1, %v574_v23, %v575_v28  ;;  %v743_v29 = vrot.slane %v5008_v52, 1  ;;  %v5039_v34 = vsel %vm561_vm1, 0.0, %v580_v61  ;;  %v5042_v47 = vsel %vm561_vm1, %v581_v63, 0.0 }
  0xb2   : > { %4095 = vrot.lane.b32.xlu0 %v4094_v12, %s4542_s17  ;;  %v744_v48 = vrot.slane %v5035_v26, 1  ;;  %v746_v50 = vrot.slane %v5011_v53, 1  ;;  %v5048_v3 = vsel %vm496_vm0, %v326_v24, %v4102_v6  ;;  %v5051_v23 = vsel %vm496_vm0, %v327_v13, %v4103_v5 }
  0xb3   : > { %v765_v28 = vsel %vm722_vm4, %v763_v25, %v764_v57  ;;  %v767_v4 = vsel %vm722_vm4, %v764_v57, %v766_v62  ;;  %v4113_v1 = vunpack.i.h.bf16 %v4111_v33  ;;  %v4112_v56 = vunpack.i.l.bf16 %v4111_v33 }
  0xb4   : > { %v4139_v35 = vpack.i.bf16 %v767_v4, %v765_v28  ;;  %v745_v0 = vsel %vm722_vm4, %v743_v29, %v744_v48  ;;  %v747_v12 = vsel %vm722_vm4, %v744_v48, %v746_v50  ;;  %v5064_v5 = vsel %vm561_vm1, %v577_v15, %v578_v32  ;;  %v4121_v24 = vpop.permute.xlu1 %4120 }
  0xb5   : > { %v4104_v59 = vpack.i.bf16 %v747_v12, %v745_v0  ;;  %v748_v6 = vrot.slane %v4920_v36, 1  ;;  %v522_v13 = vsel %vm496_vm0, %v329_v60, %v4113_v1  ;;  %v749_v25 = vrot.slane %v5064_v5, 1 }
  0xb6   : > { %4140 = vrot.lane.b32.xlu1 %v4139_v35, %s4542_s17  ;;  %v751_v57 = vrot.slane %v4955_v16, 1  ;;  %v5072_v62 = vsel %vm561_vm1, %v592_v49, %v593_v46  ;;  %v521_v58 = vsel %vm496_vm0, %v328_v7, %v4112_v56  ;;  %v599_v14 = vrot.slane %v522_v13, 7 }
  0xb7   : > { %4105 = vrot.lane.b32.xlu0 %v4104_v59, %s4542_s17  ;;  %v773_v15 = vrot.slane %v5024_v10, 1  ;;  %v774_v32 = vrot.slane %v5072_v62, 1  ;;  %v598_v29 = vrot.slane %v521_v58, 7  ;;  %v750_v33 = vsel %vm722_vm4, %v748_v6, %v749_v25 }
  0xb8   : > { %v752_v1 = vsel %vm722_vm4, %v749_v25, %v751_v57  ;;  %v776_v48 = vrot.slane %v5027_v11, 1  ;;  %v595_v49 = vrot.slane %v5048_v3, 7  ;;  %v5084_v7 = vsel %vm561_vm1, %v580_v61, %v581_v63  ;;  %v330_v63 = vld [vmem:[%s4796_s12 + $0xd0] sm:$0xff]  ;;  %v4131_v0 = vpop.permute.xlu1 %4130 }
  0xb9   : > { %v4114_v46 = vpack.i.bf16 %v752_v1, %v750_v33  ;;  %v775_v59 = vsel %vm722_vm4, %v773_v15, %v774_v32  ;;  %v596_v56 = vrot.slane %v5051_v23, 7  ;;  %v5088_v50 = vsel %vm561_vm1, %v599_v14, 0.0  ;;  %v331_v23 = vld [vmem:[%s4796_s12 + $0xd8] sm:$0xff] }
  0xba   : > { %v777_v28 = vsel %vm722_vm4, %v774_v32, %v776_v48  ;;  %v753_v4 = vrot.slane %v5039_v34, 1  ;;  %v5093_v60 = vsel %vm561_vm1, 0.0, %v598_v29  ;;  %v754_v35 = vrot.slane %v5084_v7, 1  ;;  %v333_v32 = vld [vmem:[%s4796_s12 + $0xe8] sm:$0xff] }
  0xbb   : > { %4115 = vrot.lane.b32.xlu0 %v4114_v46, %s4542_s17  ;;  %v4149_v3 = vpack.i.bf16 %v777_v28, %v775_v59  ;;  %v756_v61 = vrot.slane %v5042_v47, 1  ;;  %v4123_v12 = vunpack.i.h.bf16 %v4121_v24  ;;  %v4122_v6 = vunpack.i.l.bf16 %v4121_v24  ;;  %v332_v59 = vld [vmem:[%s4796_s12 + $0xe0] sm:$0xff] }
  0xbc   : > { %v5105_v13 = vsel %vm561_vm1, %v583_v37, %v584_v41  ;;  %v758_v25 = vrot.slane %v4960_v17, 1  ;;  %v755_v57 = vsel %vm722_vm4, %v753_v4, %v754_v35  ;;  %v761_v24 = vrot.slane %v4975_v38, 1 }
  0xbd   : > { %4150 = vrot.lane.b32.xlu1 %v4149_v3, %s4542_s17  ;;  %v757_v58 = vsel %vm722_vm4, %v754_v35, %v756_v61  ;;  %v759_v15 = vrot.slane %v5105_v13, 1  ;;  %v523_v21 = vsel %vm496_vm0, %v330_v63, %v4122_v6  ;;  %v524_v37 = vsel %vm496_vm0, %v331_v23, %v4123_v12 }
  0xbe   : > { %v4124_v22 = vpack.i.bf16 %v757_v58, %v755_v57  ;;  %v4133_v41 = vunpack.i.h.bf16 %v4131_v0  ;;  %v601_v33 = vrot.slane %v523_v21, 7  ;;  %v602_v1 = vrot.slane %v524_v37, 7 }
  0xbf   : > { %v760_v48 = vsel %vm722_vm4, %v758_v25, %v759_v15  ;;  %v762_v46 = vsel %vm722_vm4, %v759_v15, %v761_v24  ;;  %v4132_v4 = vunpack.i.l.bf16 %v4131_v0  ;;  %v5122_v35 = vsel %vm561_vm1, %v598_v29, %v599_v14 }
  0xc0   : > { %4125 = vrot.lane.b32.xlu0 %v4124_v22, %s4542_s17  ;;  %v4134_v28 = vpack.i.bf16 %v762_v46, %v760_v48  ;;  %v526_v3 = vsel %vm496_vm0, %v333_v32, %v4133_v41  ;;  %v6498_v61 = vrot.slane %v4995_v44, 7  ;;  %v6499_v23 = vrot.slane %v4981_v40, 7 }
  0xc1   : > { %v605_v6 = vrot.slane %v526_v3, 7  ;;  %v783_v25 = vrot.slane %v5093_v60, 1  ;;  %v5136_v0 = vsel %vm561_vm1, 0.0, %v595_v49  ;;  %v5139_v57 = vsel %vm561_vm1, %v596_v56, 0.0 }
  0xc2   : > { %v5127_v63 = vsel %vm561_vm1, 0.0, %v6498_v61  ;;  %v5132_v12 = vsel %vm561_vm1, %v6499_v23, 0.0  ;;  %v525_v14 = vsel %vm496_vm0, %v332_v59, %v4132_v4  ;;  %v784_v29 = vrot.slane %v5122_v35, 1 }
  0xc3   : > { %v5144_v58 = vsel %vm561_vm1, 0.0, %v601_v33  ;;  %v604_v15 = vrot.slane %v525_v14, 7  ;;  %v786_v24 = vrot.slane %v5088_v50, 1  ;;  %v6500_v32 = vmov %v6499_v23 }
  0xc4   : > { %v6501_v22 = vmov %v6498_v61  ;;  %v5155_v37 = vsel %vm561_vm1, %v602_v1, 0.0  ;;  %4135 = vrot.lane.b32.xlu0 %v4134_v28, %s4542_s17  ;;  %v785_v41 = vsel %vm722_vm4, %v783_v25, %v784_v29  ;;  %v768_v48 = vrot.slane %v5127_v63, 1 }
  0xc5   : > { %v5152_v21 = vsel %vm561_vm1, %v6501_v22, %v6500_v32  ;;  %v5162_v59 = vsel %vm561_vm1, %v605_v6, 0.0  ;;  %v787_v40 = vsel %vm722_vm4, %v784_v29, %v786_v24  ;;  %v771_v44 = vrot.slane %v5132_v12, 1 }
  0xc6   : > { %v769_v46 = vrot.slane %v5152_v21, 1  ;;  %v5167_v4 = vsel %vm561_vm1, %v595_v49, %v596_v56  ;;  %v5170_v3 = vsel %vm561_vm1, 0.0, %v604_v15  ;;  %v4159_v28 = vpack.i.bf16 %v787_v40, %v785_v41 }
  0xc7   : > { %v778_v23 = vrot.slane %v5136_v0, 1  ;;  %v779_v14 = vrot.slane %v5167_v4, 1  ;;  %v781_v32 = vrot.slane %v5139_v57, 1  ;;  %v5178_v29 = vsel %vm561_vm1, %v601_v33, %v602_v1 }
  0xc8   : > { %v770_v61 = vsel %vm722_vm4, %v768_v48, %v769_v46  ;;  %v772_v25 = vsel %vm722_vm4, %v769_v46, %v771_v44  ;;  %4160 = vrot.lane.b32.xlu1 %v4159_v28, %s4542_s17  ;;  %v788_v56 = vrot.slane %v5144_v58, 1  ;;  %v789_v24 = vrot.slane %v5178_v29, 1 }
  0xc9   : > { %v4144_v49 = vpack.i.bf16 %v772_v25, %v770_v61  ;;  %v791_v22 = vrot.slane %v5155_v37, 1  ;;  %v780_v41 = vsel %vm722_vm4, %v778_v23, %v779_v14  ;;  %v782_v48 = vsel %vm722_vm4, %v779_v14, %v781_v32 }
  0xca   : > { %v5187_v46 = vsel %vm561_vm1, %v604_v15, %v605_v6  ;;  %v4154_v33 = vpack.i.bf16 %v782_v48, %v780_v41  ;;  %v793_v1 = vrot.slane %v5170_v3, 1  ;;  %v790_v40 = vsel %vm722_vm4, %v788_v56, %v789_v24 }
  0xcb   : > { %4145 = vrot.lane.b32.xlu0 %v4144_v49, %s4542_s17  ;;  %v792_v44 = vsel %vm722_vm4, %v789_v24, %v791_v22  ;;  %v794_v28 = vrot.slane %v5187_v46, 1  ;;  %v796_v61 = vrot.slane %v5162_v59, 1  ;;  %v6502_v23 = vpack.i.bf16 %v4850_v55, %v4847_v54 }
  0xcc   : > { %v4164_v6 = vpack.i.bf16 %v792_v44, %v790_v40  ;;  %v905_v32 = vrot.slane %v4874_v8, 2  ;;  %v908_v49 = vrot.slane %v4877_v9, 2  ;;  %v906_v56 = vrot.slane %v4900_v27, 2 }
  0xcd   : > { %4170 = vrot.lane.b32.xlu1 %v6502_v23, %s4541_s20  ;;  %v795_v15 = vsel %vm722_vm4, %v793_v1, %v794_v28  ;;  %v797_v25 = vsel %vm722_vm4, %v794_v28, %v796_v61  ;;  %v4208_v1 = vld [vmem:[%s6490_s3 + $0xc0] sm:$0xff]   ;;  %v910_v44 = vrot.slane %v4863_v2, 2  ;;  %v913_v28 = vrot.slane %v4888_v18, 2 }
  0xce   : > { %v4174_v14 = vpack.i.bf16 %v797_v25, %v795_v15  ;;  %v907_v22 = vsel %vm899_vm2, %v905_v32, %v906_v56  ;;  %v909_v41 = vsel %vm899_vm2, %v906_v56, %v908_v49  ;;  %v911_v23 = vrot.slane %v4937_v51, 2 }
  0xcf   : > { %4155 = vrot.lane.b32.xlu0 %v4154_v33, %s4542_s17  ;;  %v5216_v40 = vpack.c.bf16 %v909_v41, %v907_v22  ;;  %v6503_v15 = vmov 0   ;;  %v918_v22 = vrot.slane %v4912_v31, 2  ;;  %v916_v41 = vrot.slane %v4989_v42, 2 }
  0xd0   : > { %v912_v32 = vsel %vm899_vm2, %v910_v44, %v911_v23  ;;  %v914_v49 = vsel %vm899_vm2, %v911_v23, %v913_v28 }
  0xd1   : > { %v919_v44 = vsel %vm899_vm2, %v916_v41, %v918_v22  ;;  %v928_v22 = vrot.slane %v4955_v16, 2 }
  0xd3   : > { %4165 = vrot.lane.b32.xlu0 %v4164_v6, %s4542_s17 }
  0xd7   : > { %4175 = vrot.lane.b32.xlu0 %v4174_v14, %s4542_s17 }
 0x113   : > { %v4066_v54 = vpop.permute.xlu0 %4065 }
 0x114   : > { %v4068_v55 = vunpack.i.h.bf16 %v4066_v54  ;;  %v4067_v24 = vunpack.i.l.bf16 %v4066_v54  ;;  %v4210_v54 = vld [vmem:[%s6490_s3 + $0xd0] sm:$0xff]  }
 0x116   : > { %v1013_v48 = vsel %vm1012_vm3, %v4806_v20, %v4067_v24  ;;  %v1014_v33 = vsel %vm1012_vm3, %v4803_v19, %v4068_v55  ;;  %v4209_v19 = vld [vmem:[%s6490_s3 + $0xc8] sm:$0xff]  }
 0x117   : > { %v1045_v9 = vpack.c.bf16 %v1014_v33, %v1013_v48  ;;  %v4211_v48 = vld [vmem:[%s6490_s3 + $0xd8] sm:$0xff]  }
 0x118   : > { %v4076_v61 = vpop.permute.xlu0 %4075 }
 0x119   : > { %1333 = vmatmul.mubr.bf16.gmra.mrb[4].mxu1 %v1045_v9  ;;  %1682 = vmatmul.mubr.bf16.vlgmr.msra.gmra.mrb[0].mxu0 %v1045_v9  ;;  %v4078_v20 = vunpack.i.h.bf16 %v4076_v61  ;;  %v4077_v6 = vunpack.i.l.bf16 %v4076_v61  ;;  %v4212_v61 = vld [vmem:[%s6490_s3 + $0xe0] sm:$0xff]  }
 0x11a   : > { %2004 = vmatpush1.bf16.msra.mxu0 %v4208_v1  ;;  %3668 = vmatprep.mubr.msk.bf16.mxu1 %vm1012_vm3, %v5216_v40 }
 0x11b   : > { %3719 = vmatprep.mubr.msk.bf16.mxu0 %vm1012_vm3, %v5216_v40  ;;  %2005 = vmatprep.subr.bf16.mxu0 %v6503_v15  ;;  %v1015_v18 = vsel %vm1012_vm3, %v4874_v8, %v4077_v6  ;;  %v1016_v25 = vsel %vm1012_vm3, %v4900_v27, %v4078_v20  ;;  %v5241_v8 = vpack.c.bf16 %v914_v49, %v912_v32  ;;  %v915_v27 = vrot.slane %v4907_v30, 2 }
 0x11c   : > { %v4086_v14 = vpop.permute.xlu0 %4085  ;;  %v5235_v56 = vpack.c.bf16 %v1016_v25, %v1015_v18  ;;  %v4213_v18 = vld [vmem:[%s6490_s3 + $0xe8] sm:$0xff]  }
 0x11d   : > { %v4088_v55 = vunpack.i.h.bf16 %v4086_v14  ;;  %v4087_v24 = vunpack.i.l.bf16 %v4086_v14  ;;  %v917_v9 = vsel %vm899_vm2, %v915_v27, %v916_v41  ;;  %v926_v41 = vrot.slane %v5064_v5, 2 }
 0x11e   : > { %2006 = vmatpush1.bf16.msra.mxu0 %v4209_v19  ;;  %v5267_v6 = vpack.c.bf16 %v919_v44, %v917_v9  ;;  %v921_v19 = vrot.slane %v5035_v26, 2 }
 0x11f   : > { %2007 = vmatprep.subr.bf16.mxu0 %v6503_v15  ;;  %v1017_v31 = vsel %vm1012_vm3, %v4863_v2, %v4087_v24  ;;  %v1018_v33 = vsel %vm1012_vm3, %v4937_v51, %v4088_v55  ;;  %v920_v2 = vrot.slane %v5008_v52, 2  ;;  %v923_v51 = vrot.slane %v5011_v53, 2  ;;  %v4214_v55 = vld [vmem:[%s6490_s3 + $0xf0] sm:$0xff]  }
 0x120   : > { %v5262_v28 = vpack.c.bf16 %v1018_v33, %v1017_v31  ;;  %v4215_v31 = vld [vmem:[%s6490_s3 + $0xf8] sm:$0xff]   ;;  %v929_v44 = vsel %vm899_vm2, %v926_v41, %v928_v22 }
 0x121   : > { %1341 = vmatmul.mubr.bf16.gmra.mrb[8].mxu1 %v5235_v56  ;;  %1690 = vmatmul.mubr.bf16.gmra.mrb[4].mxu0 %v5235_v56  ;;  %v922_v32 = vsel %vm899_vm2, %v920_v2, %v921_v19  ;;  %v924_v49 = vsel %vm899_vm2, %v921_v19, %v923_v51 }
 0x122   : > { %3669 = vmatprep.mubr.msk.bf16.mxu1 %vm1012_vm3, %v5241_v8  ;;  %3720 = vmatprep.mubr.msk.bf16.mxu0 %vm1012_vm3, %v5241_v8 }
 0x123   : > { %2008 = vmatpush1.bf16.msra.mxu0 %v4210_v54 }
 0x124   : > { %2009 = vmatprep.subr.bf16.mxu0 %v6503_v15  ;;  %v4096_v1 = vpop.permute.xlu0 %4095 }
 0x125   : > { %v4098_v23 = vunpack.i.h.bf16 %v4096_v1  ;;  %v4097_v20 = vunpack.i.l.bf16 %v4096_v1 }
 0x127   : > { %2010 = vmatpush1.bf16.msra.mxu0 %v4211_v48  ;;  %v1019_v53 = vsel %vm1012_vm3, %v4907_v30, %v4097_v20  ;;  %v1020_v25 = vsel %vm1012_vm3, %v4989_v42, %v4098_v23  ;;  %v5294_v30 = vpack.c.bf16 %v924_v49, %v922_v32  ;;  %v925_v42 = vrot.slane %v4920_v36, 2 }
 0x128   : > { %2011 = vmatprep.subr.bf16.mxu0 %v6503_v15  ;;  %v5289_v54 = vpack.c.bf16 %v1020_v25, %v1019_v53  ;;  %v5306_v48 = vpop.permute.xlu1 %4140  ;;  %v933_v23 = vrot.slane %v5042_v47, 2  ;;  %v4217_v53 = vld [vmem:[%s6490_s3 + $0x108] sm:$0xff]  }
 0x129   : > { %1349 = vmatmul.mubr.bf16.gmra.mrb[12].mxu1 %v5262_v28  ;;  %1698 = vmatmul.mubr.bf16.gmra.mrb[8].mxu0 %v5262_v28  ;;  %v4106_v14 = vpop.permute.xlu0 %4105  ;;  %v927_v9 = vsel %vm899_vm2, %v925_v42, %v926_v41  ;;  %v335_v42 = vld [vmem:[%s4796_s12 + $0xf8] sm:$0xff] }
 0x12a   : > { %3670 = vmatprep.mubr.msk.bf16.mxu1 %vm1012_vm3, %v5267_v6  ;;  %3721 = vmatprep.mubr.msk.bf16.mxu0 %vm1012_vm3, %v5267_v6  ;;  %v4108_v24 = vunpack.i.h.bf16 %v4106_v14  ;;  %v4107_v27 = vunpack.i.l.bf16 %v4106_v14  ;;  %v5327_v19 = vpack.c.bf16 %v929_v44, %v927_v9  ;;  %v938_v44 = vrot.slane %v4975_v38, 2  ;;  %v4219_v38 = vld [vmem:[%s6490_s3 + $0x118] sm:$0xff]  }
 0x12b   : > { %2012 = vmatpush1.bf16.msra.mxu0 %v4212_v61  ;;  %v930_v61 = vrot.slane %v5039_v34, 2 }
 0x12c   : > { %2013 = vmatprep.subr.bf16.mxu0 %v6503_v15  ;;  %v1021_v16 = vsel %vm1012_vm3, %v5008_v52, %v4107_v27  ;;  %v1022_v33 = vsel %vm1012_vm3, %v5035_v26, %v4108_v24  ;;  %v4216_v52 = vld [vmem:[%s6490_s3 + $0x100] sm:$0xff]   ;;  %v935_v24 = vrot.slane %v4960_v17, 2  ;;  %v334_v27 = vld [vmem:[%s4796_s12 + $0xf0] sm:$0xff] }
 0x12d   : > { %v4116_v1 = vpop.permute.xlu0 %4115  ;;  %v5322_v2 = vpack.c.bf16 %v1022_v33, %v1021_v16 }
 0x12e   : > { %v4118_v26 = vunpack.i.h.bf16 %v4116_v1  ;;  %v4117_v51 = vunpack.i.l.bf16 %v4116_v1 }
 0x12f   : > { %2014 = vmatpush1.bf16.msra.mxu0 %v4213_v18  ;;  %v5320_v20 = vpop.permute.xlu1 %4150  ;;  %v931_v18 = vrot.slane %v5084_v7, 2 }
 0x130   : > { %2015 = vmatprep.subr.bf16.mxu0 %v6503_v15  ;;  %v1023_v25 = vsel %vm1012_vm3, %v4920_v36, %v4117_v51  ;;  %v1024_v14 = vsel %vm1012_vm3, %v5064_v5, %v4118_v26  ;;  %v936_v36 = vrot.slane %v5105_v13, 2  ;;  %v4218_v5 = vld [vmem:[%s6490_s3 + $0x110] sm:$0xff]  }
 0x131   : > { %1357 = vmatmul.mubr.bf16.gmra.mrb[16].mxu1 %v5289_v54  ;;  %1706 = vmatmul.mubr.bf16.gmra.mrb[12].mxu0 %v5289_v54  ;;  %v932_v32 = vsel %vm899_vm2, %v930_v61, %v931_v18  ;;  %v934_v49 = vsel %vm899_vm2, %v931_v18, %v933_v23  ;;  %v5352_v41 = vpack.c.bf16 %v1024_v14, %v1023_v25 }
 0x132   : > { %3671 = vmatprep.mubr.msk.bf16.mxu1 %vm1012_vm3, %v5294_v30  ;;  %3722 = vmatprep.mubr.msk.bf16.mxu0 %vm1012_vm3, %v5294_v30 }
 0x133   : > { %2016 = vmatpush1.bf16.msra.mxu0 %v4214_v55  ;;  %v4126_v55 = vpop.permute.xlu0 %4125 }
 0x134   : > { %2017 = vmatprep.subr.bf16.mxu0 %v6503_v15  ;;  %v4128_v16 = vunpack.i.h.bf16 %v4126_v55  ;;  %v4127_v33 = vunpack.i.l.bf16 %v4126_v55  ;;  %v939_v55 = vsel %vm899_vm2, %v936_v36, %v938_v44 }
 0x136   : > { %v1025_v51 = vsel %vm1012_vm3, %v5039_v34, %v4127_v33  ;;  %v1026_v18 = vsel %vm1012_vm3, %v5084_v7, %v4128_v16  ;;  %v943_v33 = vrot.slane %v4992_v43, 2 }
 0x137   : > { %2018 = vmatpush1.bf16.msra.mxu0 %v4215_v31  ;;  %v5354_v31 = vpack.c.bf16 %v934_v49, %v932_v32  ;;  %v4136_v25 = vpop.permute.xlu0 %4135 }
 0x138   : > { %2019 = vmatprep.subr.bf16.mxu0 %v6503_v15 }
 0x139   : > { %1365 = vmatmul.mubr.bf16.gmra.mrb[20].mxu1 %v5322_v2  ;;  %1714 = vmatmul.mubr.bf16.gmra.mrb[16].mxu0 %v5322_v2 }
 0x13a   : > { %3672 = vmatprep.mubr.msk.bf16.mxu1 %vm1012_vm3, %v5327_v19  ;;  %3723 = vmatprep.mubr.msk.bf16.mxu0 %vm1012_vm3, %v5327_v19  ;;  %v5337_v47 = vpop.permute.xlu1 %4160 }
 0x13b   : > { %2020 = vmatpush1.bf16.msra.mxu0 %v4216_v52 }
 0x13c   : > { %2021 = vmatprep.subr.bf16.mxu0 %v6503_v15 }
 0x13f   : > { %v4171_v22 = vpop.permute.xlu1 %4170  ;;  %2022 = vmatpush1.bf16.msra.mxu0 %v4217_v53  ;;  %v937_v53 = vsel %vm899_vm2, %v935_v24, %v936_v36 }
 0x140   : > { %v4173_v1 = vunpack.i.h.bf16 %v4171_v22  ;;  %v4172_v9 = vunpack.i.l.bf16 %v4171_v22  ;;  %2023 = vmatprep.subr.bf16.mxu0 %v6503_v15  ;;  %v4138_v22 = vunpack.i.h.bf16 %v4136_v25  ;;  %v5395_v16 = vpack.c.bf16 %v939_v55, %v937_v53  ;;  %v2485_v55 = vld [vmem:[%s5418_s26 + $0x8] sm:$0xff] }
 0x141   : > { %1373 = vmatmul.mubr.bf16.gmra.mrb[24].mxu1 %v5352_v41  ;;  %1722 = vmatmul.mubr.bf16.gmra.mrb[20].mxu0 %v5352_v41  ;;  %v946_v53 = vrot.slane %v5152_v21, 2 }
 0x142   : > { %v528_v61 = vsel %vm496_vm0, %v335_v42, %v4173_v1  ;;  %v527_v23 = vsel %vm496_vm0, %v334_v27, %v4172_v9  ;;  %3673 = vmatprep.mubr.msk.bf16.mxu1 %vm1012_vm3, %v5354_v31  ;;  %3724 = vmatprep.mubr.msk.bf16.mxu0 %vm1012_vm3, %v5354_v31  ;;  %v5392_v27 = vpack.c.bf16 %v1026_v18, %v1025_v51  ;;  %v940_v42 = vrot.slane %v4978_v39, 2 }
 0x143   : > { %v608_v52 = vrot.slane %v528_v61, 7  ;;  %v607_v26 = vrot.slane %v527_v23, 7  ;;  %2024 = vmatpush1.bf16.msra.mxu0 %v4218_v5  ;;  %v4137_v5 = vunpack.i.l.bf16 %v4136_v25  ;;  %v941_v9 = vrot.slane %v5019_v45, 2  ;;  %v2484_v25 = vld [vmem:[%s5418_s26] sm:$0xff] }
 0x144   : > { %2025 = vmatprep.subr.bf16.mxu0 %v6503_v15  ;;  %v1028_v61 = vsel %vm1012_vm3, %v5105_v13, %v4138_v22  ;;  %v945_v13 = vrot.slane %v5127_v63, 2  ;;  %v948_v18 = vrot.slane %v5132_v12, 2  ;;  %2548 = vrot.lane.b32.xlu0 %v2484_v25, %s4541_s20  ;;  %v2487_v22 = vld [vmem:[%s5418_s26 + $0x18] sm:$0xff]  ;;  %v955_v25 = vrot.slane %v5136_v0, 2 }
 0x145   : > { %v5380_v14 = vsel %vm561_vm1, %v608_v52, 0.0  ;;  %v5383_v32 = vsel %vm561_vm1, 0.0, %v607_v26  ;;  %v5386_v49 = vsel %vm561_vm1, %v607_v26, %v608_v52  ;;  %v1027_v43 = vsel %vm1012_vm3, %v4960_v17, %v4137_v5 }
 0x146   : > { %v798_v34 = vrot.slane %v5383_v32, 1  ;;  %v799_v7 = vrot.slane %v5386_v49, 1  ;;  %v801_v24 = vrot.slane %v5380_v14, 1  ;;  %v942_v23 = vsel %vm899_vm2, %v940_v42, %v941_v9  ;;  %v2486_v42 = vld [vmem:[%s5418_s26 + $0x10] sm:$0xff] }
 0x147   : > { %2026 = vmatpush1.bf16.msra.mxu0 %v4219_v38  ;;  %v944_v52 = vsel %vm899_vm2, %v941_v9, %v943_v33  ;;  %v5420_v26 = vpack.c.bf16 %v1028_v61, %v1027_v43  ;;  %v4143_v38 = vunpack.i.h.bf16 %v5306_v48  ;;  %v4142_v17 = vunpack.i.l.bf16 %v5306_v48  ;;  %v4146_v33 = vpop.permute.xlu0 %4145  ;;  %v2488_v43 = vld [vmem:[%s5418_s26 + $0x20] sm:$0xff] }
 0x148   : > { %v800_v36 = vsel %vm722_vm4, %v798_v34, %v799_v7  ;;  %v802_v1 = vsel %vm722_vm4, %v799_v7, %v801_v24  ;;  %v5424_v51 = vpack.c.bf16 %v944_v52, %v942_v23  ;;  %v5433_v34 = vpop.f32.mrb[0].mxu1  ;;  %2552 = vrot.lane.b32.xlu0 %v2486_v42, %s4541_s20  ;;  %v4148_v9 = vunpack.i.h.bf16 %v4146_v33 }
 0x149   : > { %1381 = vmatmul.mubr.bf16.gmra.mrb[28].mxu1 %v5392_v27  ;;  %1730 = vmatmul.mubr.bf16.gmra.mrb[24].mxu0 %v5392_v27  ;;  %v4179_v44 = vpack.i.bf16 %v802_v1, %v800_v36  ;;  %v1328_v48 = vpop.f32.mrb[1].mxu1  ;;  %v1029_v7 = vsel %vm1012_vm3, %v4978_v39, %v4142_v17  ;;  %v1030_v24 = vsel %vm1012_vm3, %v5019_v45, %v4143_v38  ;;  %v2489_v45 = vld [vmem:[%s5418_s26 + $0x28] sm:$0xff]  ;;  %v950_v61 = vrot.slane %v5024_v10, 2 }
 0x14a   : > { %3674 = vmatprep.mubr.msk.bf16.mxu1 %vm1012_vm3, %v5395_v16  ;;  %3725 = vmatprep.mubr.msk.bf16.mxu0 %vm1012_vm3, %v5395_v16  ;;  %v5441_v12 = vpop.f32.mrb[2].mxu1  ;;  %v949_v36 = vsel %vm899_vm2, %v946_v53, %v948_v18  ;;  %v5451_v1 = vpack.c.bf16 %v1030_v24, %v1029_v7  ;;  %v953_v23 = vrot.slane %v5027_v11, 2  ;;  %v951_v52 = vrot.slane %v5072_v62, 2 }
 0x14b   : > { %4180 = vrot.lane.b32.xlu1 %v4179_v44, %s4542_s17  ;;  %v1331_v5 = vpop.f32.mrb[3].mxu1  ;;  %v4147_v44 = vunpack.i.l.bf16 %v4146_v33  ;;  %v1032_v11 = vsel %vm1012_vm3, %v5152_v21, %v4148_v9  ;;  %v4153_v18 = vunpack.i.h.bf16 %v5320_v20  ;;  %v4156_v48 = vpop.permute.xlu0 %4155  ;;  %v2491_v9 = vld [vmem:[%s5418_s26 + $0x38] sm:$0xff] }
 0x14c   : > { %2556 = vrot.lane.b32.xlu0 %v2488_v43, %s4541_s20  ;;  %v954_v17 = vsel %vm899_vm2, %v951_v52, %v953_v23  ;;  %v4158_v24 = vunpack.i.h.bf16 %v4156_v48  ;;  %v4157_v42 = vunpack.i.l.bf16 %v4156_v48 }
 0x14d   : > { %v1031_v38 = vsel %vm1012_vm3, %v5127_v63, %v4147_v44  ;;  %v956_v63 = vrot.slane %v5167_v4, 2  ;;  %v4163_v44 = vunpack.i.h.bf16 %v5337_v47 }
 0x14e   : > { %v1035_v5 = vsel %vm1012_vm3, %v5136_v0, %v4157_v42  ;;  %v1036_v33 = vsel %vm1012_vm3, %v5167_v4, %v4158_v24  ;;  %v965_v0 = vrot.slane %v5144_v58, 2  ;;  %v968_v4 = vrot.slane %v5155_v37, 2  ;;  %v2507_v42 = vld [vmem:[%s5418_s26 + $0xb8] sm:$0xff] }
 0x14f   : > { %2550 = vrot.lane.b32.xlu1 %v2485_v55, %s4541_s20  ;;  %v958_v55 = vrot.slane %v5139_v57, 2  ;;  %v957_v57 = vsel %vm899_vm2, %v955_v25, %v956_v63  ;;  %v4166_v23 = vpop.permute.xlu0 %4165 }
 0x151   : > { %1389 = vmatmul.mubr.bf16.gmra.mrb[32].mxu1 %v5420_v26  ;;  %1738 = vmatmul.mubr.bf16.gmra.mrb[28].mxu0 %v5420_v26  ;;  %v959_v7 = vsel %vm899_vm2, %v956_v63, %v958_v55  ;;  %v2494_v63 = vld [vmem:[%s5418_s26 + $0x50] sm:$0xff] }
 0x152   : > { %3675 = vmatprep.mubr.msk.bf16.mxu1 %vm1012_vm3, %v5424_v51  ;;  %3770 = vmatprep.mubr.msk.bf16.mxu0 %vm1012_vm3, %v5216_v40  ;;  %v947_v40 = vsel %vm899_vm2, %v945_v13, %v946_v53  ;;  %v5476_v13 = vpack.c.bf16 %v1032_v11, %v1031_v38  ;;  %v2493_v11 = vld [vmem:[%s5418_s26 + $0x48] sm:$0xff] }
 0x153   : > { %2554 = vrot.lane.b32.xlu1 %v2487_v22, %s4541_s20  ;;  %v5455_v39 = vpack.c.bf16 %v949_v36, %v947_v40  ;;  %v5499_v22 = vpack.c.bf16 %v959_v7, %v957_v57  ;;  %v2490_v36 = vld [vmem:[%s5418_s26 + $0x30] sm:$0xff]  ;;  %v4176_v55 = vpop.permute.xlu0 %4175  ;;  %v2496_v7 = vld [vmem:[%s5418_s26 + $0x60] sm:$0xff] }
 0x154   : > { %2560 = vrot.lane.b32.xlu0 %v2490_v36, %s4541_s20  ;;  %v4177_v48 = vunpack.i.l.bf16 %v4176_v55 }
 0x157   : > { %2558 = vrot.lane.b32.xlu1 %v2489_v45, %s4541_s20  ;;  %v966_v45 = vrot.slane %v5178_v29, 2 }
 0x159   : > { %1397 = vmatmul.mubr.bf16.gmra.mrb[36].mxu1 %v5451_v1  ;;  %2036 = vmatmul.mubr.bf16.vlgmr.msra.gmra.mrb[0].mxu0 %v5235_v56  ;;  %v952_v56 = vsel %vm899_vm2, %v950_v61, %v951_v52  ;;  %v1038_v61 = vsel %vm1012_vm3, %v5122_v35, %v4163_v44  ;;  %v967_v37 = vsel %vm899_vm2, %v965_v0, %v966_v45  ;;  %v2512_v44 = vld [vmem:[%s5418_s26 + $0xe0] sm:$0xff]  ;;  %v2513_v0 = vld [vmem:[%s5418_s26 + $0xe8] sm:$0xff] }
 0x15a   : > { %3676 = vmatprep.mubr.msk.bf16.mxu1 %vm1012_vm3, %v5455_v39  ;;  %3771 = vmatprep.mubr.msk.bf16.mxu0 %vm1012_vm3, %v5241_v8  ;;  %v4152_v8 = vunpack.i.l.bf16 %v5320_v20  ;;  %v5480_v53 = vpack.c.bf16 %v954_v17, %v952_v56  ;;  %v1034_v20 = vsel %vm1012_vm3, %v5072_v62, %v4153_v18  ;;  %v961_v62 = vrot.slane %v5122_v35, 2 }
 0x15b   : > { %2562 = vrot.lane.b32.xlu1 %v2491_v9, %s4541_s20  ;;  %v969_v52 = vsel %vm899_vm2, %v966_v45, %v968_v4  ;;  %v4168_v56 = vunpack.i.h.bf16 %v4166_v23  ;;  %v973_v35 = vrot.slane %v5162_v59, 2  ;;  %v971_v18 = vrot.slane %v5187_v46, 2  ;;  %v2511_v9 = vld [vmem:[%s5418_s26 + $0xd8] sm:$0xff]  ;;  %v2514_v4 = vld [vmem:[%s5418_s26 + $0xf0] sm:$0xff] }
 0x15c   : > { %v1033_v21 = vsel %vm1012_vm3, %v5024_v10, %v4152_v8  ;;  %v963_v10 = vrot.slane %v5088_v50, 2  ;;  %v5546_v17 = vpack.c.bf16 %v969_v52, %v967_v37 }
 0x15d   : > { %v1040_v25 = vsel %vm1012_vm3, %v5178_v29, %v4168_v56 }
 0x15e   : > { %v964_v40 = vsel %vm899_vm2, %v961_v62, %v963_v10  ;;  %v975_v10 = vrot.slane %v5383_v32, 2 }
 0x15f   : > { %2566 = vrot.lane.b32.xlu1 %v2493_v11, %s4541_s20 }
 0x161   : > { %1405 = vmatmul.mubr.bf16.gmra.mrb[40].mxu1 %v5476_v13  ;;  %2044 = vmatmul.mubr.bf16.gmra.mrb[4].mxu0 %v5262_v28  ;;  %v5497_v28 = vpack.c.bf16 %v1034_v20, %v1033_v21  ;;  %v2495_v20 = vld [vmem:[%s5418_s26 + $0x58] sm:$0xff] }
 0x162   : > { %3677 = vmatprep.mubr.msk.bf16.mxu1 %vm1012_vm3, %v5480_v53  ;;  %3772 = vmatprep.mubr.msk.bf16.mxu0 %vm1012_vm3, %v5267_v6  ;;  %v960_v6 = vrot.slane %v5093_v60, 2 }
 0x163   : > { %2570 = vrot.lane.b32.xlu1 %v2495_v20, %s4541_s20 }
 0x164   : > { %v962_v50 = vsel %vm899_vm2, %v960_v6, %v961_v62  ;;  %v2508_v6 = vld [vmem:[%s5418_s26 + $0xc0] sm:$0xff]  ;;  %v976_v62 = vrot.slane %v5386_v49, 2 }
 0x165   : > { %v5523_v43 = vpack.c.bf16 %v964_v40, %v962_v50  ;;  %v2510_v50 = vld [vmem:[%s5418_s26 + $0xd0] sm:$0xff] }
 0x169   : > { %1413 = vmatmul.mubr.bf16.gmra.mrb[44].mxu1 %v5497_v28  ;;  %2052 = vmatmul.mubr.bf16.gmra.mrb[8].mxu0 %v5289_v54  ;;  %v5518_v54 = vpack.c.bf16 %v1036_v33, %v1035_v5  ;;  %v977_v5 = vsel %vm899_vm2, %v975_v10, %v976_v62 }
 0x16a   : > { %3678 = vmatprep.mubr.msk.bf16.mxu1 %vm1012_vm3, %v5499_v22  ;;  %3773 = vmatprep.mubr.msk.bf16.mxu0 %vm1012_vm3, %v5294_v30  ;;  %v4162_v30 = vunpack.i.l.bf16 %v5337_v47 }
 0x16c   : > { %v1037_v47 = vsel %vm1012_vm3, %v5093_v60, %v4162_v30  ;;  %v970_v60 = vrot.slane %v5170_v3, 2 }
 0x16d   : > { %v5543_v38 = vpack.c.bf16 %v1038_v61, %v1037_v47  ;;  %v2515_v47 = vld [vmem:[%s5418_s26 + $0xf8] sm:$0xff] }
 0x16e   : > { %v972_v59 = vsel %vm899_vm2, %v970_v60, %v971_v18 }
 0x171   : > { %1421 = vmatmul.mubr.bf16.gmra.mrb[48].mxu1 %v5518_v54  ;;  %2060 = vmatmul.mubr.bf16.gmra.mrb[12].mxu0 %v5322_v2  ;;  %v2492_v2 = vld [vmem:[%s5418_s26 + $0x40] sm:$0xff] }
 0x172   : > { %3679 = vmatprep.mubr.msk.bf16.mxu1 %vm1012_vm3, %v5523_v43  ;;  %3774 = vmatprep.mubr.msk.bf16.mxu0 %vm1012_vm3, %v5327_v19  ;;  %v4167_v19 = vunpack.i.l.bf16 %v4166_v23 }
 0x173   : > { %2564 = vrot.lane.b32.xlu0 %v2492_v2, %s4541_s20 }
 0x174   : > { %v1039_v8 = vsel %vm1012_vm3, %v5144_v58, %v4167_v19  ;;  %v1041_v58 = vsel %vm1012_vm3, %v5170_v3, %v4177_v48  ;;  %v2498_v3 = vld [vmem:[%s5418_s26 + $0x70] sm:$0xff] }
 0x175   : > { %v5566_v21 = vpack.c.bf16 %v1040_v25, %v1039_v8 }
 0x177   : > { %2568 = vrot.lane.b32.xlu0 %v2494_v63, %s4541_s20 }
 0x179   : > { %1429 = vmatmul.mubr.bf16.gmra.mrb[52].mxu1 %v5543_v38  ;;  %2068 = vmatmul.mubr.bf16.gmra.mrb[16].mxu0 %v5352_v41  ;;  %v974_v41 = vsel %vm899_vm2, %v971_v18, %v973_v35 }
 0x17a   : > { %3680 = vmatprep.mubr.msk.bf16.mxu1 %vm1012_vm3, %v5546_v17  ;;  %3775 = vmatprep.mubr.msk.bf16.mxu0 %vm1012_vm3, %v5354_v31  ;;  %v4178_v31 = vunpack.i.h.bf16 %v4176_v55  ;;  %v5569_v57 = vpack.c.bf16 %v974_v41, %v972_v59 }
 0x17b   : > { %2572 = vrot.lane.b32.xlu0 %v2496_v7, %s4541_s20 }
 0x17c   : > { %v1042_v29 = vsel %vm1012_vm3, %v5187_v46, %v4178_v31  ;;  %v2499_v46 = vld [vmem:[%s5418_s26 + $0x78] sm:$0xff] }
 0x17d   : > { %v5584_v24 = vpack.c.bf16 %v1042_v29, %v1041_v58  ;;  %v5700_v29 = vld [vmem:[%s6491_s4] ss:$0 sm:$0xff] }
 0x17e   : > { %v1453_v7 = vadd.f32 %v5700_v29, %v5433_v34 }
 0x17f   : > { %2576 = vrot.lane.b32.xlu0 %v2498_v3, %s4541_s20 }
 0x181   : > { %1437 = vmatmul.mubr.bf16.gmra.mrb[56].mxu1 %v5566_v21  ;;  %2076 = vmatmul.mubr.bf16.gmra.mrb[20].mxu0 %v5392_v27  ;;  %v2497_v27 = vld [vmem:[%s5418_s26 + $0x68] sm:$0xff] }
 0x182   : > { %3681 = vmatprep.mubr.msk.bf16.mxu1 %vm1012_vm3, %v5569_v57  ;;  %3776 = vmatprep.mubr.msk.bf16.mxu0 %vm1012_vm3, %v5395_v16  ;;  %v2500_v16 = vld [vmem:[%s5418_s26 + $0x80] sm:$0xff] }
 0x183   : > { %2574 = vrot.lane.b32.xlu1 %v2497_v27, %s4541_s20  ;;  %2580 = vrot.lane.b32.xlu0 %v2500_v16, %s4541_s20  ;;  %v1454_v27 = vadd.f32 %v5700_v29, %v5441_v12 }
 0x187   : > { %2578 = vrot.lane.b32.xlu1 %v2499_v46, %s4541_s20 }
 0x189   : > { %1445 = vmatmul.mubr.bf16.gmra.mrb[60].mxu1 %v5584_v24  ;;  %2084 = vmatmul.mubr.bf16.gmra.mrb[24].mxu0 %v5420_v26  ;;  %v2501_v26 = vld [vmem:[%s5418_s26 + $0x88] sm:$0xff] }
 0x18a   : > { %3726 = vmatprep.mubr.msk.bf16.mxu1 %vm1012_vm3, %v5424_v51  ;;  %3777 = vmatprep.mubr.msk.bf16.mxu0 %vm1012_vm3, %v5424_v51  ;;  %v2502_v51 = vld [vmem:[%s5418_s26 + $0x90] sm:$0xff] }
 0x18b   : > { %2582 = vrot.lane.b32.xlu1 %v2501_v26, %s4541_s20  ;;  %2584 = vrot.lane.b32.xlu0 %v2502_v51, %s4541_s20 }
 0x191   : > { %1746 = vmatmul.mubr.bf16.vlgmr.msra.gmra.mrb[32].mxu1 %v5451_v1  ;;  %2092 = vmatmul.mubr.bf16.gmra.mrb[28].mxu0 %v5451_v1  ;;  %v2503_v1 = vld [vmem:[%s5418_s26 + $0x98] sm:$0xff] }
 0x192   : > { %3727 = vmatprep.mubr.msk.bf16.mxu1 %vm1012_vm3, %v5455_v39  ;;  %3778 = vmatprep.mubr.msk.bf16.mxu0 %vm1012_vm3, %v5455_v39  ;;  %v2504_v39 = vld [vmem:[%s5418_s26 + $0xa0] sm:$0xff] }
 0x193   : > { %2586 = vrot.lane.b32.xlu1 %v2503_v1, %s4541_s20  ;;  %2588 = vrot.lane.b32.xlu0 %v2504_v39, %s4541_s20 }
 0x199   : > { %1754 = vmatmul.mubr.bf16.gmra.mrb[36].mxu1 %v5476_v13  ;;  %2100 = vmatmul.mubr.bf16.gmra.mrb[32].mxu0 %v5476_v13  ;;  %v2505_v13 = vld [vmem:[%s5418_s26 + $0xa8] sm:$0xff] }
 0x19a   : > { %3728 = vmatprep.mubr.msk.bf16.mxu1 %vm1012_vm3, %v5480_v53  ;;  %3779 = vmatprep.mubr.msk.bf16.mxu0 %vm1012_vm3, %v5480_v53  ;;  %v2506_v53 = vld [vmem:[%s5418_s26 + $0xb0] sm:$0xff] }
 0x19b   : > { %2590 = vrot.lane.b32.xlu1 %v2505_v13, %s4541_s20  ;;  %2592 = vrot.lane.b32.xlu0 %v2506_v53, %s4541_s20 }
 0x19f   : > { %2594 = vrot.lane.b32.xlu1 %v2507_v42, %s4541_s20  ;;  %2596 = vrot.lane.b32.xlu0 %v2508_v6, %s4541_s20 }
 0x1a1   : > { %1762 = vmatmul.mubr.bf16.gmra.mrb[40].mxu1 %v5497_v28  ;;  %2108 = vmatmul.mubr.bf16.gmra.mrb[36].mxu0 %v5497_v28  ;;  %v2509_v28 = vld [vmem:[%s5418_s26 + $0xc8] sm:$0xff] }
 0x1a2   : > { %3729 = vmatprep.mubr.msk.bf16.mxu1 %vm1012_vm3, %v5499_v22  ;;  %3780 = vmatprep.mubr.msk.bf16.mxu0 %vm1012_vm3, %v5499_v22  ;;  %v978_v22 = vrot.slane %v5380_v14, 2 }
 0x1a3   : > { %2598 = vrot.lane.b32.xlu1 %v2509_v28, %s4541_s20  ;;  %2600 = vrot.lane.b32.xlu0 %v2510_v50, %s4541_s20 }
 0x1a4   : > { %v979_v33 = vsel %vm899_vm2, %v976_v62, %v978_v22 }
 0x1a7   : > { %2602 = vrot.lane.b32.xlu1 %v2511_v9, %s4541_s20  ;;  %2604 = vrot.lane.b32.xlu0 %v2512_v44, %s4541_s20 }
 0x1a9   : > { %1770 = vmatmul.mubr.bf16.gmra.mrb[44].mxu1 %v5518_v54  ;;  %2116 = vmatmul.mubr.bf16.gmra.mrb[40].mxu0 %v5518_v54  ;;  %v1076_v54 = vpack.c.bf16 %v979_v33, %v977_v5 }
 0x1aa   : > { %3730 = vmatprep.mubr.msk.bf16.mxu1 %vm1012_vm3, %v5523_v43  ;;  %3781 = vmatprep.mubr.msk.bf16.mxu0 %vm1012_vm3, %v5523_v43 }
 0x1ab   : > { %2606 = vrot.lane.b32.xlu1 %v2513_v0, %s4541_s20  ;;  %2608 = vrot.lane.b32.xlu0 %v2514_v4, %s4541_s20 }
 0x1af   : > { %2610 = vrot.lane.b32.xlu1 %v2515_v47, %s4541_s20 }
 0x1b1   : > { %1778 = vmatmul.mubr.bf16.gmra.mrb[48].mxu1 %v5543_v38  ;;  %2124 = vmatmul.mubr.bf16.gmra.mrb[44].mxu0 %v5543_v38 }
 0x1b2   : > { %3731 = vmatprep.mubr.msk.bf16.mxu1 %vm1012_vm3, %v5546_v17  ;;  %3782 = vmatprep.mubr.msk.bf16.mxu0 %vm1012_vm3, %v5546_v17 }
 0x1b9   : > { %1786 = vmatmul.mubr.bf16.gmra.mrb[52].mxu1 %v5566_v21  ;;  %2132 = vmatmul.mubr.bf16.gmra.mrb[48].mxu0 %v5566_v21 }
 0x1ba   : > { %3732 = vmatprep.mubr.msk.bf16.mxu1 %vm1012_vm3, %v5569_v57  ;;  %3783 = vmatprep.mubr.msk.bf16.mxu0 %vm1012_vm3, %v5569_v57 }
 0x1bd   : > { %v4181_v14 = vpop.permute.xlu1 %4180 }
 0x1be   : > { %v4183_v40 = vunpack.i.h.bf16 %v4181_v14  ;;  %v4182_v36 = vunpack.i.l.bf16 %v4181_v14 }
 0x1c0   : > { %v1043_v30 = vsel %vm1012_vm3, %v5383_v32, %v4182_v36  ;;  %v1044_v43 = vsel %vm1012_vm3, %v5386_v49, %v4183_v40 }
 0x1c1   : > { %1794 = vmatmul.mubr.bf16.gmra.mrb[56].mxu1 %v5584_v24  ;;  %2140 = vmatmul.mubr.bf16.gmra.mrb[52].mxu0 %v5584_v24  ;;  %v1075_v45 = vpack.c.bf16 %v1044_v43, %v1043_v30 }
 0x1c2   : > { %3733 = vmatprep.mubr.msk.bf16.mxu1 %vm1012_vm3, %v1076_v54  ;;  %3784 = vmatprep.mubr.msk.bf16.mxu0 %vm1012_vm3, %v1076_v54 }
 0x1c9   : > { %1802 = vmatmul.mubr.bf16.gmra.mrb[60].mxu1 %v1075_v45  ;;  %2148 = vmatmul.mubr.bf16.gmra.mrb[56].mxu0 %v1075_v45 }
 0x1ca   : > { %2155 = vmatprep.mubr.bf16.mxu0 %v6503_v15 }
 0x1d1   : > { %2156 = vmatmul.mubr.bf16.gmra.mrb[60].mxu0 %v6503_v15 }
 0x1ec   : > { %v1334_v32 = vpop.f32.mrb[4].mxu1 }
 0x1ed   : > { %v1336_v61 = vpop.f32.mrb[5].mxu1  ;;  %v1455_v1 = vadd.f32 %v5700_v29, %v1334_v32 }
 0x1ee   : > { %v1337_v23 = vpop.f32.mrb[6].mxu1 }
 0x1ef   : > { %v1339_v49 = vpop.f32.mrb[7].mxu1  ;;  %v1456_v34 = vadd.f32 %v5700_v29, %v1337_v23  ;;  %v5740_v23 = vpop.permute.xlu0 %2548 }
 0x1f4   : > { %v1342_v37 = vpop.f32.mrb[8].mxu1 }
 0x1f5   : > { %v1344_v52 = vpop.f32.mrb[9].mxu1  ;;  %v1457_v22 = vadd.f32 %v5700_v29, %v1342_v37  ;;  %v5745_v37 = vpop.permute.xlu1 %2550 }
 0x1f6   : > { %v1345_v2 = vpop.f32.mrb[10].mxu1 }
 0x1f7   : > { %v1347_v38 = vpop.f32.mrb[11].mxu1  ;;  %v1458_v5 = vadd.f32 %v5700_v29, %v1345_v2 }
 0x1fc   : > { %v1350_v11 = vpop.f32.mrb[12].mxu1 }
 0x1fd   : > { %v1352_v56 = vpop.f32.mrb[13].mxu1  ;;  %v1459_v9 = vadd.f32 %v5700_v29, %v1350_v11 }
 0x1fe   : > { %v1353_v19 = vpop.f32.mrb[14].mxu1 }
 0x1ff   : > { %v1355_v17 = vpop.f32.mrb[15].mxu1  ;;  %v1460_v43 = vadd.f32 %v5700_v29, %v1353_v19 }
 0x200   : > { %v5752_v17 = vpop.permute.xlu0 %2552 }
 0x204   : > { %v5681_v60 = vpop.f32.mrb[16].mxu1 }
 0x205   : > { %v1360_v35 = vpop.f32.mrb[17].mxu1  ;;  %v1461_v49 = vadd.f32 %v5700_v29, %v5681_v60 }
 0x206   : > { %v5683_v18 = vpop.f32.mrb[18].mxu1 }
 0x207   : > { %v1363_v8 = vpop.f32.mrb[19].mxu1  ;;  %v1462_v38 = vadd.f32 %v5700_v29, %v5683_v18  ;;  %v5761_v18 = vpop.permute.xlu0 %2556 }
 0x208   : > { %v5757_v8 = vpop.permute.xlu1 %2554 }
 0x20c   : > { %v5685_v25 = vpop.f32.mrb[20].mxu1 }
 0x20d   : > { %v1368_v15 = vpop.f32.mrb[21].mxu1 }
 0x20e   : > { %v5687_v55 = vpop.f32.mrb[22].mxu1 }
 0x20f   : > { %v1371_v59 = vpop.f32.mrb[23].mxu1 }
 0x210   : > { %v1463_v59 = vadd.f32 %v5700_v29, %v5685_v25 }
 0x214   : > { %v5689_v41 = vpop.f32.mrb[24].mxu1 }
 0x215   : > { %v1376_v63 = vpop.f32.mrb[25].mxu1 }
 0x216   : > { %v5691_v21 = vpop.f32.mrb[26].mxu1  ;;  %v5765_v63 = vpop.permute.xlu1 %2558 }
 0x217   : > { %v1379_v20 = vpop.f32.mrb[27].mxu1 }
 0x21c   : > { %v5693_v31 = vpop.f32.mrb[28].mxu1 }
 0x21d   : > { %v1384_v48 = vpop.f32.mrb[29].mxu1 }
 0x21e   : > { %v5695_v57 = vpop.f32.mrb[30].mxu1 }
 0x21f   : > { %v1387_v58 = vpop.f32.mrb[31].mxu1 }
 0x220   : > { %v1464_v58 = vadd.f32 %v5700_v29, %v5687_v55 }
 0x22c   : > { %v2037_v24 = vpop.f32.mrb[0].mxu0 }
 0x22d   : > { %v5706_v3 = vadd.f32 %v2037_v24, %v1453_v7  ;;  %v2039_v46 = vpop.f32.mrb[1].mxu0 }
 0x22e   : > { %v2040_v16 = vpop.f32.mrb[2].mxu0  ;;  %v5772_v46 = vpop.permute.xlu0 %2560 }
 0x22f   : > { %4220 = vtanh.f32 %v5706_v3  ;;  %v5709_v26 = vadd.f32 %v2040_v16, %v1454_v27  ;;  %v2042_v51 = vpop.f32.mrb[3].mxu0 }
 0x230   : > { %v5777_v51 = vpop.permute.xlu1 %2562 }
 0x231   : > { %4222 = vtanh.f32 %v5709_v26 }
 0x232   : > { %v5781_v55 = vpop.permute.xlu0 %2564 }
 0x234   : > { %v2045_v39 = vpop.f32.mrb[4].mxu0 }
 0x235   : > { %v5714_v13 = vadd.f32 %v2045_v39, %v1455_v1  ;;  %v2047_v53 = vpop.f32.mrb[5].mxu0  ;;  %v1465_v39 = vadd.f32 %v5700_v29, %v5689_v41 }
 0x236   : > { %v2048_v12 = vpop.f32.mrb[6].mxu0 }
 0x237   : > { %4224 = vtanh.f32 %v5714_v13  ;;  %v5717_v42 = vadd.f32 %v2048_v12, %v1456_v34  ;;  %v2050_v6 = vpop.f32.mrb[7].mxu0  ;;  %v5785_v34 = vpop.permute.xlu1 %2566 }
 0x238   : > { %v1466_v6 = vadd.f32 %v5700_v29, %v5691_v21  ;;  %v1467_v21 = vadd.f32 %v5700_v29, %v5693_v31 }
 0x239   : > { %v4221_v28 = vpop.eup %4220  ;;  %4226 = vtanh.f32 %v5717_v42 }
 0x23a   : > { %2708 = vrot.lane.b32.xlu0 %v4221_v28, %s4541_s20 }
 0x23b   : > { %v4223_v10 = vpop.eup %4222 }
 0x23c   : > { %v2053_v62 = vpop.f32.mrb[8].mxu0  ;;  %2710 = vrot.lane.b32.xlu1 %v4223_v10, %s4541_s20 }
 0x23d   : > { %v5724_v33 = vadd.f32 %v2053_v62, %v1457_v22  ;;  %v2055_v14 = vpop.f32.mrb[9].mxu0  ;;  %v5792_v62 = vpop.permute.xlu0 %2568 }
 0x23e   : > { %v2056_v50 = vpop.f32.mrb[10].mxu0  ;;  %v5797_v14 = vpop.permute.xlu1 %2570 }
 0x23f   : > { %4228 = vtanh.f32 %v5724_v33  ;;  %v5727_v40 = vadd.f32 %v2056_v50, %v1458_v5  ;;  %v2058_v36 = vpop.f32.mrb[11].mxu0 }
 0x241   : > { %v4225_v54 = vpop.eup %4224  ;;  %4230 = vtanh.f32 %v5727_v40  ;;  %v5803_v36 = vpop.permute.xlu0 %2572 }
 0x242   : > { %2712 = vrot.lane.b32.xlu0 %v4225_v54, %s4541_s20  ;;  %v5805_v54 = vpop.permute.xlu1 %2574 }
 0x243   : > { %v4227_v44 = vpop.eup %4226 }
 0x244   : > { %v2061_v30 = vpop.f32.mrb[12].mxu0  ;;  %2714 = vrot.lane.b32.xlu1 %v4227_v44, %s4541_s20 }
 0x245   : > { %v5733_v0 = vadd.f32 %v2061_v30, %v1459_v9  ;;  %v2063_v4 = vpop.f32.mrb[13].mxu0 }
 0x246   : > { %v2064_v45 = vpop.f32.mrb[14].mxu0 }
 0x247   : > { %4232 = vtanh.f32 %v5733_v0  ;;  %v5737_v47 = vadd.f32 %v2064_v45, %v1460_v43  ;;  %v2066_v32 = vpop.f32.mrb[15].mxu0  ;;  %v1468_v43 = vadd.f32 %v5700_v29, %v5695_v57 }
 0x249   : > { %v4229_v61 = vpop.eup %4228  ;;  %4234 = vtanh.f32 %v5737_v47 }
 0x24a   : > { %2716 = vrot.lane.b32.xlu0 %v4229_v61, %s4541_s20 }
 0x24b   : > { %v4231_v52 = vpop.eup %4230 }
 0x24c   : > { %v2069_v2 = vpop.f32.mrb[16].mxu0  ;;  %2718 = vrot.lane.b32.xlu1 %v4231_v52, %s4541_s20 }
 0x24d   : > { %v5749_v11 = vadd.f32 %v2069_v2, %v1461_v49  ;;  %v2071_v56 = vpop.f32.mrb[17].mxu0 }
 0x24e   : > { %v2072_v19 = vpop.f32.mrb[18].mxu0  ;;  %v5818_v56 = vpop.permute.xlu0 %2576 }
 0x24f   : > { %4236 = vtanh.f32 %v5749_v11  ;;  %v5755_v35 = vadd.f32 %v2072_v19, %v1462_v38  ;;  %v2074_v60 = vpop.f32.mrb[19].mxu0  ;;  %v5820_v19 = vpop.permute.xlu1 %2578 }
 0x251   : > { %v4233_v15 = vpop.eup %4232  ;;  %4238 = vtanh.f32 %v5755_v35 }
 0x252   : > { %2720 = vrot.lane.b32.xlu0 %v4233_v15, %s4541_s20 }
 0x253   : > { %v4235_v20 = vpop.eup %4234 }
 0x254   : > { %v2077_v48 = vpop.f32.mrb[20].mxu0  ;;  %2722 = vrot.lane.b32.xlu1 %v4235_v20, %s4541_s20 }
 0x255   : > { %v5769_v7 = vadd.f32 %v2077_v48, %v1463_v59  ;;  %v2079_v24 = vpop.f32.mrb[21].mxu0 }
 0x256   : > { %v2080_v27 = vpop.f32.mrb[22].mxu0 }
 0x257   : > { %4240 = vtanh.f32 %v5769_v7  ;;  %v5775_v16 = vadd.f32 %v2080_v27, %v1464_v58  ;;  %v2082_v25 = vpop.f32.mrb[23].mxu0 }
 0x259   : > { %v4237_v1 = vpop.eup %4236  ;;  %4242 = vtanh.f32 %v5775_v16 }
 0x25a   : > { %2724 = vrot.lane.b32.xlu0 %v4237_v1, %s4541_s20 }
 0x25b   : > { %v4239_v53 = vpop.eup %4238 }
 0x25c   : > { %v2085_v12 = vpop.f32.mrb[24].mxu0  ;;  %2726 = vrot.lane.b32.xlu1 %v4239_v53, %s4541_s20 }
 0x25d   : > { %v5789_v28 = vadd.f32 %v2085_v12, %v1465_v39  ;;  %v2087_v22 = vpop.f32.mrb[25].mxu0 }
 0x25e   : > { %v2088_v10 = vpop.f32.mrb[26].mxu0  ;;  %v5832_v22 = vpop.permute.xlu0 %2580 }
 0x25f   : > { %4244 = vtanh.f32 %v5789_v28  ;;  %v5795_v5 = vadd.f32 %v2088_v10, %v1466_v6  ;;  %v2090_v41 = vpop.f32.mrb[27].mxu0  ;;  %v5834_v10 = vpop.permute.xlu1 %2582 }
 0x261   : > { %v4241_v50 = vpop.eup %4240  ;;  %4246 = vtanh.f32 %v5795_v5 }
 0x262   : > { %2728 = vrot.lane.b32.xlu0 %v4241_v50, %s4541_s20 }
 0x263   : > { %v4243_v9 = vpop.eup %4242 }
 0x264   : > { %v2093_v44 = vpop.f32.mrb[28].mxu0  ;;  %v1747_v30 = vpop.f32.mrb[32].mxu1  ;;  %2730 = vrot.lane.b32.xlu1 %v4243_v9, %s4541_s20 }
 0x265   : > { %v5809_v4 = vadd.f32 %v2093_v44, %v1467_v21  ;;  %v1749_v45 = vpop.f32.mrb[33].mxu1  ;;  %v2095_v32 = vpop.f32.mrb[29].mxu0  ;;  %v3883_v57 = vadd.f32 %v5700_v29, %v1747_v30 }
 0x266   : > { %v1750_v61 = vpop.f32.mrb[34].mxu1  ;;  %v2096_v49 = vpop.f32.mrb[30].mxu0 }
 0x267   : > { %4248 = vtanh.f32 %v5809_v4  ;;  %v5813_v31 = vadd.f32 %v2096_v49, %v1468_v43  ;;  %v1752_v52 = vpop.f32.mrb[35].mxu1  ;;  %v2098_v2 = vpop.f32.mrb[31].mxu0  ;;  %v3885_v20 = vadd.f32 %v5700_v29, %v1750_v61 }
 0x269   : > { %v4245_v38 = vpop.eup %4244  ;;  %4250 = vtanh.f32 %v5813_v31 }
 0x26a   : > { %2732 = vrot.lane.b32.xlu0 %v4245_v38, %s4541_s20 }
 0x26b   : > { %v4247_v60 = vpop.eup %4246 }
 0x26c   : > { %v2101_v15 = vpop.f32.mrb[32].mxu0  ;;  %v1755_v59 = vpop.f32.mrb[36].mxu1  ;;  %2734 = vrot.lane.b32.xlu1 %v4247_v60, %s4541_s20 }
 0x26d   : > { %v5823_v48 = vadd.f32 %v3883_v57, %v2101_v15  ;;  %v1757_v58 = vpop.f32.mrb[37].mxu1  ;;  %v2103_v24 = vpop.f32.mrb[33].mxu0  ;;  %v3887_v6 = vadd.f32 %v5700_v29, %v1755_v59 }
 0x26e   : > { %v1758_v27 = vpop.f32.mrb[38].mxu1  ;;  %v2104_v25 = vpop.f32.mrb[34].mxu0 }
 0x26f   : > { %4252 = vtanh.f32 %v5823_v48  ;;  %v5827_v1 = vadd.f32 %v3885_v20, %v2104_v25  ;;  %v1760_v39 = vpop.f32.mrb[39].mxu1  ;;  %v2106_v53 = vpop.f32.mrb[35].mxu0  ;;  %v3889_v9 = vadd.f32 %v5700_v29, %v1758_v27 }
 0x270   : > { %v5846_v57 = vpop.permute.xlu0 %2584  ;;  %v5848_v60 = vpop.permute.xlu1 %2586 }
 0x271   : > { %v4249_v12 = vpop.eup %4248  ;;  %4254 = vtanh.f32 %v5827_v1 }
 0x272   : > { %2736 = vrot.lane.b32.xlu0 %v4249_v12, %s4541_s20 }
 0x273   : > { %v4251_v41 = vpop.eup %4250 }
 0x274   : > { %v2109_v50 = vpop.f32.mrb[36].mxu0  ;;  %v1763_v21 = vpop.f32.mrb[40].mxu1  ;;  %2738 = vrot.lane.b32.xlu1 %v4251_v41, %s4541_s20 }
 0x275   : > { %v5837_v44 = vadd.f32 %v3887_v6, %v2109_v50  ;;  %v1765_v30 = vpop.f32.mrb[41].mxu1  ;;  %v2111_v43 = vpop.f32.mrb[37].mxu0  ;;  %v3891_v38 = vadd.f32 %v5700_v29, %v1763_v21 }
 0x276   : > { %v1766_v45 = vpop.f32.mrb[42].mxu1  ;;  %v2112_v32 = vpop.f32.mrb[38].mxu0 }
 0x277   : > { %4256 = vtanh.f32 %v5837_v44  ;;  %v5841_v61 = vadd.f32 %v3889_v9, %v2112_v32  ;;  %v1768_v49 = vpop.f32.mrb[43].mxu1  ;;  %v2114_v52 = vpop.f32.mrb[39].mxu0  ;;  %v3893_v58 = vadd.f32 %v5700_v29, %v1766_v45 }
 0x278   : > { %v5860_v9 = vpop.permute.xlu0 %2588  ;;  %v5862_v30 = vpop.permute.xlu1 %2590 }
 0x279   : > { %v4253_v2 = vpop.eup %4252  ;;  %4258 = vtanh.f32 %v5841_v61  ;;  %6504 = vst [vmem:[#allocation6_spill] sm:$0xff] %v5862_v30 }
 0x27a   : > { %2740 = vrot.lane.b32.xlu0 %v4253_v2, %s4541_s20 }
 0x27b   : > { %v4255_v15 = vpop.eup %4254 }
 0x27c   : > { %v2117_v59 = vpop.f32.mrb[40].mxu0  ;;  %v1771_v20 = vpop.f32.mrb[44].mxu1  ;;  %2742 = vrot.lane.b32.xlu1 %v4255_v15, %s4541_s20 }
 0x27d   : > { %v5851_v24 = vadd.f32 %v3891_v38, %v2117_v59  ;;  %v1773_v27 = vpop.f32.mrb[45].mxu1  ;;  %v2119_v25 = vpop.f32.mrb[41].mxu0  ;;  %v3895_v21 = vadd.f32 %v5700_v29, %v1771_v20 }
 0x27e   : > { %v1774_v39 = vpop.f32.mrb[46].mxu1  ;;  %v2120_v53 = vpop.f32.mrb[42].mxu0 }
 0x27f   : > { %4260 = vtanh.f32 %v5851_v24  ;;  %v5855_v12 = vadd.f32 %v3893_v58, %v2120_v53  ;;  %v1776_v6 = vpop.f32.mrb[47].mxu1  ;;  %v2122_v41 = vpop.f32.mrb[43].mxu0  ;;  %v3897_v49 = vadd.f32 %v5700_v29, %v1774_v39  ;;  %v3785_v53 = vmul.f32 -1.442695, %v5706_v3 }
 0x280   : > { %v5875_v6 = vpop.permute.xlu0 %2592  ;;  %v5877_v41 = vpop.permute.xlu1 %2594 }
 0x281   : > { %v4257_v50 = vpop.eup %4256  ;;  %4262 = vtanh.f32 %v5855_v12  ;;  %6505 = vst [vmem:[#allocation7_spill] sm:$0xff] %v5875_v6  ;;  %6506 = vst [vmem:[#allocation8_spill] sm:$0xff] %v5877_v41 }
 0x282   : > { %2744 = vrot.lane.b32.xlu0 %v4257_v50, %s4541_s20 }
 0x283   : > { %v4259_v43 = vpop.eup %4258 }
 0x284   : > { %v2125_v45 = vpop.f32.mrb[44].mxu0  ;;  %v1779_v32 = vpop.f32.mrb[48].mxu1  ;;  %2746 = vrot.lane.b32.xlu1 %v4259_v43, %s4541_s20 }
 0x285   : > { %v5865_v52 = vadd.f32 %v3895_v21, %v2125_v45  ;;  %v1781_v2 = vpop.f32.mrb[49].mxu1  ;;  %v2127_v38 = vpop.f32.mrb[45].mxu0  ;;  %v3899_v39 = vadd.f32 %v5700_v29, %v1779_v32 }
 0x286   : > { %v1782_v15 = vpop.f32.mrb[50].mxu1  ;;  %v2128_v59 = vpop.f32.mrb[46].mxu0 }
 0x287   : > { %4264 = vtanh.f32 %v5865_v52  ;;  %v5869_v20 = vadd.f32 %v3897_v49, %v2128_v59  ;;  %v1784_v58 = vpop.f32.mrb[51].mxu1  ;;  %v2130_v27 = vpop.f32.mrb[47].mxu0  ;;  %v3901_v45 = vadd.f32 %v5700_v29, %v1782_v15  ;;  %v3787_v15 = vmul.f32 -1.442695, %v5714_v13 }
 0x289   : > { %v4261_v25 = vpop.eup %4260  ;;  %4266 = vtanh.f32 %v5869_v20 }
 0x28a   : > { %2748 = vrot.lane.b32.xlu0 %v4261_v25, %s4541_s20  ;;  %4268 = vpow2.f32 %v3785_v53  ;;  %v3786_v25 = vmul.f32 -1.442695, %v5709_v26  ;;  %v5891_v53 = vpop.permute.xlu0 %2596 }
 0x28b   : > { %v4263_v50 = vpop.eup %4262  ;;  %6507 = vst [vmem:[#allocation9_spill] sm:$0xff] %v5891_v53  ;;  %v3788_v53 = vmul.f32 -1.442695, %v5717_v42 }
 0x28c   : > { %v2133_v21 = vpop.f32.mrb[48].mxu0  ;;  %v1787_v43 = vpop.f32.mrb[52].mxu1  ;;  %2750 = vrot.lane.b32.xlu1 %v4263_v50, %s4541_s20 }
 0x28d   : > { %v5880_v49 = vadd.f32 %v3899_v39, %v2133_v21  ;;  %v1789_v3 = vpop.f32.mrb[53].mxu1  ;;  %v2135_v2 = vpop.f32.mrb[49].mxu0  ;;  %v3903_v39 = vadd.f32 %v5700_v29, %v1787_v43 }
 0x28e   : > { %v1790_v38 = vpop.f32.mrb[54].mxu1  ;;  %v2136_v59 = vpop.f32.mrb[50].mxu0 }
 0x28f   : > { %4270 = vtanh.f32 %v5880_v49  ;;  %v5884_v32 = vadd.f32 %v3901_v45, %v2136_v59  ;;  %v1792_v58 = vpop.f32.mrb[55].mxu1  ;;  %v2138_v27 = vpop.f32.mrb[51].mxu0  ;;  %v3905_v2 = vadd.f32 %v5700_v29, %v1790_v38 }
 0x290   : > { %v5893_v50 = vpop.permute.xlu1 %2598  ;;  %v5905_v38 = vpop.permute.xlu0 %2600 }
 0x291   : > { %v4265_v41 = vpop.eup %4264  ;;  %4272 = vtanh.f32 %v5884_v32  ;;  %6508 = vst [vmem:[#allocation10_spill] sm:$0xff] %v5893_v50  ;;  %6509 = vst [vmem:[#allocation11_spill] sm:$0xff] %v5905_v38 }
 0x292   : > { %2752 = vrot.lane.b32.xlu0 %v4265_v41, %s4541_s20  ;;  %4274 = vpow2.f32 %v3786_v25 }
 0x293   : > { %v4267_v21 = vpop.eup %4266  ;;  %4276 = vpow2.f32 %v3787_v15 }
 0x294   : > { %v2141_v45 = vpop.f32.mrb[52].mxu0  ;;  %v1795_v3 = vpop.f32.mrb[56].mxu1  ;;  %2754 = vrot.lane.b32.xlu1 %v4267_v21, %s4541_s20 }
 0x295   : > { %v5896_v26 = vadd.f32 %v3903_v39, %v2141_v45  ;;  %v1797_v13 = vpop.f32.mrb[57].mxu1  ;;  %v2143_v59 = vpop.f32.mrb[53].mxu0  ;;  %v3907_v15 = vadd.f32 %v5700_v29, %v1795_v3 }
 0x296   : > { %v1798_v41 = vpop.f32.mrb[58].mxu1  ;;  %v2144_v58 = vpop.f32.mrb[54].mxu0 }
 0x297   : > { %4278 = vtanh.f32 %v5896_v26  ;;  %v5900_v43 = vadd.f32 %v3905_v2, %v2144_v58  ;;  %v1800_v27 = vpop.f32.mrb[59].mxu1  ;;  %v2146_v50 = vpop.f32.mrb[55].mxu0  ;;  %v3909_v42 = vadd.f32 %v5700_v29, %v1798_v41 }
 0x298   : > { %v4269_v25 = vpop.eup %4268  ;;  %v5908_v39 = vpop.permute.xlu1 %2602  ;;  %v3789_v50 = vmul.f32 -1.442695, %v5724_v33  ;;  %v3790_v33 = vmul.f32 -1.442695, %v5727_v40  ;;  %v3791_v40 = vmul.f32 -1.442695, %v5733_v0 }
 0x299   : > { %v4271_v6 = vpop.eup %4270  ;;  %4280 = vtanh.f32 %v5900_v43  ;;  %6510 = vst [vmem:[#allocation12_spill] sm:$0xff] %v5908_v39  ;;  %v2356_v45 = vadd.f32 1.0, %v4269_v25  ;;  %v5919_v41 = vpop.permute.xlu0 %2604 }
 0x29a   : > { %2756 = vrot.lane.b32.xlu0 %v4271_v6, %s4541_s20  ;;  %4282 = vpow2.f32 %v3788_v53 }
 0x29b   : > { %v4273_v21 = vpop.eup %4272 }
 0x29c   : > { %v2149_v2 = vpop.f32.mrb[56].mxu0  ;;  %v1803_v13 = vpop.f32.mrb[60].mxu1  ;;  %2758 = vrot.lane.b32.xlu1 %v4273_v21, %s4541_s20 }
 0x29d   : > { %v5912_v59 = vadd.f32 %v3907_v15, %v2149_v2  ;;  %v1805_v6 = vpop.f32.mrb[61].mxu1  ;;  %v2151_v58 = vpop.f32.mrb[57].mxu0  ;;  %v3911_v21 = vadd.f32 %v5700_v29, %v1803_v13 }
 0x29e   : > { %v4275_v27 = vpop.eup %4274  ;;  %v1806_v38 = vpop.f32.mrb[62].mxu1 }
 0x29f   : > { %v2152_v3 = vpop.f32.mrb[58].mxu0  ;;  %4284 = vtanh.f32 %v5912_v59  ;;  %v1808_v53 = vpop.f32.mrb[63].mxu1  ;;  %v2357_v2 = vadd.f32 1.0, %v4275_v27 }
 0x2a0   : > { %v5916_v39 = vadd.f32 %v3909_v42, %v2152_v3  ;;  %v2154_v25 = vpop.f32.mrb[59].mxu0  ;;  %v4277_v30 = vpop.eup %4276  ;;  %4286 = vrcp.f32 %v2356_v45  ;;  %v3913_v45 = vadd.f32 %v5700_v29, %v1806_v38 }
 0x2a1   : > { %v4279_v15 = vpop.eup %4278  ;;  %4288 = vpow2.f32 %v3789_v50  ;;  %v5924_v6 = vpop.permute.xlu1 %2606  ;;  %v2358_v58 = vadd.f32 1.0, %v4277_v30 }
 0x2a2   : > { %4290 = vtanh.f32 %v5916_v39  ;;  %2760 = vrot.lane.b32.xlu0 %v4279_v15, %s4541_s20  ;;  %v5931_v15 = vpop.permute.xlu0 %2608 }
 0x2a3   : > { %v4281_v42 = vpop.eup %4280  ;;  %4292 = vpow2.f32 %v3790_v33  ;;  %v3792_v33 = vmul.f32 -1.442695, %v5737_v47 }
 0x2a4   : > { %v2157_v3 = vpop.f32.mrb[60].mxu0  ;;  %4294 = vrcp.f32 %v2357_v2  ;;  %2762 = vrot.lane.b32.xlu1 %v4281_v42, %s4541_s20  ;;  %v4283_v27 = vpop.eup %4282 }
 0x2a5   : > { %v5928_v53 = vadd.f32 %v3911_v21, %v2157_v3  ;;  %v2159_v50 = vpop.f32.mrb[61].mxu0  ;;  %v2359_v2 = vadd.f32 1.0, %v4283_v27  ;;  %v5937_v29 = vpop.permute.xlu1 %2610 }
 0x2a6   : > { %v2160_v25 = vpop.f32.mrb[62].mxu0  ;;  %6511 = vst [vmem:[#allocation13_spill] sm:$0xff] %v5937_v29 }
 0x2a7   : > { %4296 = vtanh.f32 %v5928_v53  ;;  %v5934_v13 = vadd.f32 %v3913_v45, %v2160_v25  ;;  %v2162_v30 = vpop.f32.mrb[63].mxu0  ;;  %v3794_v25 = vmul.f32 -1.442695, %v5755_v35 }
 0x2a8   : > { %4298 = vrcp.f32 %v2358_v58  ;;  %v3793_v58 = vmul.f32 -1.442695, %v5749_v11 }
 0x2a9   : > { %v4285_v0 = vpop.eup %4284  ;;  %4300 = vpow2.f32 %v3791_v40 }
 0x2aa   : > { %v5939_v38 = vpop.eup %4286  ;;  %4302 = vtanh.f32 %v5934_v13  ;;  %2764 = vrot.lane.b32.xlu0 %v4285_v0, %s4541_s20 }
 0x2ab   : > { %v4289_v21 = vpop.eup %4288  ;;  %4304 = vpow2.f32 %v3792_v33 }
 0x2ac   : > { %v4291_v42 = vpop.eup %4290  ;;  %v2709_v3 = vpop.permute.xlu0 %2708  ;;  %4306 = vrcp.f32 %v2359_v2  ;;  %v2360_v45 = vadd.f32 1.0, %v4289_v21 }
 0x2ad   : > { %v2804_v47 = vmul.f32 %v5939_v38, %v2709_v3  ;;  %2766 = vrot.lane.b32.xlu1 %v4291_v42, %s4541_s20  ;;  %v4293_v40 = vpop.eup %4292  ;;  %4308 = vpow2.f32 %v3793_v58  ;;  %v3795_v3 = vmul.f32 -1.442695, %v5769_v7 }
 0x2ae   : > { %v5946_v50 = vpop.eup %4294  ;;  %v2711_v27 = vpop.permute.xlu1 %2710  ;;  %v2361_v0 = vadd.f32 1.0, %v4293_v40  ;;  %4310 = vrcp.f32 %v2360_v45  ;;  %v3796_v45 = vmul.f32 -1.442695, %v5775_v16 }
 0x2af   : > { %2868 = vrot.lane.b32.xlu0 %v2804_v47, %s4541_s20  ;;  %v2805_v30 = vmul.f32 %v5946_v50, %v2711_v27  ;;  %4312 = vpow2.f32 %v3794_v25 }
 0x2b0   : > { %4314 = vrcp.f32 %v2361_v0 }
 0x2b1   : > { %v4297_v33 = vpop.eup %4296  ;;  %2870 = vrot.lane.b32.xlu1 %v2805_v30, %s4541_s20  ;;  %4316 = vpow2.f32 %v3795_v3  ;;  %v3798_v3 = vmul.f32 -1.442695, %v5795_v5 }
 0x2b2   : > { %v5951_v2 = vpop.eup %4298 }
 0x2b3   : > { %v4301_v11 = vpop.eup %4300  ;;  %2768 = vrot.lane.b32.xlu0 %v4297_v33, %s4541_s20 }
 0x2b4   : > { %v4303_v21 = vpop.eup %4302  ;;  %v2713_v42 = vpop.permute.xlu0 %2712  ;;  %v2362_v27 = vadd.f32 1.0, %v4301_v11  ;;  %v3797_v11 = vmul.f32 -1.442695, %v5789_v28 }
 0x2b5   : > { %v2806_v35 = vmul.f32 %v5951_v2, %v2713_v42  ;;  %v4305_v47 = vpop.eup %4304  ;;  %2770 = vrot.lane.b32.xlu1 %v4303_v21, %s4541_s20 }
 0x2b6   : > { %v5958_v58 = vpop.eup %4306  ;;  %v2715_v40 = vpop.permute.xlu1 %2714  ;;  %v2363_v25 = vadd.f32 1.0, %v4305_v47  ;;  %4318 = vrcp.f32 %v2362_v27 }
 0x2b7   : > { %2872 = vrot.lane.b32.xlu0 %v2806_v35, %s4541_s20  ;;  %v2807_v30 = vmul.f32 %v5958_v58, %v2715_v40  ;;  %v4309_v7 = vpop.eup %4308  ;;  %4320 = vpow2.f32 %v3796_v45 }
 0x2b8   : > { %v5964_v33 = vpop.eup %4310  ;;  %4322 = vrcp.f32 %v2363_v25  ;;  %v2364_v35 = vadd.f32 1.0, %v4309_v7  ;;  %v3799_v25 = vmul.f32 -1.442695, %v5809_v4 }
 0x2b9   : > { %2874 = vrot.lane.b32.xlu1 %v2807_v30, %s4541_s20  ;;  %v4313_v42 = vpop.eup %4312  ;;  %4324 = vpow2.f32 %v3797_v11  ;;  %v3800_v11 = vmul.f32 -1.442695, %v5813_v31 }
 0x2ba   : > { %v5968_v16 = vpop.eup %4314  ;;  %v2365_v27 = vadd.f32 1.0, %v4313_v42  ;;  %4326 = vrcp.f32 %v2364_v35 }
 0x2bb   : > { %v4317_v45 = vpop.eup %4316  ;;  %4328 = vpow2.f32 %v3798_v3 }
 0x2bc   : > { %v2717_v0 = vpop.permute.xlu0 %2716  ;;  %4330 = vrcp.f32 %v2365_v27  ;;  %v3801_v27 = vmul.f32 -1.442695, %v5823_v48 }
 0x2bd   : > { %v2808_v21 = vmul.f32 %v5964_v33, %v2717_v0  ;;  %4332 = vpow2.f32 %v3799_v25  ;;  %v3802_v25 = vmul.f32 -1.442695, %v5827_v1 }
 0x2be   : > { %v2719_v40 = vpop.permute.xlu1 %2718 }
 0x2bf   : > { %2876 = vrot.lane.b32.xlu0 %v2808_v21, %s4541_s20  ;;  %v2809_v47 = vmul.f32 %v5968_v16, %v2719_v40  ;;  %v2366_v21 = vadd.f32 1.0, %v4317_v45 }
 0x2c0   : > { %v5974_v28 = vpop.eup %4318 }
 0x2c1   : > { %2878 = vrot.lane.b32.xlu1 %v2809_v47, %s4541_s20  ;;  %v4321_v0 = vpop.eup %4320  ;;  %4334 = vrcp.f32 %v2366_v21 }
 0x2c2   : > { %v5978_v5 = vpop.eup %4322  ;;  %v2367_v35 = vadd.f32 1.0, %v4321_v0  ;;  %4336 = vpow2.f32 %v3800_v11 }
 0x2c3   : > { %v4325_v3 = vpop.eup %4324 }
 0x2c4   : > { %v2721_v30 = vpop.permute.xlu0 %2720  ;;  %v5984_v4 = vpop.eup %4326  ;;  %4338 = vrcp.f32 %v2367_v35  ;;  %v3803_v35 = vmul.f32 -1.442695, %v5837_v44 }
 0x2c5   : > { %v2810_v7 = vmul.f32 %v5974_v28, %v2721_v30  ;;  %v4329_v30 = vpop.eup %4328  ;;  %4340 = vpow2.f32 %v3801_v27  ;;  %v3804_v27 = vmul.f32 -1.442695, %v5841_v61 }
 0x2c6   : > { %v2723_v40 = vpop.permute.xlu1 %2722  ;;  %v5988_v31 = vpop.eup %4330  ;;  %v2369_v21 = vadd.f32 1.0, %v4329_v30 }
 0x2c7   : > { %2880 = vrot.lane.b32.xlu0 %v2810_v7, %s4541_s20  ;;  %v2811_v42 = vmul.f32 %v5978_v5, %v2723_v40  ;;  %v2368_v7 = vadd.f32 1.0, %v4325_v3  ;;  %v4333_v11 = vpop.eup %4332 }
 0x2c9   : > { %2882 = vrot.lane.b32.xlu1 %v2811_v42, %s4541_s20  ;;  %4342 = vrcp.f32 %v2368_v7 }
 0x2ca   : > { %4344 = vpow2.f32 %v3802_v25 }
 0x2cb   : > { %v5994_v48 = vpop.eup %4334  ;;  %4346 = vrcp.f32 %v2369_v21  ;;  %v3805_v21 = vmul.f32 -1.442695, %v5851_v24 }
 0x2cc   : > { %v2725_v47 = vpop.permute.xlu0 %2724  ;;  %4348 = vpow2.f32 %v3803_v35  ;;  %v3806_v35 = vmul.f32 -1.442695, %v5855_v12 }
 0x2cd   : > { %v2812_v45 = vmul.f32 %v5984_v4, %v2725_v47  ;;  %v4337_v47 = vpop.eup %4336 }
 0x2ce   : > { %v2727_v40 = vpop.permute.xlu1 %2726  ;;  %v5998_v1 = vpop.eup %4338  ;;  %v2371_v7 = vadd.f32 1.0, %v4337_v47 }
 0x2cf   : > { %2884 = vrot.lane.b32.xlu0 %v2812_v45, %s4541_s20  ;;  %v2813_v0 = vmul.f32 %v5988_v31, %v2727_v40  ;;  %v2370_v45 = vadd.f32 1.0, %v4333_v11  ;;  %v4341_v25 = vpop.eup %4340 }
 0x2d1   : > { %2886 = vrot.lane.b32.xlu1 %v2813_v0, %s4541_s20  ;;  %4350 = vrcp.f32 %v2370_v45 }
 0x2d2   : > { %4352 = vpow2.f32 %v3804_v27 }
 0x2d3   : > { %v6004_v44 = vpop.eup %4342  ;;  %4354 = vrcp.f32 %v2371_v7  ;;  %v3807_v7 = vmul.f32 -1.442695, %v5865_v52 }
 0x2d4   : > { %v2729_v42 = vpop.permute.xlu0 %2728  ;;  %4356 = vpow2.f32 %v3805_v21  ;;  %v3808_v21 = vmul.f32 -1.442695, %v5869_v20 }
 0x2d5   : > { %v2814_v3 = vmul.f32 %v5994_v48, %v2729_v42  ;;  %v4345_v42 = vpop.eup %4344 }
 0x2d6   : > { %v2731_v40 = vpop.permute.xlu1 %2730  ;;  %v6008_v61 = vpop.eup %4346  ;;  %v2373_v45 = vadd.f32 1.0, %v4345_v42 }
 0x2d7   : > { %2888 = vrot.lane.b32.xlu0 %v2814_v3, %s4541_s20  ;;  %v2815_v30 = vmul.f32 %v5998_v1, %v2731_v40  ;;  %v2372_v3 = vadd.f32 1.0, %v4341_v25  ;;  %v4349_v27 = vpop.eup %4348 }
 0x2d9   : > { %2890 = vrot.lane.b32.xlu1 %v2815_v30, %s4541_s20  ;;  %4358 = vrcp.f32 %v2372_v3 }
 0x2da   : > { %4360 = vpow2.f32 %v3806_v35 }
 0x2db   : > { %v6014_v24 = vpop.eup %4350  ;;  %4362 = vrcp.f32 %v2373_v45  ;;  %v3809_v45 = vmul.f32 -1.442695, %v5880_v49 }
 0x2dc   : > { %v2733_v0 = vpop.permute.xlu0 %2732  ;;  %4364 = vpow2.f32 %v3807_v7  ;;  %v3810_v7 = vmul.f32 -1.442695, %v5884_v32 }
 0x2dd   : > { %v2816_v11 = vmul.f32 %v6004_v44, %v2733_v0  ;;  %v4353_v0 = vpop.eup %4352 }
 0x2de   : > { %v2735_v40 = vpop.permute.xlu1 %2734  ;;  %v6018_v12 = vpop.eup %4354  ;;  %v2375_v3 = vadd.f32 1.0, %v4353_v0 }
 0x2df   : > { %2892 = vrot.lane.b32.xlu0 %v2816_v11, %s4541_s20  ;;  %v2817_v47 = vmul.f32 %v6008_v61, %v2735_v40  ;;  %v2374_v11 = vadd.f32 1.0, %v4349_v27  ;;  %v4357_v35 = vpop.eup %4356 }
 0x2e1   : > { %2894 = vrot.lane.b32.xlu1 %v2817_v47, %s4541_s20  ;;  %4366 = vrcp.f32 %v2374_v11 }
 0x2e2   : > { %4368 = vpow2.f32 %v3808_v21 }
 0x2e3   : > { %v6024_v52 = vpop.eup %4358  ;;  %4370 = vrcp.f32 %v2375_v3 }
 0x2e4   : > { %v2737_v30 = vpop.permute.xlu0 %2736  ;;  %4372 = vpow2.f32 %v3809_v45 }
 0x2e5   : > { %v2818_v25 = vmul.f32 %v6014_v24, %v2737_v30  ;;  %v4361_v30 = vpop.eup %4360 }
 0x2e6   : > { %v2739_v40 = vpop.permute.xlu1 %2738  ;;  %v6028_v20 = vpop.eup %4362  ;;  %v2377_v11 = vadd.f32 1.0, %v4361_v30  ;;  %v3812_v30 = vmul.f32 -1.442695, %v5900_v43 }
 0x2e7   : > { %2896 = vrot.lane.b32.xlu0 %v2818_v25, %s4541_s20  ;;  %v2819_v42 = vmul.f32 %v6018_v12, %v2739_v40  ;;  %v2376_v25 = vadd.f32 1.0, %v4357_v35  ;;  %v4365_v21 = vpop.eup %4364 }
 0x2e9   : > { %2898 = vrot.lane.b32.xlu1 %v2819_v42, %s4541_s20  ;;  %4374 = vrcp.f32 %v2376_v25  ;;  %v3811_v42 = vmul.f32 -1.442695, %v5896_v26 }
 0x2ea   : > { %4376 = vpow2.f32 %v3810_v7 }
 0x2eb   : > { %v6034_v49 = vpop.eup %4366  ;;  %4378 = vrcp.f32 %v2377_v11  ;;  %v3813_v11 = vmul.f32 -1.442695, %v5912_v59 }
 0x2ec   : > { %v2741_v47 = vpop.permute.xlu0 %2740  ;;  %4380 = vpow2.f32 %v3811_v42 }
 0x2ed   : > { %v2820_v27 = vmul.f32 %v6024_v52, %v2741_v47  ;;  %v4369_v47 = vpop.eup %4368 }
 0x2ee   : > { %v2743_v40 = vpop.permute.xlu1 %2742  ;;  %v6038_v32 = vpop.eup %4370 }
 0x2ef   : > { %2900 = vrot.lane.b32.xlu0 %v2820_v27, %s4541_s20  ;;  %v2821_v0 = vmul.f32 %v6028_v20, %v2743_v40  ;;  %v2378_v27 = vadd.f32 1.0, %v4365_v21  ;;  %v2379_v40 = vadd.f32 1.0, %v4369_v47  ;;  %v4373_v26 = vpop.eup %4372  ;;  %v3814_v47 = vmul.f32 -1.442695, %v5916_v39 }
 0x2f1   : > { %2902 = vrot.lane.b32.xlu1 %v2821_v0, %s4541_s20  ;;  %4382 = vrcp.f32 %v2378_v27 }
 0x2f2   : > { %4384 = vpow2.f32 %v3812_v30 }
 0x2f3   : > { %v6044_v7 = vpop.eup %4374  ;;  %4386 = vrcp.f32 %v2379_v40 }
 0x2f4   : > { %v2745_v3 = vpop.permute.xlu0 %2744  ;;  %v4377_v21 = vpop.eup %4376  ;;  %4388 = vpow2.f32 %v3813_v11 }
 0x2f5   : > { %v2822_v35 = vmul.f32 %v6034_v49, %v2745_v3  ;;  %v2380_v3 = vadd.f32 1.0, %v4373_v26  ;;  %v2381_v30 = vadd.f32 1.0, %v4377_v21 }
 0x2f6   : > { %v2747_v45 = vpop.permute.xlu1 %2746 }
 0x2f7   : > { %2904 = vrot.lane.b32.xlu0 %v2822_v35, %s4541_s20  ;;  %v2823_v25 = vmul.f32 %v6038_v32, %v2747_v45  ;;  %v6048_v35 = vpop.eup %4378  ;;  %4390 = vrcp.f32 %v2380_v3  ;;  %v3816_v3 = vmul.f32 -1.442695, %v5934_v13 }
 0x2f8   : > { %v4381_v45 = vpop.eup %4380  ;;  %4392 = vpow2.f32 %v3814_v47 }
 0x2f9   : > { %2906 = vrot.lane.b32.xlu1 %v2823_v25, %s4541_s20  ;;  %4394 = vrcp.f32 %v2381_v30  ;;  %v2382_v26 = vadd.f32 1.0, %v4381_v45 }
 0x2fb   : > { %v6054_v59 = vpop.eup %4382  ;;  %4396 = vrcp.f32 %v2382_v26 }
 0x2fc   : > { %v2749_v0 = vpop.permute.xlu0 %2748  ;;  %v4385_v40 = vpop.eup %4384 }
 0x2fd   : > { %v2824_v43 = vmul.f32 %v6044_v7, %v2749_v0  ;;  %v6058_v39 = vpop.eup %4386  ;;  %v2383_v11 = vadd.f32 1.0, %v4385_v40 }
 0x2fe   : > { %v2751_v42 = vpop.permute.xlu1 %2750  ;;  %v4389_v47 = vpop.eup %4388 }
 0x2ff   : > { %2908 = vrot.lane.b32.xlu0 %v2824_v43, %s4541_s20  ;;  %v2825_v27 = vmul.f32 %v6048_v35, %v2751_v42  ;;  %v3815_v43 = vmul.f32 -1.442695, %v5928_v53 }
 0x301   : > { %2910 = vrot.lane.b32.xlu1 %v2825_v27, %s4541_s20  ;;  %4398 = vpow2.f32 %v3815_v43  ;;  %v6064_v27 = vpop.eup %4390 }
 0x302   : > { %4400 = vrcp.f32 %v2383_v11  ;;  %v4393_v45 = vpop.eup %4392 }
 0x303   : > { %4402 = vpow2.f32 %v3816_v3  ;;  %v2385_v26 = vadd.f32 1.0, %v4393_v45 }
 0x304   : > { %v2753_v25 = vpop.permute.xlu0 %2752 }
 0x305   : > { %v2826_v0 = vmul.f32 %v6054_v59, %v2753_v25  ;;  %v2384_v25 = vadd.f32 1.0, %v4389_v47 }
 0x306   : > { %v2755_v42 = vpop.permute.xlu1 %2754 }
 0x307   : > { %2912 = vrot.lane.b32.xlu0 %v2826_v0, %s4541_s20  ;;  %v2827_v21 = vmul.f32 %v6058_v39, %v2755_v42  ;;  %v6067_v0 = vpop.eup %4394  ;;  %4404 = vrcp.f32 %v2384_v25 }
 0x308   : > { %v6072_v43 = vpop.eup %4396  ;;  %4406 = vrcp.f32 %v2385_v26 }
 0x309   : > { %2914 = vrot.lane.b32.xlu1 %v2827_v21, %s4541_s20 }
 0x30b   : > { %v4399_v42 = vpop.eup %4398 }
 0x30c   : > { %v2757_v30 = vpop.permute.xlu0 %2756  ;;  %v6075_v3 = vpop.eup %4400 }
 0x30d   : > { %v2828_v53 = vmul.f32 %v6064_v27, %v2757_v30  ;;  %v4403_v47 = vpop.eup %4402  ;;  %v2386_v30 = vadd.f32 1.0, %v4399_v42  ;;  %v2644_v42 = vmul.f32 %v5939_v38, %v5740_v23 }
 0x30e   : > { %v2759_v40 = vpop.permute.xlu1 %2758  ;;  %v2387_v45 = vadd.f32 1.0, %v4403_v47 }
 0x30f   : > { %2916 = vrot.lane.b32.xlu0 %v2828_v53, %s4541_s20  ;;  %v2829_v13 = vmul.f32 %v6067_v0, %v2759_v40  ;;  %4408 = vrcp.f32 %v2386_v30  ;;  %v2645_v30 = vmul.f32 %v5946_v50, %v5745_v37 }
 0x310   : > { %4410 = vrcp.f32 %v2387_v45 }
 0x311   : > { %2918 = vrot.lane.b32.xlu1 %v2829_v13, %s4541_s20  ;;  %v6080_v25 = vpop.eup %4404 }
 0x312   : > { %v6083_v26 = vpop.eup %4406 }
 0x314   : > { %v2761_v11 = vpop.permute.xlu0 %2760 }
 0x315   : > { %v2830_v21 = vmul.f32 %v6072_v43, %v2761_v11 }
 0x316   : > { %v2763_v29 = vpop.permute.xlu1 %2762 }
 0x317   : > { %2920 = vrot.lane.b32.xlu0 %v2830_v21, %s4541_s20  ;;  %v2831_v53 = vmul.f32 %v6075_v3, %v2763_v29 }
 0x319   : > { %2922 = vrot.lane.b32.xlu1 %v2831_v53, %s4541_s20  ;;  %v6093_v45 = vpop.eup %4408 }
 0x31c   : > { %v2765_v40 = vpop.permute.xlu0 %2764 }
 0x31d   : > { %v2832_v13 = vmul.f32 %v6080_v25, %v2765_v40 }
 0x31f   : > { %v2767_v11 = vpop.permute.xlu1 %2766  ;;  %2924 = vrot.lane.b32.xlu0 %v2832_v13, %s4541_s20 }
 0x320   : > { %v2833_v29 = vmul.f32 %v6083_v26, %v2767_v11  ;;  %v6097_v11 = vpop.eup %4410 }
 0x321   : > { %v2869_v21 = vpop.permute.xlu0 %2868 }
 0x322   : > { %v2964_v47 = vadd.f32 %v2869_v21, %v2644_v42  ;;  %2926 = vrot.lane.b32.xlu1 %v2833_v29, %s4541_s20  ;;  %v2646_v42 = vmul.f32 %v5951_v2, %v5752_v17  ;;  %v2648_v17 = vmul.f32 %v5964_v33, %v5761_v18  ;;  %v2650_v18 = vmul.f32 %v5974_v28, %v5772_v46 }
 0x323   : > { %v2871_v53 = vpop.permute.xlu1 %2870  ;;  %v2652_v46 = vmul.f32 %v5984_v4, %v5781_v55  ;;  %v2654_v55 = vmul.f32 %v5994_v48, %v5792_v62  ;;  %v2656_v62 = vmul.f32 %v6004_v44, %v5803_v36  ;;  %v2658_v36 = vmul.f32 %v6014_v24, %v5818_v56 }
 0x324   : > { %4412 = vtanh.f32 %v2964_v47  ;;  %3380 = vrot.lane.b32.xlu0 %v2964_v47, %s4543_s9  ;;  %v2965_v40 = vadd.f32 %v2871_v53, %v2645_v30  ;;  %v2647_v30 = vmul.f32 %v5958_v58, %v5757_v8  ;;  %v2649_v8 = vmul.f32 %v5968_v16, %v5765_v63 }
 0x325   : > { %v2769_v13 = vpop.permute.xlu0 %2768  ;;  %v2651_v63 = vmul.f32 %v5978_v5, %v5777_v51  ;;  %v2653_v51 = vmul.f32 %v5988_v31, %v5785_v34  ;;  %v2655_v34 = vmul.f32 %v5998_v1, %v5797_v14  ;;  %v2657_v14 = vmul.f32 %v6008_v61, %v5805_v54 }
 0x326   : > { %v2834_v23 = vmul.f32 %v6093_v45, %v2769_v13  ;;  %4414 = vtanh.f32 %v2965_v40  ;;  %3382 = vrot.lane.b32.xlu1 %v2965_v40, %s4543_s9  ;;  %v2659_v54 = vmul.f32 %v6018_v12, %v5820_v19  ;;  %v2660_v56 = vmul.f32 %v6024_v52, %v5832_v22 }
 0x327   : > { %v2771_v37 = vpop.permute.xlu1 %2770  ;;  %v2661_v19 = vmul.f32 %v6028_v20, %v5834_v10  ;;  %v2662_v22 = vmul.f32 %v6034_v49, %v5846_v57  ;;  %v2663_v10 = vmul.f32 %v6038_v32, %v5848_v60  ;;  %v2664_v57 = vmul.f32 %v6044_v7, %v5860_v9  ;;  %v6512_v60 = vld [vmem:[#allocation6_spill] sm:$0xff]  ;;  %v6513_v9 = vld [vmem:[#allocation7_spill] sm:$0xff] }
 0x328   : > { %2928 = vrot.lane.b32.xlu0 %v2834_v23, %s4541_s20  ;;  %v2835_v29 = vmul.f32 %v6097_v11, %v2771_v37 }
 0x329   : > { %v2873_v21 = vpop.permute.xlu0 %2872 }
 0x32a   : > { %v2966_v47 = vadd.f32 %v2873_v21, %v2646_v42  ;;  %2930 = vrot.lane.b32.xlu1 %v2835_v29, %s4541_s20 }
 0x32b   : > { %v2875_v53 = vpop.permute.xlu1 %2874 }
 0x32c   : > { %4416 = vtanh.f32 %v2966_v47  ;;  %3384 = vrot.lane.b32.xlu0 %v2966_v47, %s4543_s9  ;;  %v2967_v40 = vadd.f32 %v2875_v53, %v2647_v30 }
 0x32e   : > { %v4413_v13 = vpop.eup %4412  ;;  %4418 = vtanh.f32 %v2967_v40  ;;  %3386 = vrot.lane.b32.xlu1 %v2967_v40, %s4543_s9 }
 0x330   : > { %3060 = vrot.lane.b32.xlu0 %v4413_v13, %s4541_s20  ;;  %v4415_v23 = vpop.eup %4414 }
 0x331   : > { %v2877_v42 = vpop.permute.xlu0 %2876 }
 0x332   : > { %v2968_v37 = vadd.f32 %v2877_v42, %v2648_v17  ;;  %3062 = vrot.lane.b32.xlu1 %v4415_v23, %s4541_s20 }
 0x333   : > { %v2879_v29 = vpop.permute.xlu1 %2878 }
 0x334   : > { %4420 = vtanh.f32 %v2968_v37  ;;  %3388 = vrot.lane.b32.xlu0 %v2968_v37, %s4543_s9  ;;  %v2969_v21 = vadd.f32 %v2879_v29, %v2649_v8 }
 0x336   : > { %v4417_v47 = vpop.eup %4416  ;;  %4422 = vtanh.f32 %v2969_v21  ;;  %3390 = vrot.lane.b32.xlu1 %v2969_v21, %s4543_s9 }
 0x338   : > { %3064 = vrot.lane.b32.xlu0 %v4417_v47, %s4541_s20  ;;  %v4419_v30 = vpop.eup %4418 }
 0x339   : > { %v2881_v53 = vpop.permute.xlu0 %2880 }
 0x33a   : > { %v2970_v40 = vadd.f32 %v2881_v53, %v2650_v18  ;;  %3066 = vrot.lane.b32.xlu1 %v4419_v30, %s4541_s20 }
 0x33b   : > { %v2883_v13 = vpop.permute.xlu1 %2882 }
 0x33c   : > { %4424 = vtanh.f32 %v2970_v40  ;;  %3392 = vrot.lane.b32.xlu0 %v2970_v40, %s4543_s9  ;;  %v2971_v17 = vadd.f32 %v2883_v13, %v2651_v63 }
 0x33e   : > { %v4421_v23 = vpop.eup %4420  ;;  %4426 = vtanh.f32 %v2971_v17  ;;  %3394 = vrot.lane.b32.xlu1 %v2971_v17, %s4543_s9 }
 0x340   : > { %3068 = vrot.lane.b32.xlu0 %v4421_v23, %s4541_s20  ;;  %v4423_v42 = vpop.eup %4422 }
 0x341   : > { %v2885_v37 = vpop.permute.xlu0 %2884 }
 0x342   : > { %v2972_v8 = vadd.f32 %v2885_v37, %v2652_v46  ;;  %3070 = vrot.lane.b32.xlu1 %v4423_v42, %s4541_s20 }
 0x343   : > { %v2887_v29 = vpop.permute.xlu1 %2886 }
 0x344   : > { %4428 = vtanh.f32 %v2972_v8  ;;  %3396 = vrot.lane.b32.xlu0 %v2972_v8, %s4543_s9  ;;  %v2973_v21 = vadd.f32 %v2887_v29, %v2653_v51 }
 0x346   : > { %v4425_v47 = vpop.eup %4424  ;;  %4430 = vtanh.f32 %v2973_v21  ;;  %3398 = vrot.lane.b32.xlu1 %v2973_v21, %s4543_s9 }
 0x348   : > { %3072 = vrot.lane.b32.xlu0 %v4425_v47, %s4541_s20  ;;  %v4427_v18 = vpop.eup %4426 }
 0x349   : > { %v2889_v30 = vpop.permute.xlu0 %2888 }
 0x34a   : > { %v2974_v53 = vadd.f32 %v2889_v30, %v2654_v55  ;;  %3074 = vrot.lane.b32.xlu1 %v4427_v18, %s4541_s20 }
 0x34b   : > { %v2891_v40 = vpop.permute.xlu1 %2890 }
 0x34c   : > { %4432 = vtanh.f32 %v2974_v53  ;;  %3400 = vrot.lane.b32.xlu0 %v2974_v53, %s4543_s9  ;;  %v2975_v63 = vadd.f32 %v2891_v40, %v2655_v34 }
 0x34e   : > { %v4429_v13 = vpop.eup %4428  ;;  %4434 = vtanh.f32 %v2975_v63  ;;  %3402 = vrot.lane.b32.xlu1 %v2975_v63, %s4543_s9 }
 0x350   : > { %3076 = vrot.lane.b32.xlu0 %v4429_v13, %s4541_s20  ;;  %v4431_v17 = vpop.eup %4430 }
 0x351   : > { %v2893_v23 = vpop.permute.xlu0 %2892 }
 0x352   : > { %v2976_v46 = vadd.f32 %v2893_v23, %v2656_v62  ;;  %3078 = vrot.lane.b32.xlu1 %v4431_v17, %s4541_s20 }
 0x353   : > { %v2895_v42 = vpop.permute.xlu1 %2894 }
 0x354   : > { %4436 = vtanh.f32 %v2976_v46  ;;  %3404 = vrot.lane.b32.xlu0 %v2976_v46, %s4543_s9  ;;  %v2977_v37 = vadd.f32 %v2895_v42, %v2657_v14 }
 0x356   : > { %v4433_v8 = vpop.eup %4432  ;;  %4438 = vtanh.f32 %v2977_v37  ;;  %3406 = vrot.lane.b32.xlu1 %v2977_v37, %s4543_s9 }
 0x358   : > { %3080 = vrot.lane.b32.xlu0 %v4433_v8, %s4541_s20  ;;  %v4435_v51 = vpop.eup %4434 }
 0x359   : > { %v2897_v29 = vpop.permute.xlu0 %2896 }
 0x35a   : > { %v2978_v21 = vadd.f32 %v2897_v29, %v2658_v36  ;;  %3082 = vrot.lane.b32.xlu1 %v4435_v51, %s4541_s20  ;;  %v2665_v51 = vmul.f32 %v6048_v35, %v6512_v60 }
 0x35b   : > { %v2899_v47 = vpop.permute.xlu1 %2898 }
 0x35c   : > { %4440 = vtanh.f32 %v2978_v21  ;;  %3408 = vrot.lane.b32.xlu0 %v2978_v21, %s4543_s9  ;;  %v2979_v55 = vadd.f32 %v2899_v47, %v2659_v54  ;;  %v2666_v47 = vmul.f32 %v6054_v59, %v6513_v9 }
 0x35e   : > { %v4437_v18 = vpop.eup %4436  ;;  %4442 = vtanh.f32 %v2979_v55  ;;  %3410 = vrot.lane.b32.xlu1 %v2979_v55, %s4543_s9 }
 0x360   : > { %3084 = vrot.lane.b32.xlu0 %v4437_v18, %s4541_s20  ;;  %v4439_v30 = vpop.eup %4438 }
 0x361   : > { %v2901_v53 = vpop.permute.xlu0 %2900 }
 0x362   : > { %v2980_v34 = vadd.f32 %v2901_v53, %v2660_v56  ;;  %3086 = vrot.lane.b32.xlu1 %v4439_v30, %s4541_s20  ;;  %v6514_v30 = vld [vmem:[#allocation8_spill] sm:$0xff] }
 0x363   : > { %v2903_v40 = vpop.permute.xlu1 %2902  ;;  %v2667_v53 = vmul.f32 %v6058_v39, %v6514_v30  ;;  %v2673_v30 = vmul.f32 %v6083_v26, %v5924_v6 }
 0x364   : > { %4444 = vtanh.f32 %v2980_v34  ;;  %3412 = vrot.lane.b32.xlu0 %v2980_v34, %s4543_s9  ;;  %v2981_v63 = vadd.f32 %v2903_v40, %v2661_v19 }
 0x366   : > { %v4441_v13 = vpop.eup %4440  ;;  %4446 = vtanh.f32 %v2981_v63  ;;  %3414 = vrot.lane.b32.xlu1 %v2981_v63, %s4543_s9  ;;  %v6515_v63 = vld [vmem:[#allocation9_spill] sm:$0xff] }
 0x368   : > { %3088 = vrot.lane.b32.xlu0 %v4441_v13, %s4541_s20  ;;  %v4443_v62 = vpop.eup %4442  ;;  %v2668_v13 = vmul.f32 %v6064_v27, %v6515_v63 }
 0x369   : > { %v2905_v17 = vpop.permute.xlu0 %2904 }
 0x36a   : > { %v2982_v23 = vadd.f32 %v2905_v17, %v2662_v22  ;;  %3090 = vrot.lane.b32.xlu1 %v4443_v62, %s4541_s20 }
 0x36b   : > { %v2907_v46 = vpop.permute.xlu1 %2906 }
 0x36c   : > { %4448 = vtanh.f32 %v2982_v23  ;;  %3416 = vrot.lane.b32.xlu0 %v2982_v23, %s4543_s9  ;;  %v2983_v14 = vadd.f32 %v2907_v46, %v2663_v10  ;;  %v6516_v23 = vld [vmem:[#allocation10_spill] sm:$0xff] }
 0x36d   : > { %v2669_v10 = vmul.f32 %v6067_v0, %v6516_v23 }
 0x36e   : > { %v4445_v42 = vpop.eup %4444  ;;  %4450 = vtanh.f32 %v2983_v14  ;;  %3418 = vrot.lane.b32.xlu1 %v2983_v14, %s4543_s9 }
 0x370   : > { %3092 = vrot.lane.b32.xlu0 %v4445_v42, %s4541_s20  ;;  %v4447_v37 = vpop.eup %4446 }
 0x371   : > { %v2909_v8 = vpop.permute.xlu0 %2908 }
 0x372   : > { %v2984_v36 = vadd.f32 %v2909_v8, %v2664_v57  ;;  %3094 = vrot.lane.b32.xlu1 %v4447_v37, %s4541_s20  ;;  %v6517_v57 = vld [vmem:[#allocation11_spill] sm:$0xff] }
 0x373   : > { %v2911_v29 = vpop.permute.xlu1 %2910  ;;  %v2670_v37 = vmul.f32 %v6072_v43, %v6517_v57 }
 0x374   : > { %4452 = vtanh.f32 %v2984_v36  ;;  %3420 = vrot.lane.b32.xlu0 %v2984_v36, %s4543_s9  ;;  %v2985_v21 = vadd.f32 %v2911_v29, %v2665_v51  ;;  %v6518_v51 = vld [vmem:[#allocation12_spill] sm:$0xff] }
 0x375   : > { %v2671_v29 = vmul.f32 %v6075_v3, %v6518_v51 }
 0x376   : > { %v4449_v54 = vpop.eup %4448  ;;  %4454 = vtanh.f32 %v2985_v21  ;;  %3422 = vrot.lane.b32.xlu1 %v2985_v21, %s4543_s9 }
 0x378   : > { %3096 = vrot.lane.b32.xlu0 %v4449_v54, %s4541_s20  ;;  %v4451_v55 = vpop.eup %4450 }
 0x379   : > { %v2913_v18 = vpop.permute.xlu0 %2912 }
 0x37a   : > { %v2986_v56 = vadd.f32 %v2913_v18, %v2666_v47  ;;  %3098 = vrot.lane.b32.xlu1 %v4451_v55, %s4541_s20  ;;  %v2672_v47 = vmul.f32 %v6080_v25, %v5919_v41 }
 0x37b   : > { %v2915_v34 = vpop.permute.xlu1 %2914 }
 0x37c   : > { %4456 = vtanh.f32 %v2986_v56  ;;  %3424 = vrot.lane.b32.xlu0 %v2986_v56, %s4543_s9  ;;  %v2987_v19 = vadd.f32 %v2915_v34, %v2667_v53 }
 0x37e   : > { %v4453_v40 = vpop.eup %4452  ;;  %4458 = vtanh.f32 %v2987_v19  ;;  %3426 = vrot.lane.b32.xlu1 %v2987_v19, %s4543_s9 }
 0x380   : > { %3100 = vrot.lane.b32.xlu0 %v4453_v40, %s4541_s20  ;;  %v4455_v22 = vpop.eup %4454  ;;  %v2674_v40 = vmul.f32 %v6093_v45, %v5931_v15 }
 0x381   : > { %v2917_v62 = vpop.permute.xlu0 %2916 }
 0x382   : > { %v2988_v17 = vadd.f32 %v2917_v62, %v2668_v13  ;;  %3102 = vrot.lane.b32.xlu1 %v4455_v22, %s4541_s20  ;;  %v6519_v62 = vld [vmem:[#allocation13_spill] sm:$0xff] }
 0x383   : > { %v2919_v46 = vpop.permute.xlu1 %2918 }
 0x384   : > { %4460 = vtanh.f32 %v2988_v17  ;;  %3428 = vrot.lane.b32.xlu0 %v2988_v17, %s4543_s9  ;;  %v2989_v14 = vadd.f32 %v2919_v46, %v2669_v10  ;;  %v2675_v17 = vmul.f32 %v6097_v11, %v6519_v62 }
 0x386   : > { %v4457_v42 = vpop.eup %4456  ;;  %4462 = vtanh.f32 %v2989_v14  ;;  %3430 = vrot.lane.b32.xlu1 %v2989_v14, %s4543_s9 }
 0x388   : > { %3104 = vrot.lane.b32.xlu0 %v4457_v42, %s4541_s20  ;;  %v4459_v8 = vpop.eup %4458 }
 0x389   : > { %v2921_v36 = vpop.permute.xlu0 %2920 }
 0x38a   : > { %v2990_v60 = vadd.f32 %v2921_v36, %v2670_v37  ;;  %3106 = vrot.lane.b32.xlu1 %v4459_v8, %s4541_s20 }
 0x38b   : > { %v2923_v21 = vpop.permute.xlu1 %2922 }
 0x38c   : > { %4464 = vtanh.f32 %v2990_v60  ;;  %3432 = vrot.lane.b32.xlu0 %v2990_v60, %s4543_s9  ;;  %v2991_v54 = vadd.f32 %v2923_v21, %v2671_v29 }
 0x38e   : > { %v4461_v9 = vpop.eup %4460  ;;  %4466 = vtanh.f32 %v2991_v54  ;;  %3434 = vrot.lane.b32.xlu1 %v2991_v54, %s4543_s9 }
 0x390   : > { %3108 = vrot.lane.b32.xlu0 %v4461_v9, %s4541_s20  ;;  %v4463_v55 = vpop.eup %4462 }
 0x391   : > { %v2925_v18 = vpop.permute.xlu0 %2924 }
 0x392   : > { %v2992_v56 = vadd.f32 %v2925_v18, %v2672_v47  ;;  %3110 = vrot.lane.b32.xlu1 %v4463_v55, %s4541_s20 }
 0x394   : > { %4468 = vtanh.f32 %v2992_v56  ;;  %v2927_v53 = vpop.permute.xlu1 %2926  ;;  %3436 = vrot.lane.b32.xlu0 %v2992_v56, %s4543_s9 }
 0x395   : > { %v2993_v41 = vadd.f32 %v2927_v53, %v2673_v30 }
 0x396   : > { %v4465_v34 = vpop.eup %4464  ;;  %v3381_v19 = vpop.permute.xlu0 %3380 }
 0x397   : > { %4470 = vtanh.f32 %v2993_v41  ;;  %3476 = vst.msk [vmem:[%s6214_s13] sm:$0xff] %vm496_vm0, %v3381_v19  ;;  %3438 = vrot.lane.b32.xlu1 %v2993_v41, %s4543_s9 }
 0x398   : > { %3112 = vrot.lane.b32.xlu0 %v4465_v34, %s4541_s20  ;;  %v4467_v6 = vpop.eup %4466  ;;  %v3383_v63 = vpop.permute.xlu1 %3382 }
 0x399   : > { %3477 = vst.msk [vmem:[%s6214_s13 + $0x8] sm:$0xff] %vm496_vm0, %v3383_v63 }
 0x39a   : > { %v2929_v13 = vpop.permute.xlu0 %2928 }
 0x39b   : > { %v6225_v22 = vadd.f32 %v2929_v13, %v2674_v40  ;;  %3114 = vrot.lane.b32.xlu1 %v4467_v6, %s4541_s20 }
 0x39c   : > { %v2931_v23 = vpop.permute.xlu1 %2930 }
 0x39d   : > { %4472 = vtanh.f32 %v6225_v22  ;;  %v6231_v46 = vadd.f32 %v2931_v23, %v2675_v17 }
 0x39e   : > { %v4469_v10 = vpop.eup %4468  ;;  %v3385_v15 = vpop.permute.xlu0 %3384 }
 0x39f   : > { %3478 = vst.msk [vmem:[%s6214_s13 + $0x10] sm:$0xff] %vm496_vm0, %v3385_v15  ;;  %3116 = vrot.lane.b32.xlu0 %v4469_v10, %s4541_s20  ;;  %4474 = vtanh.f32 %v6231_v46 }
 0x3a0   : > { %v3387_v42 = vpop.permute.xlu1 %3386 }
 0x3a1   : > { %v4471_v14 = vpop.eup %4470  ;;  %3479 = vst.msk [vmem:[%s6214_s13 + $0x18] sm:$0xff] %vm496_vm0, %v3387_v42 }
 0x3a2   : > { %3118 = vrot.lane.b32.xlu1 %v4471_v14, %s4541_s20  ;;  %v3061_v57 = vpop.permute.xlu0 %3060 }
 0x3a3   : > { %v3156_v37 = vmul.f32 %v5939_v38, %v3061_v57 }
 0x3a4   : > { %v3063_v8 = vpop.permute.xlu1 %3062 }
 0x3a5   : > { %3220 = vrot.lane.b32.xlu0 %v3156_v37, %s4542_s17  ;;  %v3157_v36 = vmul.f32 %v5946_v50, %v3063_v8 }
 0x3a6   : > { %v3389_v60 = vpop.permute.xlu0 %3388 }
 0x3a7   : > { %v4473_v51 = vpop.eup %4472  ;;  %3480 = vst.msk [vmem:[%s6214_s13 + $0x20] sm:$0xff] %vm496_vm0, %v3389_v60  ;;  %3222 = vrot.lane.b32.xlu1 %v3157_v36, %s4542_s17 }
 0x3a8   : > { %v3391_v29 = vpop.permute.xlu1 %3390 }
 0x3a9   : > { %3120 = vrot.lane.b32.xlu0 %v4473_v51, %s4541_s20  ;;  %v4475_v21 = vpop.eup %4474  ;;  %3481 = vst.msk [vmem:[%s6214_s13 + $0x28] sm:$0xff] %vm496_vm0, %v3391_v29 }
 0x3aa   : > { %v3065_v38 = vpop.permute.xlu0 %3064 }
 0x3ab   : > { %v3158_v54 = vmul.f32 %v5951_v2, %v3065_v38  ;;  %3122 = vrot.lane.b32.xlu1 %v4475_v21, %s4541_s20  ;;  %s3645_s20 = sshll.u32 %s273_s14, 8 }
 0x3ac   : > { %v3067_v50 = vpop.permute.xlu1 %3066  ;;  %s6357_s15 = scalar_lea.vmem [#allocation3], %s3645_s20 }
 0x3ad   : > { %3224 = vrot.lane.b32.xlu0 %v3158_v54, %s4542_s17  ;;  %v3159_v9 = vmul.f32 %v5958_v58, %v3067_v50  ;;  %s3527_s12 = sshll.u32 %s6357_s15, 4  ;;  %s6436_s12 = int_to_ptr.vmem [resolvable:$true] %s3527_s12 }
 0x3ae   : > { %v3393_v47 = vpop.permute.xlu0 %3392  ;;  %s4476_s26 = scalar_lea.vmem %s6436_s12, 4096  ;;  %p4483_p0 = scmp.lt.s32.totalorder %s6436_s12, %s4481_s29 }
 0x3af   : > { %3482 = vst.msk [vmem:[%s6214_s13 + $0x30] sm:$0xff] %vm496_vm0, %v3393_v47  ;;  %3226 = vrot.lane.b32.xlu1 %v3159_v9, %s4542_s17  ;;  %p4477_p11 = scmp.ne.s32.totalorder %s6436_s12, %s4476_s26 }
 0x3b0   : > { %v3395_v55 = vpop.permute.xlu1 %3394 }
 0x3b1   : > { %3483 = vst.msk [vmem:[%s6214_s13 + $0x38] sm:$0xff] %vm496_vm0, %v3395_v55  ;;  %p4478_p12 = pnand %p4477_p11, %p4620_p5 }
 0x3b2   : > { %v3069_v18 = vpop.permute.xlu0 %3068 }
 0x3b3   : > { %v3160_v2 = vmul.f32 %v5964_v33, %v3069_v18  ;;  %p4479_p13 = pneg %p4478_p12 }
 0x3b4   : > { %v3071_v56 = vpop.permute.xlu1 %3070 }
 0x3b5   : > { %3228 = vrot.lane.b32.xlu0 %v3160_v2, %s4542_s17  ;;  %v3161_v30 = vmul.f32 %v5968_v16, %v3071_v56 }
 0x3b6   : > { %v3397_v53 = vpop.permute.xlu0 %3396 }
 0x3b7   : > { %3484 = vst.msk [vmem:[%s6214_s13 + $0x40] sm:$0xff] %vm496_vm0, %v3397_v53  ;;  %3230 = vrot.lane.b32.xlu1 %v3161_v30, %s4542_s17 }
 0x3b8   : > { %v3399_v58 = vpop.permute.xlu1 %3398 }
 0x3b9   : > { %3485 = vst.msk [vmem:[%s6214_s13 + $0x48] sm:$0xff] %vm496_vm0, %v3399_v58 }
 0x3ba   : > { %v3073_v41 = vpop.permute.xlu0 %3072 }
 0x3bb   : > { %v3162_v34 = vmul.f32 %v5974_v28, %v3073_v41 }
 0x3bc   : > { %v3075_v19 = vpop.permute.xlu1 %3074 }
 0x3bd   : > { %3232 = vrot.lane.b32.xlu0 %v3162_v34, %s4542_s17  ;;  %v3163_v33 = vmul.f32 %v5978_v5, %v3075_v19 }
 0x3be   : > { %v3401_v6 = vpop.permute.xlu0 %3400 }
 0x3bf   : > { %3486 = vst.msk [vmem:[%s6214_s13 + $0x50] sm:$0xff] %vm496_vm0, %v3401_v6  ;;  %3234 = vrot.lane.b32.xlu1 %v3163_v33, %s4542_s17 }
 0x3c0   : > { %v3403_v16 = vpop.permute.xlu1 %3402 }
 0x3c1   : > { %3487 = vst.msk [vmem:[%s6214_s13 + $0x58] sm:$0xff] %vm496_vm0, %v3403_v16 }
 0x3c2   : > { %v3077_v40 = vpop.permute.xlu0 %3076 }
 0x3c3   : > { %v3164_v63 = vmul.f32 %v5984_v4, %v3077_v40 }
 0x3c4   : > { %v3079_v13 = vpop.permute.xlu1 %3078 }
 0x3c5   : > { %3236 = vrot.lane.b32.xlu0 %v3164_v63, %s4542_s17  ;;  %v3165_v28 = vmul.f32 %v5988_v31, %v3079_v13 }
 0x3c6   : > { %v3405_v62 = vpop.permute.xlu0 %3404 }
 0x3c7   : > { %3488 = vst.msk [vmem:[%s6214_s13 + $0x60] sm:$0xff] %vm496_vm0, %v3405_v62  ;;  %3238 = vrot.lane.b32.xlu1 %v3165_v28, %s4542_s17 }
 0x3c8   : > { %v3407_v5 = vpop.permute.xlu1 %3406 }
 0x3c9   : > { %3489 = vst.msk [vmem:[%s6214_s13 + $0x68] sm:$0xff] %vm496_vm0, %v3407_v5 }
 0x3ca   : > { %v3081_v17 = vpop.permute.xlu0 %3080 }
 0x3cb   : > { %v3166_v23 = vmul.f32 %v5994_v48, %v3081_v17 }
 0x3cc   : > { %v3083_v10 = vpop.permute.xlu1 %3082 }
 0x3cd   : > { %3240 = vrot.lane.b32.xlu0 %v3166_v23, %s4542_s17  ;;  %v3167_v4 = vmul.f32 %v5998_v1, %v3083_v10 }
 0x3ce   : > { %v3409_v15 = vpop.permute.xlu0 %3408 }
 0x3cf   : > { %3490 = vst.msk [vmem:[%s6214_s13 + $0x70] sm:$0xff] %vm496_vm0, %v3409_v15  ;;  %3242 = vrot.lane.b32.xlu1 %v3167_v4, %s4542_s17 }
 0x3d0   : > { %v3411_v31 = vpop.permute.xlu1 %3410 }
 0x3d1   : > { %3491 = vst.msk [vmem:[%s6214_s13 + $0x78] sm:$0xff] %vm496_vm0, %v3411_v31 }
 0x3d2   : > { %v3085_v14 = vpop.permute.xlu0 %3084 }
 0x3d3   : > { %v3168_v42 = vmul.f32 %v6004_v44, %v3085_v14 }
 0x3d4   : > { %v3087_v57 = vpop.permute.xlu1 %3086 }
 0x3d5   : > { %3244 = vrot.lane.b32.xlu0 %v3168_v42, %s4542_s17  ;;  %v3169_v48 = vmul.f32 %v6008_v61, %v3087_v57 }
 0x3d6   : > { %v3413_v37 = vpop.permute.xlu0 %3412 }
 0x3d7   : > { %3492 = vst.msk [vmem:[%s6214_s13 + $0x80] sm:$0xff] %vm496_vm0, %v3413_v37  ;;  %3246 = vrot.lane.b32.xlu1 %v3169_v48, %s4542_s17 }
 0x3d8   : > { %v3415_v1 = vpop.permute.xlu1 %3414 }
 0x3d9   : > { %3493 = vst.msk [vmem:[%s6214_s13 + $0x88] sm:$0xff] %vm496_vm0, %v3415_v1 }
 0x3da   : > { %v3089_v8 = vpop.permute.xlu0 %3088 }
 0x3db   : > { %v3170_v36 = vmul.f32 %v6014_v24, %v3089_v8 }
 0x3dc   : > { %v3091_v60 = vpop.permute.xlu1 %3090 }
 0x3dd   : > { %3248 = vrot.lane.b32.xlu0 %v3170_v36, %s4542_s17  ;;  %v3171_v44 = vmul.f32 %v6018_v12, %v3091_v60 }
 0x3de   : > { %v3417_v51 = vpop.permute.xlu0 %3416 }
 0x3df   : > { %3494 = vst.msk [vmem:[%s6214_s13 + $0x90] sm:$0xff] %vm496_vm0, %v3417_v51  ;;  %3250 = vrot.lane.b32.xlu1 %v3171_v44, %s4542_s17 }
 0x3e0   : > { %v3419_v61 = vpop.permute.xlu1 %3418 }
 0x3e1   : > { %3495 = vst.msk [vmem:[%s6214_s13 + $0x98] sm:$0xff] %vm496_vm0, %v3419_v61 }
 0x3e2   : > { %v3093_v29 = vpop.permute.xlu0 %3092 }
 0x3e3   : > { %v3172_v21 = vmul.f32 %v6024_v52, %v3093_v29 }
 0x3e4   : > { %v3095_v38 = vpop.permute.xlu1 %3094 }
 0x3e5   : > { %3252 = vrot.lane.b32.xlu0 %v3172_v21, %s4542_s17  ;;  %v3173_v24 = vmul.f32 %v6028_v20, %v3095_v38 }
 0x3e6   : > { %v3421_v54 = vpop.permute.xlu0 %3420 }
 0x3e7   : > { %3496 = vst.msk [vmem:[%s6214_s13 + $0xa0] sm:$0xff] %vm496_vm0, %v3421_v54  ;;  %3254 = vrot.lane.b32.xlu1 %v3173_v24, %s4542_s17 }
 0x3e8   : > { %v3423_v12 = vpop.permute.xlu1 %3422 }
 0x3e9   : > { %3497 = vst.msk [vmem:[%s6214_s13 + $0xa8] sm:$0xff] %vm496_vm0, %v3423_v12 }
 0x3ea   : > { %v3097_v50 = vpop.permute.xlu0 %3096 }
 0x3eb   : > { %v3174_v9 = vmul.f32 %v6034_v49, %v3097_v50 }
 0x3ec   : > { %v3099_v47 = vpop.permute.xlu1 %3098 }
 0x3ed   : > { %3256 = vrot.lane.b32.xlu0 %v3174_v9, %s4542_s17  ;;  %v3175_v52 = vmul.f32 %v6038_v32, %v3099_v47 }
 0x3ee   : > { %v3425_v55 = vpop.permute.xlu0 %3424 }
 0x3ef   : > { %3498 = vst.msk [vmem:[%s6214_s13 + $0xb0] sm:$0xff] %vm496_vm0, %v3425_v55  ;;  %3258 = vrot.lane.b32.xlu1 %v3175_v52, %s4542_s17 }
 0x3f0   : > { %v3427_v20 = vpop.permute.xlu1 %3426 }
 0x3f1   : > { %3499 = vst.msk [vmem:[%s6214_s13 + $0xb8] sm:$0xff] %vm496_vm0, %v3427_v20 }
 0x3f2   : > { %v3101_v18 = vpop.permute.xlu0 %3100 }
 0x3f3   : > { %v3176_v2 = vmul.f32 %v6044_v7, %v3101_v18 }
 0x3f4   : > { %v3103_v56 = vpop.permute.xlu1 %3102 }
 0x3f5   : > { %3260 = vrot.lane.b32.xlu0 %v3176_v2, %s4542_s17  ;;  %v3177_v49 = vmul.f32 %v6048_v35, %v3103_v56 }
 0x3f6   : > { %v3429_v30 = vpop.permute.xlu0 %3428 }
 0x3f7   : > { %3500 = vst.msk [vmem:[%s6214_s13 + $0xc0] sm:$0xff] %vm496_vm0, %v3429_v30  ;;  %3262 = vrot.lane.b32.xlu1 %v3177_v49, %s4542_s17 }
 0x3f8   : > { %v3431_v32 = vpop.permute.xlu1 %3430 }
 0x3f9   : > { %3501 = vst.msk [vmem:[%s6214_s13 + $0xc8] sm:$0xff] %vm496_vm0, %v3431_v32 }
 0x3fa   : > { %v3105_v53 = vpop.permute.xlu0 %3104 }
 0x3fb   : > { %v3178_v58 = vmul.f32 %v6054_v59, %v3105_v53 }
 0x3fc   : > { %v3107_v41 = vpop.permute.xlu1 %3106 }
 0x3fd   : > { %3264 = vrot.lane.b32.xlu0 %v3178_v58, %s4542_s17  ;;  %v3179_v7 = vmul.f32 %v6058_v39, %v3107_v41 }
 0x3fe   : > { %v3433_v34 = vpop.permute.xlu0 %3432 }
 0x3ff   : > { %3502 = vst.msk [vmem:[%s6214_s13 + $0xd0] sm:$0xff] %vm496_vm0, %v3433_v34  ;;  %3266 = vrot.lane.b32.xlu1 %v3179_v7, %s4542_s17 }
 0x400   : > { %v3435_v35 = vpop.permute.xlu1 %3434 }
 0x401   : > { %3503 = vst.msk [vmem:[%s6214_s13 + $0xd8] sm:$0xff] %vm496_vm0, %v3435_v35 }
 0x402   : > { %v3109_v19 = vpop.permute.xlu0 %3108 }
 0x403   : > { %v3180_v33 = vmul.f32 %v6064_v27, %v3109_v19 }
 0x404   : > { %v3111_v6 = vpop.permute.xlu1 %3110 }
 0x405   : > { %3268 = vrot.lane.b32.xlu0 %v3180_v33, %s4542_s17  ;;  %v3181_v59 = vmul.f32 %v6067_v0, %v3111_v6 }
 0x406   : > { %v3437_v16 = vpop.permute.xlu0 %3436 }
 0x407   : > { %3504 = vst.msk [vmem:[%s6214_s13 + $0xe0] sm:$0xff] %vm496_vm0, %v3437_v16  ;;  %3270 = vrot.lane.b32.xlu1 %v3181_v59, %s4542_s17 }
 0x409   : > { %v3439_v39 = vpop.permute.xlu1 %3438 }
 0x40a   : > { %3505 = vst.msk [vmem:[%s6214_s13 + $0xe8] sm:$0xff] %vm496_vm0, %v3439_v39  ;;  %v3113_v40 = vpop.permute.xlu0 %3112 }
 0x40b   : > { %v3182_v63 = vmul.f32 %v6072_v43, %v3113_v40 }
 0x40d   : > { %v3115_v13 = vpop.permute.xlu1 %3114  ;;  %3272 = vrot.lane.b32.xlu0 %v3182_v63, %s4542_s17 }
 0x40e   : > { %v3183_v27 = vmul.f32 %v6075_v3, %v3115_v13 }
 0x410   : > { %3274 = vrot.lane.b32.xlu1 %v3183_v27, %s4542_s17 }
 0x411   : > { %v3117_v0 = vpop.permute.xlu0 %3116 }
 0x412   : > { %v3184_v28 = vmul.f32 %v6080_v25, %v3117_v0 }
 0x414   : > { %v3119_v62 = vpop.permute.xlu1 %3118  ;;  %3276 = vrot.lane.b32.xlu0 %v3184_v28, %s4542_s17 }
 0x415   : > { %v3185_v5 = vmul.f32 %v6083_v26, %v3119_v62 }
 0x417   : > { %3278 = vrot.lane.b32.xlu1 %v3185_v5, %s4542_s17  ;;  %v3221_v43 = vpop.permute.xlu0 %3220 }
 0x418   : > { %3316 = vst.msk [vmem:[%s6357_s15] sm:$0xff] %vm496_vm0, %v3221_v43 }
 0x419   : > { %v3223_v3 = vpop.permute.xlu1 %3222 }
 0x41a   : > { %3317 = vst.msk [vmem:[%s6357_s15 + $0x8] sm:$0xff] %vm496_vm0, %v3223_v3 }
 0x41b   : > { %v3121_v25 = vpop.permute.xlu0 %3120 }
 0x41c   : > { %v3186_v17 = vmul.f32 %v6093_v45, %v3121_v25 }
 0x41d   : > { %v3123_v26 = vpop.permute.xlu1 %3122 }
 0x41e   : > { %3280 = vrot.lane.b32.xlu0 %v3186_v17, %s4542_s17  ;;  %v3187_v23 = vmul.f32 %v6097_v11, %v3123_v26 }
 0x41f   : > { %v3225_v10 = vpop.permute.xlu0 %3224 }
 0x420   : > { %3318 = vst.msk [vmem:[%s6357_s15 + $0x10] sm:$0xff] %vm496_vm0, %v3225_v10  ;;  %3282 = vrot.lane.b32.xlu1 %v3187_v23, %s4542_s17  ;;  %s3826_s17 = sshll.u32 %s4603_s25, 12  ;;  %s6444_s25 = scalar_lea.sflag [#allocation4], %s273_s14 }
 0x421   : > { %v3227_v4 = vpop.permute.xlu1 %3226  ;;  %s6434_s19 = scalar_lea.hbm %s6492_s5, %s3826_s17 }
 0x422   : > { %3440 = vrot.lane.b32.xlu0 %v6225_v22, %s4543_s9  ;;  %3319 = vst.msk [vmem:[%s6357_s15 + $0x18] sm:$0xff] %vm496_vm0, %v3227_v4 }
 0x424   : > { %3442 = vrot.lane.b32.xlu1 %v6231_v46, %s4543_s9  ;;  %s4482_s9 = scalar_lea.vmem %s4481_s29, 8192 }
 0x425   : > { %p4484_p1 = scmp.lt.s32.totalorder %s4482_s9, %s4476_s26 }
 0x427   : > { %v3229_v45 = vpop.permute.xlu0 %3228  ;;  %p4485_p2 = por %p4484_p1, %p4483_p0 }
 0x428   : > { %3320 = vst.msk [vmem:[%s6357_s15 + $0x20] sm:$0xff] %vm496_vm0, %v3229_v45 }
 0x429   : > { %v3231_v11 = vpop.permute.xlu1 %3230  ;;  %p4486_p3 = pnand %p4485_p2, %p4479_p13 }
 0x42a   : > { %3321 = vst.msk [vmem:[%s6357_s15 + $0x28] sm:$0xff] %vm496_vm0, %v3231_v11 }
 0x42f   : > { %v3233_v15 = vpop.permute.xlu0 %3232 }
 0x430   : > { %3322 = vst.msk [vmem:[%s6357_s15 + $0x30] sm:$0xff] %vm496_vm0, %v3233_v15 }
 0x431   : > { %v3235_v22 = vpop.permute.xlu1 %3234 }
 0x432   : > { %3323 = vst.msk [vmem:[%s6357_s15 + $0x38] sm:$0xff] %vm496_vm0, %v3235_v22 }
 0x437   : > { %v3237_v31 = vpop.permute.xlu0 %3236 }
 0x438   : > { %3324 = vst.msk [vmem:[%s6357_s15 + $0x40] sm:$0xff] %vm496_vm0, %v3237_v31 }
 0x439   : > { %v3239_v46 = vpop.permute.xlu1 %3238 }
 0x43a   : > { %3325 = vst.msk [vmem:[%s6357_s15 + $0x48] sm:$0xff] %vm496_vm0, %v3239_v46 }
 0x43f   : > { %v3241_v14 = vpop.permute.xlu0 %3240 }
 0x440   : > { %3326 = vst.msk [vmem:[%s6357_s15 + $0x50] sm:$0xff] %vm496_vm0, %v3241_v14 }
 0x441   : > { %v3243_v42 = vpop.permute.xlu1 %3242 }
 0x442   : > { %3327 = vst.msk [vmem:[%s6357_s15 + $0x58] sm:$0xff] %vm496_vm0, %v3243_v42 }
 0x447   : > { %v3245_v57 = vpop.permute.xlu0 %3244 }
 0x448   : > { %3328 = vst.msk [vmem:[%s6357_s15 + $0x60] sm:$0xff] %vm496_vm0, %v3245_v57 }
 0x449   : > { %v3247_v48 = vpop.permute.xlu1 %3246 }
 0x44a   : > { %3329 = vst.msk [vmem:[%s6357_s15 + $0x68] sm:$0xff] %vm496_vm0, %v3247_v48 }
 0x44f   : > { %v3249_v37 = vpop.permute.xlu0 %3248 }
 0x450   : > { %3330 = vst.msk [vmem:[%s6357_s15 + $0x70] sm:$0xff] %vm496_vm0, %v3249_v37 }
 0x451   : > { %v3251_v1 = vpop.permute.xlu1 %3250 }
 0x452   : > { %3331 = vst.msk [vmem:[%s6357_s15 + $0x78] sm:$0xff] %vm496_vm0, %v3251_v1 }
 0x457   : > { %v3253_v8 = vpop.permute.xlu0 %3252 }
 0x458   : > { %3332 = vst.msk [vmem:[%s6357_s15 + $0x80] sm:$0xff] %vm496_vm0, %v3253_v8 }
 0x459   : > { %v3255_v36 = vpop.permute.xlu1 %3254 }
 0x45a   : > { %3333 = vst.msk [vmem:[%s6357_s15 + $0x88] sm:$0xff] %vm496_vm0, %v3255_v36 }
 0x45f   : > { %v3257_v60 = vpop.permute.xlu0 %3256 }
 0x460   : > { %3334 = vst.msk [vmem:[%s6357_s15 + $0x90] sm:$0xff] %vm496_vm0, %v3257_v60 }
 0x461   : > { %v3259_v44 = vpop.permute.xlu1 %3258 }
 0x462   : > { %3335 = vst.msk [vmem:[%s6357_s15 + $0x98] sm:$0xff] %vm496_vm0, %v3259_v44 }
 0x467   : > { %v3261_v51 = vpop.permute.xlu0 %3260 }
 0x468   : > { %3336 = vst.msk [vmem:[%s6357_s15 + $0xa0] sm:$0xff] %vm496_vm0, %v3261_v51 }
 0x469   : > { %v3263_v61 = vpop.permute.xlu1 %3262 }
 0x46a   : > { %3337 = vst.msk [vmem:[%s6357_s15 + $0xa8] sm:$0xff] %vm496_vm0, %v3263_v61 }
 0x46f   : > { %v3265_v29 = vpop.permute.xlu0 %3264 }
 0x470   : > { %3338 = vst.msk [vmem:[%s6357_s15 + $0xb0] sm:$0xff] %vm496_vm0, %v3265_v29 }
 0x471   : > { %v3267_v21 = vpop.permute.xlu1 %3266 }
 0x472   : > { %3339 = vst.msk [vmem:[%s6357_s15 + $0xb8] sm:$0xff] %vm496_vm0, %v3267_v21 }
 0x477   : > { %v3269_v38 = vpop.permute.xlu0 %3268 }
 0x478   : > { %3340 = vst.msk [vmem:[%s6357_s15 + $0xc0] sm:$0xff] %vm496_vm0, %v3269_v38 }
 0x479   : > { %v3271_v24 = vpop.permute.xlu1 %3270 }
 0x47a   : > { %3341 = vst.msk [vmem:[%s6357_s15 + $0xc8] sm:$0xff] %vm496_vm0, %v3271_v24 }
 0x47f   : > { %v3273_v54 = vpop.permute.xlu0 %3272 }
 0x480   : > { %3342 = vst.msk [vmem:[%s6357_s15 + $0xd0] sm:$0xff] %vm496_vm0, %v3273_v54 }
 0x482   : > { %v3275_v12 = vpop.permute.xlu1 %3274 }
 0x483   : > { %3343 = vst.msk [vmem:[%s6357_s15 + $0xd8] sm:$0xff] %vm496_vm0, %v3275_v12 }
 0x486   : > { %v3277_v50 = vpop.permute.xlu0 %3276 }
 0x487   : > { %3344 = vst.msk [vmem:[%s6357_s15 + $0xe0] sm:$0xff] %vm496_vm0, %v3277_v50 }
 0x489   : > { %v3279_v9 = vpop.permute.xlu1 %3278 }
 0x48a   : > { %3345 = vst.msk [vmem:[%s6357_s15 + $0xe8] sm:$0xff] %vm496_vm0, %v3279_v9 }
 0x490   : > { %v3281_v47 = vpop.permute.xlu0 %3280 }
 0x491   : > { %3346 = vst.msk [vmem:[%s6357_s15 + $0xf0] sm:$0xff] %vm496_vm0, %v3281_v47 }
 0x492   : > { %v3283_v52 = vpop.permute.xlu1 %3282 }
 0x493   : > { %3347 = vst.msk [vmem:[%s6357_s15 + $0xf8] sm:$0xff] %vm496_vm0, %v3283_v52 }
 0x494   : > { %v3441_v55 = vpop.permute.xlu0 %3440 }
 0x495   : > { %3506 = vst.msk [vmem:[%s6214_s13 + $0xf0] sm:$0xff] %vm496_vm0, %v3441_v55 }
 0x496   : > { %4489 = shalt.err (!%p4486_p3)
}
 0x497   : > { %s4490_s10 = scalar_lea.hbm %s6434_s19, 4096  ;;  %s4494_s20 = scalar_lea.hbm %s6492_s5, 8192 }
 0x498   : > { %p4491_p4 = scmp.ne.s32.totalorder %s6434_s19, %s4490_s10  ;;  %p4495_p9 = scmp.lt.u32.totalorder %s6434_s19, %s6492_s5 }
 0x499   : > { %p4496_p10 = scmp.lt.u32.totalorder %s4494_s20, %s4490_s10  ;;  %p4498_p12 = scmp.lt.u32.totalorder %s4490_s10, %s6434_s19 }
 0x49a   : > { %p4492_p7 = pnand %p4491_p4, %p4620_p5 }
 0x49b   : > { %p4497_p11 = por %p4496_p10, %p4495_p9 }
 0x49c   : > { %p4493_p8 = pneg %p4492_p7 }
 0x49d   : > { %p4499_p13 = por %p4498_p12, %p4497_p11 }
 0x49f   : > { %p4500_p0 = pnand %p4499_p13, %p4493_p8 }
 0x4a1   : > { %4503 = shalt.err (!%p4500_p0)
}
 0x4a2   : > { %s4545_s16 = smov 128   ;;  %s4546_s18 = smov 8   ;;  %v3443_v20 = vpop.permute.xlu1 %3442 }
 0x4a3   : > { %3979 = dma.vmem_to_hbm [thread:$0]  (%p4620_p5), %s6436_s12, 4096, %s6434_s19, %s6444_s25, %s4545_s16, %s4545_s16, %s4546_s18  }
 0x4a4   : > { %3507 = vst.msk [vmem:[%s6214_s13 + $0xf8] sm:$0xff] %vm496_vm0, %v3443_v20 }
 0x4a5 PF: > { %p3985_p1 = scmp.ge.s32.totalorder %s4538_s24, 2  ;;  %s3545_s26 = sand.u32 1, %s4526_s21  }
 0x4a6   : > { %s3546_s28 = scalar_lea.sflag [#allocation4], %s3545_s26 }
 0x4a7   : > { %p3982_p2 = pnand %p3985_p1, %p4624_p6 }
 0x4a9   : > { %4521 = dma.done.wait (!%p3982_p2), %s3546_s28, 4096  }
 0x4aa   : > { %4523 = vsyncadd (!%p3982_p2), %s3546_s28, 4294963200  ;;  %p17_p5 = scmp.ge.s32.totalorder %s4607_s27, 4   ;;  %s6520_s21 = smov %s4530_s22 }
 0x4ab   : > { %s6521_s22 = smov %s4534_s23  ;;  %s6522_s23 = smov %s4618_s30 }
 0x4ac   : > { %s6523_s24 = smov %s4607_s27  ;;  %19 = sbr.rel (!%p17_p5) target bundleno = 3 (0x3), region = 95 }
 0x4b3   :  { %3559 = vsyncpa [#allocation4], 1 }
 0x4b4   :  { %3561 = vsyncpa [#allocation4 + $0x1], 1 }

</bundles_post_ra>
